<compile_context>
chip_gen: v6e
topology: v6e:2x2x1
jax: 0.10.0
libtpu: 0.0.40
codegen_flags: <defaults>
</compile_context>

<pallas_src>
import functools
import math

import jax
import jax.numpy as jnp
from jax import lax
from jax.experimental import pallas as pl
from jax.experimental.pallas import tpu as pltpu

PYRAMID_DIM = 64
DIL_32 = ((1, 3, 3), (1, 6, 6), (1, 9, 9))
DIL_16 = ((1, 4, 4), (1, 8, 8), (1, 12, 12))
# TODO(synk): get_temporal_scales() assumed to return (2, 2, 2), undoing the
# three temporal AvgPools; the specialized x2 upsample below relies on it.


def _round_up(x, m):
    return ((x + m - 1) // m) * m


def _choose_h_tile(H, W, row_cap):
    """Largest divisor th of H with th*W <= row_cap and (th*W) % 8 == 0."""
    cands = [th for th in range(1, H + 1) if H % th == 0 and (th * W) % 8 == 0]
    if not cands:
        # TODO(synk): shapes where no H-divisor gives 8-aligned rows would need
        # output-row padding; the decoder's even-sized maps never hit this.
        return H
    fit = [th for th in cands if th * W <= row_cap]
    return max(fit) if fit else min(cands)


# ----------------------------------------------------------------------------
# Kernel 1: "taps" conv — 3x3x3 / dilated convs (and whole folded pyramids) as
# ONE K-packed bf16 GEMM per tile on a VMEM-resident padded input.
# Grid = (N, T, H-tiles); only valid output rows are produced.
# ----------------------------------------------------------------------------
def _taps_conv_kernel(x_ref, w_ref, b_ref, o_ref, patch_ref, *, shifts, C, th,
                      W, Wp, Tp, Hp, pt, ph, pw, act):
    n = pl.program_id(0)
    t = pl.program_id(1)
    j = pl.program_id(2)
    slab = th * Wp
    base = ((n * Tp + t + pt) * Hp + (j * th + ph)) * Wp + pw

    # im2col patch: one contiguous shifted slab read per tap (static shift,
    # unrolled), cast to bf16, staged into lane-group k*C of the packed patch.
    for k, s in enumerate(shifts):
        sl = x_ref[pl.ds(base + s, slab), :]                     # (slab, C) f32
        patch_ref[0:slab, k * C:(k + 1) * C] = sl.astype(jnp.bfloat16)

    # single K-packed bf16 GEMM (K = ntaps*C), f32 accumulation on the MXU
    y = jnp.dot(patch_ref[...], w_ref[...], preferred_element_type=jnp.float32)
    y = y + b_ref[...]
    if act == "relu":
        y = jnp.maximum(y, 0.0)

    # keep only the W valid output columns of each of the th h-rows
    for r in range(th):
        o_ref[r * W:(r + 1) * W, :] = y[r * Wp:r * Wp + W, :].astype(o_ref.dtype)


def taps_conv(x_cl, offsets, w_taps, b, act="none", out_dtype=jnp.bfloat16,
              row_cap=512):
    """Conv with arbitrary integer (t,h,w) tap offsets, channels-last input.

    x_cl: [N,T,H,W,C] (any float dtype); w_taps: [ntaps*C, O] bf16 (tap-major,
    same offset order); b: [O] f32.
    NOTE: the padded input is held fully resident in VMEM (fine for decoder
    scale maps); very large maps would need halo-blocked DMA.  # TODO(synk)
    """
    N, T, H, W, C = map(int, x_cl.shape)
    ntaps = len(offsets)
    O = int(w_taps.shape[1])
    assert int(w_taps.shape[0]) == ntaps * C

    pt = max(abs(o[0]) for o in offsets)
    ph = max(abs(o[1]) for o in offsets)
    pw = max(abs(o[2]) for o in offsets)
    Hp, Wp = H + 2 * ph, W + 2 * pw
    Tp = T + 2 * pt + 1            # +1 trailing guard frame (slab reads of the
                                   # last tile may run a few rows past the end)
    xpad = jnp.pad(x_cl.astype(jnp.float32),
                   ((0, 0), (pt, pt + 1), (ph, ph), (pw, pw), (0, 0)))
    Mflat = N * Tp * Hp * Wp
    flat = xpad.reshape(Mflat, C)

    th = _choose_h_tile(H, W, row_cap)
    n_ht = H // th
    rows_out = th * W
    slab_pad = _round_up(th * Wp, 16)
    shifts = tuple(ot * Hp * Wp + oh * Wp + ow for (ot, oh, ow) in offsets)
    Ktot = ntaps * C
    M_out = N * T * H * W
    b2 = b.reshape(1, O).astype(jnp.float32)

    out = pl.pallas_call(
        functools.partial(_taps_conv_kernel, shifts=shifts, C=C, th=th, W=W,
                          Wp=Wp, Tp=Tp, Hp=Hp, pt=pt, ph=ph, pw=pw, act=act),
        out_shape=jax.ShapeDtypeStruct((M_out, O), out_dtype),
        grid_spec=pltpu.PrefetchScalarGridSpec(
            num_scalar_prefetch=0,
            grid=(N, T, n_ht),
            in_specs=[
                pl.BlockSpec((Mflat, C), lambda n, t, j: (0, 0)),   # resident
                pl.BlockSpec((Ktot, O), lambda n, t, j: (0, 0)),
                pl.BlockSpec((1, O), lambda n, t, j: (0, 0)),
            ],
            out_specs=pl.BlockSpec(
                (rows_out, O), lambda n, t, j: ((n * T + t) * n_ht + j, 0)),
            scratch_shapes=[pltpu.VMEM((slab_pad, Ktot), jnp.bfloat16)],
        ),
        compiler_params=pltpu.CompilerParams(
            dimension_semantics=("parallel", "parallel", "parallel"),
            vmem_limit_bytes=32 * 1024 * 1024),
    )(flat, w_taps, b2)
    return out.reshape(N, T, H, W, O)


# ----------------------------------------------------------------------------
# Kernel 2: fused concat + 1x1 conv (bias-free), bf16 operands, f32 accumulate.
# ----------------------------------------------------------------------------
def _concat_1x1_kernel(x1_ref, x2_ref, w_ref, o_ref, *, c1):
    y = jnp.dot(x1_ref[...], w_ref[0:c1, :], preferred_element_type=jnp.float32)
    y = y + jnp.dot(x2_ref[...], w_ref[c1:, :],
                    preferred_element_type=jnp.float32)
    o_ref[...] = y.astype(o_ref.dtype)


def fused_concat_1x1(x1, x2, w, out_dtype=jnp.bfloat16, row_cap=512):
    lead = x1.shape[:-1]
    assert tuple(x2.shape[:-1]) == tuple(lead)
    M = int(math.prod(lead))
    c1, c2 = int(x1.shape[-1]), int(x2.shape[-1])
    O = int(w.shape[1])
    a = x1.reshape(M, c1).astype(jnp.bfloat16)
    bm = x2.reshape(M, c2).astype(jnp.bfloat16)

    if M <= row_cap:
        tm, Mp = M, M
    else:
        tm = None
        for cand in range(min(row_cap, M), 7, -1):
            if cand % 8 == 0 and M % cand == 0:
                tm = cand
                break
        if tm is None:                      # fallback: pad to a clean tile
            tm = 256
            Mp = _round_up(M, tm)
            a = jnp.pad(a, ((0, Mp - M), (0, 0)))
            bm = jnp.pad(bm, ((0, Mp - M), (0, 0)))
        else:
            Mp = M

    out = pl.pallas_call(
        functools.partial(_concat_1x1_kernel, c1=c1),
        out_shape=jax.ShapeDtypeStruct((Mp, O), out_dtype),
        grid_spec=pltpu.PrefetchScalarGridSpec(
            num_scalar_prefetch=0,
            grid=(Mp // tm,),
            in_specs=[pl.BlockSpec((tm, c1), lambda i: (i, 0)),
                      pl.BlockSpec((tm, c2), lambda i: (i, 0)),
                      pl.BlockSpec((c1 + c2, O), lambda i: (0, 0))],
            out_specs=pl.BlockSpec((tm, O), lambda i: (i, 0))),
        compiler_params=pltpu.CompilerParams(dimension_semantics=("parallel",)),
    )(a, bm, w)
    if Mp != M:
        out = out[:M]
    return out.reshape(*lead, O)


# ----------------------------------------------------------------------------
# Kernel 3: fused conv_4 + decoder head.  conv_4 (1x1, no bias) is folded into
# the packed head weight, so one GEMM produces
# [embedding (tanh(0.25*x)+offset) | variance (+bias) | seediness (sigmoid)].
# Grid = (N, T, H-tiles): exact integer spatiotemporal offsets from program_id.
# ----------------------------------------------------------------------------
def _divmod_small(r, d):
    # exact for 0 <= r < 2**24 (here r < th*W <= 1024): f32 reciprocal + fixup
    q = jnp.floor(r.astype(jnp.float32) * (1.0 / d)).astype(jnp.int32)
    rem = r - q * d
    q = jnp.where(rem < 0, q - 1, q)
    rem = jnp.where(rem < 0, rem + d, rem)
    q = jnp.where(rem >= d, q + 1, q)
    rem = jnp.where(rem >= d, rem - d, rem)
    return q, rem


def _conv4_head_kernel(x1_ref, x2_ref, w_ref, b_ref, o_ref, *, c1, E, V,
                       has_seed, tanh_act, th, W, H, T, time_scale):
    t = pl.program_id(1)
    j = pl.program_id(2)
    rows = th * W

    y = jnp.dot(x1_ref[...], w_ref[0:c1, :], preferred_element_type=jnp.float32)
    y = y + jnp.dot(x2_ref[...], w_ref[c1:, :],
                    preferred_element_type=jnp.float32)
    y = y + b_ref[...]                 # packed bias: zero outside variance slots

    emb = y[:, 0:E]
    if tanh_act:
        emb = jnp.tanh(emb * 0.25)

    # TODO(synk): add_spatiotemporal_offset is external to the prompt; assumed to
    # add normalized (x, y, t*time_scale) grids to embedding channels 0..2.
    r = lax.broadcasted_iota(jnp.int32, (rows, 1), 0)
    hi, wi = _divmod_small(r, W)
    fx = (wi.astype(jnp.float32) + 0.5) * (1.0 / W)
    fy = ((j * th + hi).astype(jnp.float32) + 0.5) * (1.0 / H)
    ft = (t.astype(jnp.float32) + 0.5) * (1.0 / T) * time_scale
    col = lax.broadcasted_iota(jnp.int32, (rows, E), 1)
    off = jnp.where(col == 0, fx,
                    jnp.where(col == 1, fy,
                              jnp.where(col == 2, ft, 0.0)))

    o_ref[:, 0:E] = emb + off
    o_ref[:, E:E + V] = y[:, E:E + V]
    if has_seed:
        ys = y[:, E + V:E + V + 1]
        o_ref[:, E + V:E + V + 1] = 1.0 / (1.0 + jnp.exp(-ys))   # exact sigmoid


def fused_conv4_head(x_up, x4, w_packed, b_packed, *, E, has_seed, tanh_act,
                     time_scale=1.0, row_cap=256):
    N, T, H, W, c1 = map(int, x_up.shape)
    c2 = int(x4.shape[-1])
    assert tuple(x4.shape[:4]) == (N, T, H, W)
    OUT = int(w_packed.shape[1])
    V = OUT - E - (1 if has_seed else 0)
    th = _choose_h_tile(H, W, row_cap)
    n_ht = H // th
    rows = th * W
    M = N * T * H * W
    x1 = x_up.reshape(M, c1).astype(jnp.bfloat16)
    x2 = x4.reshape(M, c2).astype(jnp.bfloat16)

    out = pl.pallas_call(
        functools.partial(_conv4_head_kernel, c1=c1, E=E, V=V,
                          has_seed=has_seed, tanh_act=tanh_act, th=th, W=W,
                          H=H, T=T, time_scale=float(time_scale)),
        out_shape=jax.ShapeDtypeStruct((M, OUT), jnp.float32),
        grid_spec=pltpu.PrefetchScalarGridSpec(
            num_scalar_prefetch=0,
            grid=(N, T, n_ht),
            in_specs=[
                pl.BlockSpec((rows, c1),
                             lambda n, t, j: ((n * T + t) * n_ht + j, 0)),
                pl.BlockSpec((rows, c2),
                             lambda n, t, j: ((n * T + t) * n_ht + j, 0)),
                pl.BlockSpec((c1 + c2, OUT), lambda n, t, j: (0, 0)),
                pl.BlockSpec((1, OUT), lambda n, t, j: (0, 0)),
            ],
            out_specs=pl.BlockSpec(
                (rows, OUT), lambda n, t, j: ((n * T + t) * n_ht + j, 0))),
        compiler_params=pltpu.CompilerParams(
            dimension_semantics=("parallel", "parallel", "parallel")),
    )(x1, x2, w_packed, b_packed)
    return out.reshape(N, T, H, W, OUT)


# ----------------------------------------------------------------------------
# XLA glue (negligible FLOPs): avg-pool / specialized x2 trilinear upsample.
# ----------------------------------------------------------------------------
def avg_pool3d_cl(x, ksize, stride, padding, out_dtype=jnp.bfloat16):
    """PyTorch AvgPool3d semantics (count_include_pad=True, floor mode)."""
    kt, kh, kw = ksize
    st, sh, sw = stride
    pt, ph, pw = padding
    xp = jnp.pad(x.astype(jnp.float32),
                 ((0, 0), (pt, pt), (ph, ph), (pw, pw), (0, 0)))
    s = lax.reduce_window(xp, 0.0, lax.add,
                          window_dimensions=(1, kt, kh, kw, 1),
                          window_strides=(1, st, sh, sw, 1),
                          padding="VALID")
    return (s * (1.0 / float(kt * kh * kw))).astype(out_dtype)


def _upsample2_axis(x, axis):
    """x2 linear upsample, align_corners=False, via slices (no gathers)."""
    size = x.shape[axis]
    if size == 1:
        return jnp.concatenate([x, x], axis=axis)
    first = lax.slice_in_dim(x, 0, 1, axis=axis)
    last = lax.slice_in_dim(x, size - 1, size, axis=axis)
    xl = lax.concatenate([first, lax.slice_in_dim(x, 0, size - 1, axis=axis)],
                         axis)
    xr = lax.concatenate([lax.slice_in_dim(x, 1, size, axis=axis), last], axis)
    even = 0.75 * x + 0.25 * xl
    odd = 0.75 * x + 0.25 * xr
    y = jnp.stack([even, odd], axis=axis + 1)
    shape = list(x.shape)
    shape[axis] = 2 * size
    return y.reshape(shape)


def upsample2x_cl(x, out_dtype=jnp.bfloat16):
    """Trilinear upsample by (2,2,2), align_corners=False.  x: [N,T,H,W,C]."""
    x = x.astype(jnp.float32)
    x = _upsample2_axis(x, 1)
    x = _upsample2_axis(x, 2)
    x = _upsample2_axis(x, 3)
    return x.astype(out_dtype)


# ----------------------------------------------------------------------------
# Tap-offset enumerations (static, shared by weight prep and forward)
# ----------------------------------------------------------------------------
def _conv3_offsets():
    return tuple((it - 1, ih - 1, iw - 1)
                 for it in range(3) for ih in range(3) for iw in range(3))


def _pyramid_offsets(dilations):
    offs = {(0, 0, 0)}                       # 1x1 branch
    for (dt, dh, dw) in dilations:
        for it in (-1, 0, 1):
            for ih in (-1, 0, 1):
                for iw in (-1, 0, 1):
                    offs.add((it * dt, ih * dh, iw * dw))
    return tuple(sorted(offs))


# ----------------------------------------------------------------------------
# Raw parameter init (PyTorch layout, shapes follow the module __init__)
# ----------------------------------------------------------------------------
class ParamGen:
    def __init__(self, seed):
        self._key = jax.random.PRNGKey(seed)

    def _next(self):
        self._key, k = jax.random.split(self._key)
        return k

    def conv3d(self, out_ch, in_ch, k, bias=True):
        fan_in = in_ch * k[0] * k[1] * k[2]
        scale = 1.0 / math.sqrt(fan_in)
        w = jax.random.uniform(self._next(), (out_ch, in_ch) + tuple(k),
                               jnp.float32, -scale, scale)
        b = (jax.random.uniform(self._next(), (out_ch,), jnp.float32,
                                -scale, scale) if bias else None)
        return {"w": w, "b": b}


def _init_ap(pg, in_ch, pyramid_dim, n_dil, out_ch):
    # TODO(synk): AtrousPyramid3D definition not given in the prompt; assumed
    # 1x1 conv + one dilated 3x3x3 conv per rate -> concat -> 1x1 out conv (+bias).
    return {
        "conv1x1": pg.conv3d(pyramid_dim, in_ch, (1, 1, 1)),
        "dil": [pg.conv3d(pyramid_dim, in_ch, (3, 3, 3)) for _ in range(n_dil)],
        "out": pg.conv3d(out_ch, pyramid_dim * (n_dil + 1), (1, 1, 1)),
    }


def init_decoder_params(in_channels, inter_channels, embedding_size,
                        seediness_output=True, seed=0):
    pg = ParamGen(seed)
    params = {}
    params["block_32x"] = [
        _init_ap(pg, in_channels, PYRAMID_DIM, 3, inter_channels[0]),
        _init_ap(pg, inter_channels[0], PYRAMID_DIM, 3, inter_channels[0]),
        _init_ap(pg, inter_channels[0], PYRAMID_DIM, 3, inter_channels[0]),
    ]
    # block_16x: both pyramids declared with `in_channels` inputs (verbatim from
    # the reference module) -> requires in_channels == inter_channels[1]
    params["block_16x"] = [
        _init_ap(pg, in_channels, PYRAMID_DIM, 3, inter_channels[1]),
        _init_ap(pg, in_channels, PYRAMID_DIM, 3, inter_channels[1]),
    ]
    params["block_8x"] = pg.conv3d(inter_channels[2], in_channels, (3, 3, 3))
    params["block_4x"] = pg.conv3d(inter_channels[3], in_channels, (3, 3, 3))
    params["conv_16"] = pg.conv3d(inter_channels[1],
                                  inter_channels[0] + inter_channels[1],
                                  (1, 1, 1), bias=False)
    params["conv_8"] = pg.conv3d(inter_channels[2],
                                 inter_channels[1] + inter_channels[2],
                                 (1, 1, 1), bias=False)
    params["conv_4"] = pg.conv3d(inter_channels[3],
                                 inter_channels[2] + inter_channels[3],
                                 (1, 1, 1), bias=False)
    # TODO(synk): assumed get_nb_free_dims(..) == 0, get_nb_embedding_dims(..) == embedding_size
    variance_channels = embedding_size - 0
    params["conv_embedding"] = pg.conv3d(embedding_size, inter_channels[-1],
                                         (1, 1, 1), bias=False)
    params["conv_variance"] = pg.conv3d(variance_channels, inter_channels[-1],
                                        (1, 1, 1), bias=True)
    if seediness_output:
        params["conv_seediness"] = pg.conv3d(1, inter_channels[-1],
                                             (1, 1, 1), bias=False)
    return params


# ----------------------------------------------------------------------------
# One-time weight preparation (pre-transpose / pack / pre-compose, bf16)
# ----------------------------------------------------------------------------
def _prep_pyramid(p, dilations):
    """Fold (branch convs -> concat -> 1x1 out conv) into one taps-GEMM weight."""
    offsets = _pyramid_offsets(dilations)
    P, C = int(p["conv1x1"]["w"].shape[0]), int(p["conv1x1"]["w"].shape[1])
    O = int(p["out"]["w"].shape[0])
    n_br = len(dilations) + 1
    wout = p["out"]["w"].reshape(O, P * n_br)                  # [O, P*n_br]

    acc = {off: jnp.zeros((C, O), jnp.float32) for off in offsets}
    wo0 = wout[:, :P]                                          # [O, P]
    acc[(0, 0, 0)] = acc[(0, 0, 0)] + p["conv1x1"]["w"].reshape(P, C).T @ wo0.T
    bias = p["conv1x1"]["b"] @ wo0.T
    for bi, (dp, (dt, dh, dw)) in enumerate(zip(p["dil"], dilations)):
        wo = wout[:, P * (bi + 1):P * (bi + 2)]
        bias = bias + dp["b"] @ wo.T
        wb = dp["w"]                                           # [P, C, 3, 3, 3]
        for it in range(3):
            for ih in range(3):
                for iw in range(3):
                    off = ((it - 1) * dt, (ih - 1) * dh, (iw - 1) * dw)
                    acc[off] = acc[off] + wb[:, :, it, ih, iw].T @ wo.T
    bias = bias + p["out"]["b"]
    w_st = jnp.concatenate([acc[o] for o in offsets], axis=0)  # [ntaps*C, O]
    return {"w": w_st.astype(jnp.bfloat16), "b": bias.astype(jnp.float32)}


def _prep_conv3(cw, cb):
    O, C = int(cw.shape[0]), int(cw.shape[1])
    mats = [cw[:, :, it, ih, iw].T
            for it in range(3) for ih in range(3) for iw in range(3)]
    w_st = jnp.concatenate(mats, axis=0)                       # [27*C, O]
    b = cb if cb is not None else jnp.zeros((O,), jnp.float32)
    return {"w": w_st.astype(jnp.bfloat16), "b": b.astype(jnp.float32)}


def _prep_1x1(cw):
    O, Cin = int(cw.shape[0]), int(cw.shape[1])
    return {"w": cw.reshape(O, Cin).T.astype(jnp.bfloat16)}


def _prep_head(raw, seediness):
    """Fold conv_4 (1x1, no bias) into the packed embedding/variance/seediness GEMM."""
    w4 = raw["conv_4"]["w"]
    c4o, c4i = int(w4.shape[0]), int(w4.shape[1])
    w4m = w4.reshape(c4o, c4i).T.astype(jnp.float32)            # (c4i, c4o)
    w_emb = raw["conv_embedding"]["w"]
    w_var = raw["conv_variance"]["w"]
    E, V = int(w_emb.shape[0]), int(w_var.shape[0])
    mats = [w_emb.reshape(E, c4o).T, w_var.reshape(V, c4o).T]
    biases = [jnp.zeros((E,), jnp.float32),
              raw["conv_variance"]["b"].astype(jnp.float32)]
    if seediness:
        mats.append(raw["conv_seediness"]["w"].reshape(1, c4o).T)
        biases.append(jnp.zeros((1,), jnp.float32))
    w_head = jnp.concatenate(mats, axis=1).astype(jnp.float32)  # (c4o, OUT)
    w_total = (w4m @ w_head).astype(jnp.bfloat16)               # (c4i, OUT)
    b_packed = jnp.concatenate(biases).reshape(1, -1).astype(jnp.float32)
    return {"w": w_total, "b": b_packed}


def prepare_decoder_params(raw, seediness_output=True):
    prep = {}
    prep["block_32x"] = [_prep_pyramid(p, DIL_32) for p in raw["block_32x"]]
    prep["block_16x"] = [_prep_pyramid(p, DIL_16) for p in raw["block_16x"]]
    prep["block_8x"] = _prep_conv3(raw["block_8x"]["w"], raw["block_8x"]["b"])
    prep["block_4x"] = _prep_conv3(raw["block_4x"]["w"], raw["block_4x"]["b"])
    prep["conv_16"] = _prep_1x1(raw["conv_16"]["w"])
    prep["conv_8"] = _prep_1x1(raw["conv_8"]["w"])
    prep["head"] = _prep_head(raw, seediness_output)
    return prep


# ----------------------------------------------------------------------------
# Forward pass
# ----------------------------------------------------------------------------
def decoder_forward(prep, feats, *, embedding_size, tanh_activation=True,
                    seediness=True, time_scale=1.0):
    """feats: 4 NCTHW f32 feature maps (32x, 16x, 8x, 4x).  Returns NCTHW f32."""
    f32x, f16x, f8x, f4x = [jnp.transpose(f, (0, 2, 3, 4, 1)).astype(jnp.float32)
                            for f in feats]

    # ---- block_32x: 3 x (fused AtrousPyramid3D -> ReLU -> temporal AvgPool) ----
    x32 = f32x
    for p in prep["block_32x"]:
        x32 = taps_conv(x32, _pyramid_offsets(DIL_32), p["w"], p["b"],
                        act="relu", out_dtype=jnp.bfloat16)
        x32 = avg_pool3d_cl(x32, (3, 1, 1), (2, 1, 1), (1, 0, 0),
                            out_dtype=jnp.bfloat16)
    x = upsample2x_cl(x32)

    # ---- block_16x: 2 x (fused AtrousPyramid3D -> ReLU -> temporal AvgPool) ----
    x16 = f16x
    for p in prep["block_16x"]:
        x16 = taps_conv(x16, _pyramid_offsets(DIL_16), p["w"], p["b"],
                        act="relu", out_dtype=jnp.bfloat16)
        x16 = avg_pool3d_cl(x16, (3, 1, 1), (2, 1, 1), (1, 0, 0),
                            out_dtype=jnp.bfloat16)
    x = fused_concat_1x1(x, x16, prep["conv_16"]["w"], out_dtype=jnp.bfloat16)
    x = upsample2x_cl(x)

    # ---- block_8x: Conv3d(3, pad 1) -> ReLU -> AvgPool3d(3, (2,1,1), pad 1) ----
    x8 = taps_conv(f8x, _conv3_offsets(), prep["block_8x"]["w"],
                   prep["block_8x"]["b"], act="relu", out_dtype=jnp.bfloat16)
    x8 = avg_pool3d_cl(x8, (3, 3, 3), (2, 1, 1), (1, 1, 1),
                       out_dtype=jnp.bfloat16)
    x = fused_concat_1x1(x, x8, prep["conv_8"]["w"], out_dtype=jnp.bfloat16)
    x = upsample2x_cl(x)

    # ---- block_4x: Conv3d(3, pad 1) -> ReLU ----
    x4 = taps_conv(f4x, _conv3_offsets(), prep["block_4x"]["w"],
                   prep["block_4x"]["b"], act="relu", out_dtype=jnp.bfloat16)

    # ---- fused conv_4 + head: embedding / variance / seediness ----
    out = fused_conv4_head(x, x4, prep["head"]["w"], prep["head"]["b"],
                           E=embedding_size, has_seed=seediness,
                           tanh_act=tanh_activation, time_scale=time_scale)
    return jnp.transpose(out, (0, 4, 1, 2, 3))          # -> NCTHW


# ----------------------------------------------------------------------------
if __name__ == "__main__":
    # NOTE: the reference module declares block_16x's second pyramid with
    # `in_channels` inputs, so in_channels must equal inter_channels[1].
    in_channels = 16
    inter_channels = (16, 16, 16, 16)
    embedding_size = 4

    raw = init_decoder_params(in_channels, inter_channels, embedding_size,
                              seediness_output=True, seed=0)
    prep = prepare_decoder_params(raw, seediness_output=True)

    # --- numerical self-check: K-packed bf16 taps GEMM vs XLA conv (bf16-rounded
    #     operands so only accumulation order differs) ---
    xc = jax.random.normal(jax.random.PRNGKey(1), (1, in_channels, 4, 8, 8),
                           jnp.float32)
    xc_bf = xc.astype(jnp.bfloat16).astype(jnp.float32)
    w_bf = raw["block_4x"]["w"].astype(jnp.bfloat16).astype(jnp.float32)
    ref = lax.conv_general_dilated(
        xc_bf, w_bf, window_strides=(1, 1, 1),
        padding=((1, 1), (1, 1), (1, 1)),
        dimension_numbers=("NCDHW", "OIDHW", "NCDHW"),
        precision=lax.Precision.HIGHEST)
    ref = jnp.maximum(ref + raw["block_4x"]["b"].reshape(1, -1, 1, 1, 1), 0.0)
    got = taps_conv(jnp.transpose(xc_bf, (0, 2, 3, 4, 1)), _conv3_offsets(),
                    prep["block_4x"]["w"], prep["block_4x"]["b"],
                    act="relu", out_dtype=jnp.float32)
    got = jnp.transpose(got, (0, 4, 1, 2, 3))
    max_err = float(jnp.max(jnp.abs(ref - got)))
    assert max_err < 2e-3, max_err

    key = jax.random.PRNGKey(0)
    k32, k16, k8, k4 = jax.random.split(key, 4)
    N, T = 1, 8
    feat_32 = jax.random.normal(k32, (N, in_channels, T, 4, 4), jnp.float32)
    feat_16 = jax.random.normal(k16, (N, in_channels, T, 8, 8), jnp.float32)
    feat_8 = jax.random.normal(k8, (N, in_channels, T, 16, 16), jnp.float32)
    feat_4 = jax.random.normal(k4, (N, in_channels, T, 32, 32), jnp.float32)

    fwd = jax.jit(functools.partial(decoder_forward,
                                    embedding_size=embedding_size,
                                    tanh_activation=True, seediness=True,
                                    time_scale=1.0))
    out = fwd(prep, (feat_32, feat_16, feat_8, feat_4))
    out = jax.block_until_ready(out)

    # embedding(4) + variance(4) + seediness(1) = 9 channels at the 4x map size
    assert out.shape == (N, 9, T, 32, 32), out.shape
    assert bool(jnp.all(jnp.isfinite(out)))
    print("KERNEL_OK")
</pallas_src>

<mosaic_0001>
module attributes {stable_mosaic.version = 11 : i64} {
  func.func @_taps_conv_kernel(%arg0: i32, %arg1: i32, %arg2: i32, %arg3: memref<700x16xf32, #tpu.memory_space<vmem>>, %arg4: memref<432x16xbf16, #tpu.memory_space<vmem>>, %arg5: memref<1x16xf32, #tpu.memory_space<vmem>>, %arg6: memref<64x16xf32, #tpu.memory_space<vmem>>, %arg7: memref<80x432xbf16, #tpu.memory_space<vmem>>) attributes {dimension_semantics = [#tpu.dimension_semantics<parallel>, #tpu.dimension_semantics<parallel>, #tpu.dimension_semantics<parallel>], iteration_bounds = array<i64: 1, 4, 1>, scalar_prefetch = 0 : i64, scratch_operands = 1 : i64, tpu.core_type = #tpu.core_type<tc>, window_params = [{pipeline_mode = #tpu.pipeline_mode<synchronous>, transform_indices = @transform_0, window_bounds = array<i64: 700, 16>}, {pipeline_mode = #tpu.pipeline_mode<synchronous>, transform_indices = @transform_1, window_bounds = array<i64: 432, 16>}, {pipeline_mode = #tpu.pipeline_mode<synchronous>, transform_indices = @transform_2, window_bounds = array<i64: 1, 16>}, {transform_indices = @transform_3, window_bounds = array<i64: 64, 16>}]} {
    %c7_i32 = arith.constant 7 : i32
    %0 = arith.muli %arg0, %c7_i32 : i32
    %1 = arith.addi %0, %arg1 : i32
    %c1_i32 = arith.constant 1 : i32
    %2 = arith.addi %1, %c1_i32 : i32
    %c10_i32 = arith.constant 10 : i32
    %3 = arith.muli %2, %c10_i32 : i32
    %c8_i32 = arith.constant 8 : i32
    %4 = arith.muli %arg2, %c8_i32 : i32
    %c1_i32_0 = arith.constant 1 : i32
    %5 = arith.addi %4, %c1_i32_0 : i32
    %6 = arith.addi %3, %5 : i32
    %c10_i32_1 = arith.constant 10 : i32
    %7 = arith.muli %6, %c10_i32_1 : i32
    %c1_i32_2 = arith.constant 1 : i32
    %8 = arith.addi %7, %c1_i32_2 : i32
    %c-111_i32 = arith.constant -111 : i32
    %9 = arith.addi %8, %c-111_i32 : i32
    %10 = arith.index_cast %9 : i32 to index
    %c0 = arith.constant 0 : index
    %11 = vector.load %arg3[%10, %c0] : memref<700x16xf32, #tpu.memory_space<vmem>>, vector<80x16xf32>
    %12 = arith.truncf %11 : vector<80x16xf32> to vector<80x16xbf16>
    %c0_3 = arith.constant 0 : index
    %c0_4 = arith.constant 0 : index
    %13 = vector.load %arg7[%c0_3, %c0_4] : memref<80x432xbf16, #tpu.memory_space<vmem>>, vector<80x16xbf16>
    tpu.vector_store %arg7[%c0_3, %c0_4], %12 {strides = array<i32>} : memref<80x432xbf16, #tpu.memory_space<vmem>>, vector<80x16xbf16>,
    %c-110_i32 = arith.constant -110 : i32
    %14 = arith.addi %8, %c-110_i32 : i32
    %15 = arith.index_cast %14 : i32 to index
    %c0_5 = arith.constant 0 : index
    %16 = vector.load %arg3[%15, %c0_5] : memref<700x16xf32, #tpu.memory_space<vmem>>, vector<80x16xf32>
    %17 = arith.truncf %16 : vector<80x16xf32> to vector<80x16xbf16>
    %c0_6 = arith.constant 0 : index
    %c16 = arith.constant 16 : index
    %18 = vector.load %arg7[%c0_6, %c16] : memref<80x432xbf16, #tpu.memory_space<vmem>>, vector<80x16xbf16>
    tpu.vector_store %arg7[%c0_6, %c16], %17 {strides = array<i32>} : memref<80x432xbf16, #tpu.memory_space<vmem>>, vector<80x16xbf16>,
    %c-109_i32 = arith.constant -109 : i32
    %19 = arith.addi %8, %c-109_i32 : i32
    %20 = arith.index_cast %19 : i32 to index
    %c0_7 = arith.constant 0 : index
    %21 = vector.load %arg3[%20, %c0_7] : memref<700x16xf32, #tpu.memory_space<vmem>>, vector<80x16xf32>
    %22 = arith.truncf %21 : vector<80x16xf32> to vector<80x16xbf16>
    %c0_8 = arith.constant 0 : index
    %c32 = arith.constant 32 : index
    %23 = vector.load %arg7[%c0_8, %c32] : memref<80x432xbf16, #tpu.memory_space<vmem>>, vector<80x16xbf16>
    tpu.vector_store %arg7[%c0_8, %c32], %22 {strides = array<i32>} : memref<80x432xbf16, #tpu.memory_space<vmem>>, vector<80x16xbf16>,
    %c-101_i32 = arith.constant -101 : i32
    %24 = arith.addi %8, %c-101_i32 : i32
    %25 = arith.index_cast %24 : i32 to index
    %c0_9 = arith.constant 0 : index
    %26 = vector.load %arg3[%25, %c0_9] : memref<700x16xf32, #tpu.memory_space<vmem>>, vector<80x16xf32>
    %27 = arith.truncf %26 : vector<80x16xf32> to vector<80x16xbf16>
    %c0_10 = arith.constant 0 : index
    %c48 = arith.constant 48 : index
    %28 = vector.load %arg7[%c0_10, %c48] : memref<80x432xbf16, #tpu.memory_space<vmem>>, vector<80x16xbf16>
    tpu.vector_store %arg7[%c0_10, %c48], %27 {strides = array<i32>} : memref<80x432xbf16, #tpu.memory_space<vmem>>, vector<80x16xbf16>,
    %c-100_i32 = arith.constant -100 : i32
    %29 = arith.addi %8, %c-100_i32 : i32
    %30 = arith.index_cast %29 : i32 to index
    %c0_11 = arith.constant 0 : index
    %31 = vector.load %arg3[%30, %c0_11] : memref<700x16xf32, #tpu.memory_space<vmem>>, vector<80x16xf32>
    %32 = arith.truncf %31 : vector<80x16xf32> to vector<80x16xbf16>
    %c0_12 = arith.constant 0 : index
    %c64 = arith.constant 64 : index
    %33 = vector.load %arg7[%c0_12, %c64] : memref<80x432xbf16, #tpu.memory_space<vmem>>, vector<80x16xbf16>
    tpu.vector_store %arg7[%c0_12, %c64], %32 {strides = array<i32>} : memref<80x432xbf16, #tpu.memory_space<vmem>>, vector<80x16xbf16>,
    %c-99_i32 = arith.constant -99 : i32
    %34 = arith.addi %8, %c-99_i32 : i32
    %35 = arith.index_cast %34 : i32 to index
    %c0_13 = arith.constant 0 : index
    %36 = vector.load %arg3[%35, %c0_13] : memref<700x16xf32, #tpu.memory_space<vmem>>, vector<80x16xf32>
    %37 = arith.truncf %36 : vector<80x16xf32> to vector<80x16xbf16>
    %c0_14 = arith.constant 0 : index
    %c80 = arith.constant 80 : index
    %38 = vector.load %arg7[%c0_14, %c80] : memref<80x432xbf16, #tpu.memory_space<vmem>>, vector<80x16xbf16>
    tpu.vector_store %arg7[%c0_14, %c80], %37 {strides = array<i32>} : memref<80x432xbf16, #tpu.memory_space<vmem>>, vector<80x16xbf16>,
    %c-91_i32 = arith.constant -91 : i32
    %39 = arith.addi %8, %c-91_i32 : i32
    %40 = arith.index_cast %39 : i32 to index
    %c0_15 = arith.constant 0 : index
    %41 = vector.load %arg3[%40, %c0_15] : memref<700x16xf32, #tpu.memory_space<vmem>>, vector<80x16xf32>
    %42 = arith.truncf %41 : vector<80x16xf32> to vector<80x16xbf16>
    %c0_16 = arith.constant 0 : index
    %c96 = arith.constant 96 : index
    %43 = vector.load %arg7[%c0_16, %c96] : memref<80x432xbf16, #tpu.memory_space<vmem>>, vector<80x16xbf16>
    tpu.vector_store %arg7[%c0_16, %c96], %42 {strides = array<i32>} : memref<80x432xbf16, #tpu.memory_space<vmem>>, vector<80x16xbf16>,
    %c-90_i32 = arith.constant -90 : i32
    %44 = arith.addi %8, %c-90_i32 : i32
    %45 = arith.index_cast %44 : i32 to index
    %c0_17 = arith.constant 0 : index
    %46 = vector.load %arg3[%45, %c0_17] : memref<700x16xf32, #tpu.memory_space<vmem>>, vector<80x16xf32>
    %47 = arith.truncf %46 : vector<80x16xf32> to vector<80x16xbf16>
    %c0_18 = arith.constant 0 : index
    %c112 = arith.constant 112 : index
    %48 = vector.load %arg7[%c0_18, %c112] : memref<80x432xbf16, #tpu.memory_space<vmem>>, vector<80x16xbf16>
    tpu.vector_store %arg7[%c0_18, %c112], %47 {strides = array<i32>} : memref<80x432xbf16, #tpu.memory_space<vmem>>, vector<80x16xbf16>,
    %c-89_i32 = arith.constant -89 : i32
    %49 = arith.addi %8, %c-89_i32 : i32
    %50 = arith.index_cast %49 : i32 to index
    %c0_19 = arith.constant 0 : index
    %51 = vector.load %arg3[%50, %c0_19] : memref<700x16xf32, #tpu.memory_space<vmem>>, vector<80x16xf32>
    %52 = arith.truncf %51 : vector<80x16xf32> to vector<80x16xbf16>
    %c0_20 = arith.constant 0 : index
    %c128 = arith.constant 128 : index
    %53 = vector.load %arg7[%c0_20, %c128] : memref<80x432xbf16, #tpu.memory_space<vmem>>, vector<80x16xbf16>
    tpu.vector_store %arg7[%c0_20, %c128], %52 {strides = array<i32>} : memref<80x432xbf16, #tpu.memory_space<vmem>>, vector<80x16xbf16>,
    %c-11_i32 = arith.constant -11 : i32
    %54 = arith.addi %8, %c-11_i32 : i32
    %55 = arith.index_cast %54 : i32 to index
    %c0_21 = arith.constant 0 : index
    %56 = vector.load %arg3[%55, %c0_21] : memref<700x16xf32, #tpu.memory_space<vmem>>, vector<80x16xf32>
    %57 = arith.truncf %56 : vector<80x16xf32> to vector<80x16xbf16>
    %c0_22 = arith.constant 0 : index
    %c144 = arith.constant 144 : index
    %58 = vector.load %arg7[%c0_22, %c144] : memref<80x432xbf16, #tpu.memory_space<vmem>>, vector<80x16xbf16>
    tpu.vector_store %arg7[%c0_22, %c144], %57 {strides = array<i32>} : memref<80x432xbf16, #tpu.memory_space<vmem>>, vector<80x16xbf16>,
    %c-10_i32 = arith.constant -10 : i32
    %59 = arith.addi %8, %c-10_i32 : i32
    %60 = arith.index_cast %59 : i32 to index
    %c0_23 = arith.constant 0 : index
    %61 = vector.load %arg3[%60, %c0_23] : memref<700x16xf32, #tpu.memory_space<vmem>>, vector<80x16xf32>
    %62 = arith.truncf %61 : vector<80x16xf32> to vector<80x16xbf16>
    %c0_24 = arith.constant 0 : index
    %c160 = arith.constant 160 : index
    %63 = vector.load %arg7[%c0_24, %c160] : memref<80x432xbf16, #tpu.memory_space<vmem>>, vector<80x16xbf16>
    tpu.vector_store %arg7[%c0_24, %c160], %62 {strides = array<i32>} : memref<80x432xbf16, #tpu.memory_space<vmem>>, vector<80x16xbf16>,
    %c-9_i32 = arith.constant -9 : i32
    %64 = arith.addi %8, %c-9_i32 : i32
    %65 = arith.index_cast %64 : i32 to index
    %c0_25 = arith.constant 0 : index
    %66 = vector.load %arg3[%65, %c0_25] : memref<700x16xf32, #tpu.memory_space<vmem>>, vector<80x16xf32>
    %67 = arith.truncf %66 : vector<80x16xf32> to vector<80x16xbf16>
    %c0_26 = arith.constant 0 : index
    %c176 = arith.constant 176 : index
    %68 = vector.load %arg7[%c0_26, %c176] : memref<80x432xbf16, #tpu.memory_space<vmem>>, vector<80x16xbf16>
    tpu.vector_store %arg7[%c0_26, %c176], %67 {strides = array<i32>} : memref<80x432xbf16, #tpu.memory_space<vmem>>, vector<80x16xbf16>,
    %c-1_i32 = arith.constant -1 : i32
    %69 = arith.addi %8, %c-1_i32 : i32
    %70 = arith.index_cast %69 : i32 to index
    %c0_27 = arith.constant 0 : index
    %71 = vector.load %arg3[%70, %c0_27] : memref<700x16xf32, #tpu.memory_space<vmem>>, vector<80x16xf32>
    %72 = arith.truncf %71 : vector<80x16xf32> to vector<80x16xbf16>
    %c0_28 = arith.constant 0 : index
    %c192 = arith.constant 192 : index
    %73 = vector.load %arg7[%c0_28, %c192] : memref<80x432xbf16, #tpu.memory_space<vmem>>, vector<80x16xbf16>
    tpu.vector_store %arg7[%c0_28, %c192], %72 {strides = array<i32>} : memref<80x432xbf16, #tpu.memory_space<vmem>>, vector<80x16xbf16>,
    %c0_i32 = arith.constant 0 : i32
    %74 = arith.addi %8, %c0_i32 : i32
    %75 = arith.index_cast %74 : i32 to index
    %c0_29 = arith.constant 0 : index
    %76 = vector.load %arg3[%75, %c0_29] : memref<700x16xf32, #tpu.memory_space<vmem>>, vector<80x16xf32>
    %77 = arith.truncf %76 : vector<80x16xf32> to vector<80x16xbf16>
    %c0_30 = arith.constant 0 : index
    %c208 = arith.constant 208 : index
    %78 = vector.load %arg7[%c0_30, %c208] : memref<80x432xbf16, #tpu.memory_space<vmem>>, vector<80x16xbf16>
    tpu.vector_store %arg7[%c0_30, %c208], %77 {strides = array<i32>} : memref<80x432xbf16, #tpu.memory_space<vmem>>, vector<80x16xbf16>,
    %c1_i32_31 = arith.constant 1 : i32
    %79 = arith.addi %8, %c1_i32_31 : i32
    %80 = arith.index_cast %79 : i32 to index
    %c0_32 = arith.constant 0 : index
    %81 = vector.load %arg3[%80, %c0_32] : memref<700x16xf32, #tpu.memory_space<vmem>>, vector<80x16xf32>
    %82 = arith.truncf %81 : vector<80x16xf32> to vector<80x16xbf16>
    %c0_33 = arith.constant 0 : index
    %c224 = arith.constant 224 : index
    %83 = vector.load %arg7[%c0_33, %c224] : memref<80x432xbf16, #tpu.memory_space<vmem>>, vector<80x16xbf16>
    tpu.vector_store %arg7[%c0_33, %c224], %82 {strides = array<i32>} : memref<80x432xbf16, #tpu.memory_space<vmem>>, vector<80x16xbf16>,
    %c9_i32 = arith.constant 9 : i32
    %84 = arith.addi %8, %c9_i32 : i32
    %85 = arith.index_cast %84 : i32 to index
    %c0_34 = arith.constant 0 : index
    %86 = vector.load %arg3[%85, %c0_34] : memref<700x16xf32, #tpu.memory_space<vmem>>, vector<80x16xf32>
    %87 = arith.truncf %86 : vector<80x16xf32> to vector<80x16xbf16>
    %c0_35 = arith.constant 0 : index
    %c240 = arith.constant 240 : index
    %88 = vector.load %arg7[%c0_35, %c240] : memref<80x432xbf16, #tpu.memory_space<vmem>>, vector<80x16xbf16>
    tpu.vector_store %arg7[%c0_35, %c240], %87 {strides = array<i32>} : memref<80x432xbf16, #tpu.memory_space<vmem>>, vector<80x16xbf16>,
    %c10_i32_36 = arith.constant 10 : i32
    %89 = arith.addi %8, %c10_i32_36 : i32
    %90 = arith.index_cast %89 : i32 to index
    %c0_37 = arith.constant 0 : index
    %91 = vector.load %arg3[%90, %c0_37] : memref<700x16xf32, #tpu.memory_space<vmem>>, vector<80x16xf32>
    %92 = arith.truncf %91 : vector<80x16xf32> to vector<80x16xbf16>
    %c0_38 = arith.constant 0 : index
    %c256 = arith.constant 256 : index
    %93 = vector.load %arg7[%c0_38, %c256] : memref<80x432xbf16, #tpu.memory_space<vmem>>, vector<80x16xbf16>
    tpu.vector_store %arg7[%c0_38, %c256], %92 {strides = array<i32>} : memref<80x432xbf16, #tpu.memory_space<vmem>>, vector<80x16xbf16>,
    %c11_i32 = arith.constant 11 : i32
    %94 = arith.addi %8, %c11_i32 : i32
    %95 = arith.index_cast %94 : i32 to index
    %c0_39 = arith.constant 0 : index
    %96 = vector.load %arg3[%95, %c0_39] : memref<700x16xf32, #tpu.memory_space<vmem>>, vector<80x16xf32>
    %97 = arith.truncf %96 : vector<80x16xf32> to vector<80x16xbf16>
    %c0_40 = arith.constant 0 : index
    %c272 = arith.constant 272 : index
    %98 = vector.load %arg7[%c0_40, %c272] : memref<80x432xbf16, #tpu.memory_space<vmem>>, vector<80x16xbf16>
    tpu.vector_store %arg7[%c0_40, %c272], %97 {strides = array<i32>} : memref<80x432xbf16, #tpu.memory_space<vmem>>, vector<80x16xbf16>,
    %c89_i32 = arith.constant 89 : i32
    %99 = arith.addi %8, %c89_i32 : i32
    %100 = arith.index_cast %99 : i32 to index
    %c0_41 = arith.constant 0 : index
    %101 = vector.load %arg3[%100, %c0_41] : memref<700x16xf32, #tpu.memory_space<vmem>>, vector<80x16xf32>
    %102 = arith.truncf %101 : vector<80x16xf32> to vector<80x16xbf16>
    %c0_42 = arith.constant 0 : index
    %c288 = arith.constant 288 : index
    %103 = vector.load %arg7[%c0_42, %c288] : memref<80x432xbf16, #tpu.memory_space<vmem>>, vector<80x16xbf16>
    tpu.vector_store %arg7[%c0_42, %c288], %102 {strides = array<i32>} : memref<80x432xbf16, #tpu.memory_space<vmem>>, vector<80x16xbf16>,
    %c90_i32 = arith.constant 90 : i32
    %104 = arith.addi %8, %c90_i32 : i32
    %105 = arith.index_cast %104 : i32 to index
    %c0_43 = arith.constant 0 : index
    %106 = vector.load %arg3[%105, %c0_43] : memref<700x16xf32, #tpu.memory_space<vmem>>, vector<80x16xf32>
    %107 = arith.truncf %106 : vector<80x16xf32> to vector<80x16xbf16>
    %c0_44 = arith.constant 0 : index
    %c304 = arith.constant 304 : index
    %108 = vector.load %arg7[%c0_44, %c304] : memref<80x432xbf16, #tpu.memory_space<vmem>>, vector<80x16xbf16>
    tpu.vector_store %arg7[%c0_44, %c304], %107 {strides = array<i32>} : memref<80x432xbf16, #tpu.memory_space<vmem>>, vector<80x16xbf16>,
    %c91_i32 = arith.constant 91 : i32
    %109 = arith.addi %8, %c91_i32 : i32
    %110 = arith.index_cast %109 : i32 to index
    %c0_45 = arith.constant 0 : index
    %111 = vector.load %arg3[%110, %c0_45] : memref<700x16xf32, #tpu.memory_space<vmem>>, vector<80x16xf32>
    %112 = arith.truncf %111 : vector<80x16xf32> to vector<80x16xbf16>
    %c0_46 = arith.constant 0 : index
    %c320 = arith.constant 320 : index
    %113 = vector.load %arg7[%c0_46, %c320] : memref<80x432xbf16, #tpu.memory_space<vmem>>, vector<80x16xbf16>
    tpu.vector_store %arg7[%c0_46, %c320], %112 {strides = array<i32>} : memref<80x432xbf16, #tpu.memory_space<vmem>>, vector<80x16xbf16>,
    %c99_i32 = arith.constant 99 : i32
    %114 = arith.addi %8, %c99_i32 : i32
    %115 = arith.index_cast %114 : i32 to index
    %c0_47 = arith.constant 0 : index
    %116 = vector.load %arg3[%115, %c0_47] : memref<700x16xf32, #tpu.memory_space<vmem>>, vector<80x16xf32>
    %117 = arith.truncf %116 : vector<80x16xf32> to vector<80x16xbf16>
    %c0_48 = arith.constant 0 : index
    %c336 = arith.constant 336 : index
    %118 = vector.load %arg7[%c0_48, %c336] : memref<80x432xbf16, #tpu.memory_space<vmem>>, vector<80x16xbf16>
    tpu.vector_store %arg7[%c0_48, %c336], %117 {strides = array<i32>} : memref<80x432xbf16, #tpu.memory_space<vmem>>, vector<80x16xbf16>,
    %c100_i32 = arith.constant 100 : i32
    %119 = arith.addi %8, %c100_i32 : i32
    %120 = arith.index_cast %119 : i32 to index
    %c0_49 = arith.constant 0 : index
    %121 = vector.load %arg3[%120, %c0_49] : memref<700x16xf32, #tpu.memory_space<vmem>>, vector<80x16xf32>
    %122 = arith.truncf %121 : vector<80x16xf32> to vector<80x16xbf16>
    %c0_50 = arith.constant 0 : index
    %c352 = arith.constant 352 : index
    %123 = vector.load %arg7[%c0_50, %c352] : memref<80x432xbf16, #tpu.memory_space<vmem>>, vector<80x16xbf16>
    tpu.vector_store %arg7[%c0_50, %c352], %122 {strides = array<i32>} : memref<80x432xbf16, #tpu.memory_space<vmem>>, vector<80x16xbf16>,
    %c101_i32 = arith.constant 101 : i32
    %124 = arith.addi %8, %c101_i32 : i32
    %125 = arith.index_cast %124 : i32 to index
    %c0_51 = arith.constant 0 : index
    %126 = vector.load %arg3[%125, %c0_51] : memref<700x16xf32, #tpu.memory_space<vmem>>, vector<80x16xf32>
    %127 = arith.truncf %126 : vector<80x16xf32> to vector<80x16xbf16>
    %c0_52 = arith.constant 0 : index
    %c368 = arith.constant 368 : index
    %128 = vector.load %arg7[%c0_52, %c368] : memref<80x432xbf16, #tpu.memory_space<vmem>>, vector<80x16xbf16>
    tpu.vector_store %arg7[%c0_52, %c368], %127 {strides = array<i32>} : memref<80x432xbf16, #tpu.memory_space<vmem>>, vector<80x16xbf16>,
    %c109_i32 = arith.constant 109 : i32
    %129 = arith.addi %8, %c109_i32 : i32
    %130 = arith.index_cast %129 : i32 to index
    %c0_53 = arith.constant 0 : index
    %131 = vector.load %arg3[%130, %c0_53] : memref<700x16xf32, #tpu.memory_space<vmem>>, vector<80x16xf32>
    %132 = arith.truncf %131 : vector<80x16xf32> to vector<80x16xbf16>
    %c0_54 = arith.constant 0 : index
    %c384 = arith.constant 384 : index
    %133 = vector.load %arg7[%c0_54, %c384] : memref<80x432xbf16, #tpu.memory_space<vmem>>, vector<80x16xbf16>
    tpu.vector_store %arg7[%c0_54, %c384], %132 {strides = array<i32>} : memref<80x432xbf16, #tpu.memory_space<vmem>>, vector<80x16xbf16>,
    %c110_i32 = arith.constant 110 : i32
    %134 = arith.addi %8, %c110_i32 : i32
    %135 = arith.index_cast %134 : i32 to index
    %c0_55 = arith.constant 0 : index
    %136 = vector.load %arg3[%135, %c0_55] : memref<700x16xf32, #tpu.memory_space<vmem>>, vector<80x16xf32>
    %137 = arith.truncf %136 : vector<80x16xf32> to vector<80x16xbf16>
    %c0_56 = arith.constant 0 : index
    %c400 = arith.constant 400 : index
    %138 = vector.load %arg7[%c0_56, %c400] : memref<80x432xbf16, #tpu.memory_space<vmem>>, vector<80x16xbf16>
    tpu.vector_store %arg7[%c0_56, %c400], %137 {strides = array<i32>} : memref<80x432xbf16, #tpu.memory_space<vmem>>, vector<80x16xbf16>,
    %c111_i32 = arith.constant 111 : i32
    %139 = arith.addi %8, %c111_i32 : i32
    %140 = arith.index_cast %139 : i32 to index
    %c0_57 = arith.constant 0 : index
    %141 = vector.load %arg3[%140, %c0_57] : memref<700x16xf32, #tpu.memory_space<vmem>>, vector<80x16xf32>
    %142 = arith.truncf %141 : vector<80x16xf32> to vector<80x16xbf16>
    %c0_58 = arith.constant 0 : index
    %c416 = arith.constant 416 : index
    %143 = vector.load %arg7[%c0_58, %c416] : memref<80x432xbf16, #tpu.memory_space<vmem>>, vector<80x16xbf16>
    tpu.vector_store %arg7[%c0_58, %c416], %142 {strides = array<i32>} : memref<80x432xbf16, #tpu.memory_space<vmem>>, vector<80x16xbf16>,
    %c0_59 = arith.constant 0 : index
    %c0_60 = arith.constant 0 : index
    %144 = vector.load %arg7[%c0_59, %c0_60] : memref<80x432xbf16, #tpu.memory_space<vmem>>, vector<80x432xbf16>
    %c0_61 = arith.constant 0 : index
    %c0_62 = arith.constant 0 : index
    %145 = vector.load %arg4[%c0_61, %c0_62] : memref<432x16xbf16, #tpu.memory_space<vmem>>, vector<432x16xbf16>
    %cst = arith.constant dense<0.000000e+00> : vector<80x16xf32>
    %146 = tpu.matmul %144, %145, %cst {dimension_numbers = #tpu.dot_dimension_numbers<[1], [0], [0], [1], [0, 0, 1, 1], [], []>} : vector<80x432xbf16>, vector<432x16xbf16>, vector<80x16xf32> -> vector<80x16xf32>
    %c0_63 = arith.constant 0 : index
    %c0_64 = arith.constant 0 : index
    %147 = vector.load %arg5[%c0_63, %c0_64] : memref<1x16xf32, #tpu.memory_space<vmem>>, vector<1x16xf32>
    %148 = vector.broadcast %147 : vector<1x16xf32> to vector<80x16xf32>
    %149 = arith.addf %146, %148 : vector<80x16xf32>
    %cst_65 = arith.constant 0.000000e+00 : f32
    %150 = vector.broadcast %cst_65 : f32 to vector<80x16xf32>
    %151 = arith.maximumf %149, %150 : vector<80x16xf32>
    %152 = vector.extract_strided_slice %151 {offsets = [0, 0], sizes = [8, 16], strides = [1, 1]} : vector<80x16xf32> to vector<8x16xf32>
    %c0_66 = arith.constant 0 : index
    %c0_67 = arith.constant 0 : index
    %153 = vector.load %arg6[%c0_66, %c0_67] : memref<64x16xf32, #tpu.memory_space<vmem>>, vector<8x16xf32>
    tpu.vector_store %arg6[%c0_66, %c0_67], %152 {strides = array<i32>} : memref<64x16xf32, #tpu.memory_space<vmem>>, vector<8x16xf32>,
    %154 = vector.extract_strided_slice %151 {offsets = [10, 0], sizes = [8, 16], strides = [1, 1]} : vector<80x16xf32> to vector<8x16xf32>
    %c8 = arith.constant 8 : index
    %c0_68 = arith.constant 0 : index
    %155 = vector.load %arg6[%c8, %c0_68] : memref<64x16xf32, #tpu.memory_space<vmem>>, vector<8x16xf32>
    tpu.vector_store %arg6[%c8, %c0_68], %154 {strides = array<i32>} : memref<64x16xf32, #tpu.memory_space<vmem>>, vector<8x16xf32>,
    %156 = vector.extract_strided_slice %151 {offsets = [20, 0], sizes = [8, 16], strides = [1, 1]} : vector<80x16xf32> to vector<8x16xf32>
    %c16_69 = arith.constant 16 : index
    %c0_70 = arith.constant 0 : index
    %157 = vector.load %arg6[%c16_69, %c0_70] : memref<64x16xf32, #tpu.memory_space<vmem>>, vector<8x16xf32>
    tpu.vector_store %arg6[%c16_69, %c0_70], %156 {strides = array<i32>} : memref<64x16xf32, #tpu.memory_space<vmem>>, vector<8x16xf32>,
    %158 = vector.extract_strided_slice %151 {offsets = [30, 0], sizes = [8, 16], strides = [1, 1]} : vector<80x16xf32> to vector<8x16xf32>
    %c24 = arith.constant 24 : index
    %c0_71 = arith.constant 0 : index
    %159 = vector.load %arg6[%c24, %c0_71] : memref<64x16xf32, #tpu.memory_space<vmem>>, vector<8x16xf32>
    tpu.vector_store %arg6[%c24, %c0_71], %158 {strides = array<i32>} : memref<64x16xf32, #tpu.memory_space<vmem>>, vector<8x16xf32>,
    %160 = vector.extract_strided_slice %151 {offsets = [40, 0], sizes = [8, 16], strides = [1, 1]} : vector<80x16xf32> to vector<8x16xf32>
    %c32_72 = arith.constant 32 : index
    %c0_73 = arith.constant 0 : index
    %161 = vector.load %arg6[%c32_72, %c0_73] : memref<64x16xf32, #tpu.memory_space<vmem>>, vector<8x16xf32>
    tpu.vector_store %arg6[%c32_72, %c0_73], %160 {strides = array<i32>} : memref<64x16xf32, #tpu.memory_space<vmem>>, vector<8x16xf32>,
    %162 = vector.extract_strided_slice %151 {offsets = [50, 0], sizes = [8, 16], strides = [1, 1]} : vector<80x16xf32> to vector<8x16xf32>
    %c40 = arith.constant 40 : index
    %c0_74 = arith.constant 0 : index
    %163 = vector.load %arg6[%c40, %c0_74] : memref<64x16xf32, #tpu.memory_space<vmem>>, vector<8x16xf32>
    tpu.vector_store %arg6[%c40, %c0_74], %162 {strides = array<i32>} : memref<64x16xf32, #tpu.memory_space<vmem>>, vector<8x16xf32>,
    %164 = vector.extract_strided_slice %151 {offsets = [60, 0], sizes = [8, 16], strides = [1, 1]} : vector<80x16xf32> to vector<8x16xf32>
    %c48_75 = arith.constant 48 : index
    %c0_76 = arith.constant 0 : index
    %165 = vector.load %arg6[%c48_75, %c0_76] : memref<64x16xf32, #tpu.memory_space<vmem>>, vector<8x16xf32>
    tpu.vector_store %arg6[%c48_75, %c0_76], %164 {strides = array<i32>} : memref<64x16xf32, #tpu.memory_space<vmem>>, vector<8x16xf32>,
    %166 = vector.extract_strided_slice %151 {offsets = [70, 0], sizes = [8, 16], strides = [1, 1]} : vector<80x16xf32> to vector<8x16xf32>
    %c56 = arith.constant 56 : index
    %c0_77 = arith.constant 0 : index
    %167 = vector.load %arg6[%c56, %c0_77] : memref<64x16xf32, #tpu.memory_space<vmem>>, vector<8x16xf32>
    tpu.vector_store %arg6[%c56, %c0_77], %166 {strides = array<i32>} : memref<64x16xf32, #tpu.memory_space<vmem>>, vector<8x16xf32>,
    return
  }
  func.func @transform_0(%arg0: i32, %arg1: i32, %arg2: i32) -> (i32, i32) {
    %c0_i32 = arith.constant 0 : i32
    %c0_i32_0 = arith.constant 0 : i32
    %c0_i32_1 = arith.constant 0 : i32
    return %c0_i32, %c0_i32_0 : i32, i32
  }
  func.func @transform_1(%arg0: i32, %arg1: i32, %arg2: i32) -> (i32, i32) {
    %c0_i32 = arith.constant 0 : i32
    %c0_i32_0 = arith.constant 0 : i32
    %c0_i32_1 = arith.constant 0 : i32
    return %c0_i32, %c0_i32_0 : i32, i32
  }
  func.func @transform_2(%arg0: i32, %arg1: i32, %arg2: i32) -> (i32, i32) {
    %c0_i32 = arith.constant 0 : i32
    %c0_i32_0 = arith.constant 0 : i32
    %c0_i32_1 = arith.constant 0 : i32
    return %c0_i32, %c0_i32_0 : i32, i32
  }
  func.func @transform_3(%arg0: i32, %arg1: i32, %arg2: i32) -> (i32, i32) {
    %c4_i32 = arith.constant 4 : i32
    %0 = arith.muli %arg0, %c4_i32 : i32
    %1 = arith.addi %0, %arg1 : i32
    %c1_i32 = arith.constant 1 : i32
    %2 = arith.muli %1, %c1_i32 : i32
    %3 = arith.addi %2, %arg2 : i32
    %c0_i32 = arith.constant 0 : i32
    %c0_i32_0 = arith.constant 0 : i32
    return %3, %c0_i32 : i32, i32
  }
}

</mosaic_0001>

<bundles_post_ra>
// kernel: tpu_custom_call.1
= control target key start
LH: loop header
LB: loop body
LE: loop exit
PB: predicated region body
PF: predicated region fallthrough
CT: control target
= control target key end

     0   :  { %s4213_s12 = smov 0   ;;  %s4215_s13 = smov 0   ;;  %s5200_s0 = inlined_call_operand.vmem [shape: f32[700,16], index: 0, kind: input, shape index: {}]   ;;  %s5201_s1 = inlined_call_operand.vmem [shape: bf16[432,16], index: 1, kind: input, shape index: {}]   ;;  %s5202_s2 = inlined_call_operand.vmem [shape: f32[1,16], index: 2, kind: input, shape index: {}]   ;;  %s5203_s3 = inlined_call_operand.vmem [shape: f32[256,16], index: 3, kind: output, shape index: {}]  }
   0x1   :  { %s4217_s14 = smov 0  }
   0x2 LB: > { %s28_s15 = sadd.s32 1, %s4179_s13  ;;  %p3149_p0 = scmp.ge.s32.totalorder %s4183_s14, 1  ;;  %s4183_s14 = sphi %s4217_s14, %s13_s14   ;;  %s4179_s13 = sphi %s4215_s13, %s5205_s13   ;;  %s4175_s12 = sphi %s4213_s12, %s5204_s12  }
   0x3   : > { %p30_p1 = scmp.ge.s32.totalorder %s28_s15, 4  ;;  %p152_p2 = scmp.lt.s32.totalorder %s4183_s14, 5 }
   0x5   : > { %s5207_s15 = smov (%p30_p1, %s28_s15), 0  ;;  %p153_p3 = pnand %p3149_p0, %p152_p2 }
   0x6   : > { %s3162_s16 = smul.u32 (!%p153_p3), 100, %s4175_s12  ;;  %s189_s20 = sadd.s32 (!%p153_p3), 1, %s4175_s12 }
   0x7   : > { %156 = sbr.rel (%p153_p3) target bundleno = 797 (0x31d), region = 32  ;;  %s4185_s22 = smov (!%p153_p3), 16  }
   0x8   : > { %s4237_s19 = scalar_lea.vmem (!%p153_p3), %s5200_s0, %s3162_s16  ;;  %s190_s21 = smul.u32 (!%p153_p3), 10, %s189_s20 }
   0x9   : > { %s4186_s29 = smov (!%p153_p3), 32   ;;  %s4187_s30 = smov (!%p153_p3), 48  }
   0xa   : > { %s193_s23 = sadd.s32 (!%p153_p3), 1, %s190_s21  ;;  %s4188_s4 = smov (!%p153_p3), 64  }
   0xb   : > { %s194_s24 = smul.u32 (!%p153_p3), 10, %s193_s23  ;;  %s4189_s5 = smov (!%p153_p3), 80  }
   0xc   : > { %v3165_v0 = vld [vmem:[%s4237_s19 + $0x11] sm:$0xff]  ;;  %v3163_v1 = vld [vmem:[%s4237_s19 + $0x1] sm:$0xff]  ;;  %v3166_v2 = vld [vmem:[%s4237_s19 + $0x19] sm:$0xff]  ;;  %vm248_vm0 = vcmask 125952   ;;  %s4190_s6 = smov 96   ;;  %vm331_vm1 = vcmask 257152  }
   0xd   : > { %v3775_v3 = vpack.c.bf16 %v3165_v0, %v3165_v0  ;;  %v3773_v4 = vpack.c.bf16 %v3163_v1, %v3163_v1  ;;  %v3164_v5 = vld [vmem:[%s4237_s19 + $0x9] sm:$0xff]  ;;  %v3776_v6 = vpack.c.bf16 %v3166_v2, %v3166_v2  ;;  %v3167_v9 = vld [vmem:[%s4237_s19 + $0x21] sm:$0xff]  ;;  %v3170_v12 = vld [vmem:[%s4237_s19 + $0x39] sm:$0xff]  ;;  %s196_s25 = sadd.s32 4294967186, %s194_s24  ;;  %s4191_s7 = smov 112   ;;  %vm414_vm2 = vcmask 388352  }
   0xe   : > { %v3774_v7 = vpack.c.bf16 %v3164_v5, %v3164_v5  ;;  %v3168_v8 = vld [vmem:[%s4237_s19 + $0x29] sm:$0xff]  ;;  %v3777_v11 = vpack.c.bf16 %v3167_v9, %v3167_v9  ;;  %v3169_v13 = vld [vmem:[%s4237_s19 + $0x31] sm:$0xff]  ;;  %v3780_v14 = vpack.c.bf16 %v3170_v12, %v3170_v12  ;;  %s4257_s28 = scalar_lea.vmem %s5200_s0, %s196_s25  ;;  %v3171_v17 = vld [vmem:[%s4237_s19 + $0x41] sm:$0xff]  ;;  %vm497_vm3 = vcmask 519552  }
   0xf   : > { %305 = vrot.lane.b32.xlu1 %v3775_v3, %s4185_s22  ;;  %301 = vrot.lane.b32.xlu0 %v3773_v4, %s4185_s22  ;;  %v3778_v10 = vpack.c.bf16 %v3168_v8, %v3168_v8  ;;  %v3779_v15 = vpack.c.bf16 %v3169_v13, %v3169_v13  ;;  %v3172_v16 = vld [vmem:[%s4237_s19 + $0x49] sm:$0xff]  ;;  %v3781_v20 = vpack.c.bf16 %v3171_v17, %v3171_v17  ;;  %v198_v23 = vld [vmem:[%s4257_s28] sm:$0xff]  ;;  %vm580_vm4 = vcmask 650752  }
  0x10   : > { %v200_v18 = vld [vmem:[%s4257_s28 + $0x10] sm:$0xff]  ;;  %v3782_v19 = vpack.c.bf16 %v3172_v16, %v3172_v16  ;;  %v3184_v24 = vld [vmem:[%s4237_s19 + $0x2] sm:$0xff]  ;;  %v3763_v25 = vpack.c.bf16 %v198_v23, %v198_v23  ;;  %v201_v26 = vld [vmem:[%s4257_s28 + $0x18] sm:$0xff]  ;;  %vm663_vm5 = vcmask 781952   ;;  %vm746_vm6 = vcmask 913152  }
  0x11   : > { %v3185_v21 = vld [vmem:[%s4237_s19 + $0xa] sm:$0xff]  ;;  %v3765_v22 = vpack.c.bf16 %v200_v18, %v200_v18  ;;  %v3766_v28 = vpack.c.bf16 %v201_v26, %v201_v26  ;;  %v202_v31 = vld [vmem:[%s4257_s28 + $0x20] sm:$0xff]  ;;  %v205_v34 = vld [vmem:[%s4257_s28 + $0x38] sm:$0xff]  ;;  %v3783_v36 = vpack.c.bf16 %v3184_v24, %v3184_v24  ;;  %vm829_vm7 = vcmask 1044352  }
  0x12   : > { %v199_v27 = vld [vmem:[%s4257_s28 + $0x8] sm:$0xff]  ;;  %249 = vst.msk [vmem:[#allocation2] sm:$0xf] %vm248_vm0, %v3763_v25  ;;  %v3767_v33 = vpack.c.bf16 %v202_v31, %v202_v31  ;;  %v3784_v35 = vpack.c.bf16 %v3185_v21, %v3185_v21  ;;  %v3187_v37 = vld [vmem:[%s4237_s19 + $0x1a] sm:$0xff]  ;;  %v3770_v38 = vpack.c.bf16 %v205_v34, %v205_v34  ;;  %v204_v39 = vld [vmem:[%s4257_s28 + $0x30] sm:$0xff]  ;;  %vm2674_vm8 = vcmask 392192  }
  0x13   : > { %307 = vrot.lane.b32.xlu1 %v3776_v6, %s4185_s22  ;;  %303 = vrot.lane.b32.xlu0 %v3774_v7, %s4185_s22  ;;  %251 = vst.msk [vmem:[#allocation2 + $0x20] sm:$0xf] %vm248_vm0, %v3765_v22  ;;  %v3764_v29 = vpack.c.bf16 %v199_v27, %v199_v27  ;;  %v203_v30 = vld [vmem:[%s4257_s28 + $0x28] sm:$0xff]  ;;  %252 = vst.msk [vmem:[#allocation2 + $0x30] sm:$0xf] %vm248_vm0, %v3766_v28  ;;  %v3186_v40 = vld [vmem:[%s4237_s19 + $0x12] sm:$0xff]  ;;  %v3769_v41 = vpack.c.bf16 %v204_v39, %v204_v39 }
  0x14   : > { %v3768_v32 = vpack.c.bf16 %v203_v30, %v203_v30  ;;  %253 = vst.msk [vmem:[#allocation2 + $0x40] sm:$0xf] %vm248_vm0, %v3767_v33  ;;  %v207_v42 = vld [vmem:[%s4257_s28 + $0x48] sm:$0xff]  ;;  %v206_v43 = vld [vmem:[%s4257_s28 + $0x40] sm:$0xff]  ;;  %256 = vst.msk [vmem:[#allocation2 + $0x70] sm:$0xf] %vm248_vm0, %v3770_v38  ;;  %v3786_v46 = vpack.c.bf16 %v3187_v37, %v3187_v37  ;;  %v3785_v47 = vpack.c.bf16 %v3186_v40, %v3186_v40 }
  0x15   : > { %250 = vst.msk [vmem:[#allocation2 + $0x10] sm:$0xf] %vm248_vm0, %v3764_v29  ;;  %v3772_v44 = vpack.c.bf16 %v207_v42, %v207_v42  ;;  %v3771_v45 = vpack.c.bf16 %v206_v43, %v206_v43  ;;  %255 = vst.msk [vmem:[#allocation2 + $0x60] sm:$0xf] %vm248_vm0, %v3769_v41  ;;  %v3189_v48 = vld [vmem:[%s4237_s19 + $0x2a] sm:$0xff]  ;;  %v3188_v49 = vld [vmem:[%s4237_s19 + $0x22] sm:$0xff] }
  0x16   : > { %254 = vst.msk [vmem:[#allocation2 + $0x50] sm:$0xf] %vm248_vm0, %v3768_v32  ;;  %v3191_v50 = vld [vmem:[%s4237_s19 + $0x3a] sm:$0xff]  ;;  %v3788_v51 = vpack.c.bf16 %v3189_v48, %v3189_v48  ;;  %v3787_v52 = vpack.c.bf16 %v3188_v49, %v3188_v49  ;;  %v3190_v53 = vld [vmem:[%s4237_s19 + $0x32] sm:$0xff]  ;;  %v3193_v56 = vld [vmem:[%s4237_s19 + $0x4a] sm:$0xff]  ;;  %vm2846_vm9 = vcmask 130048  }
  0x17   : > { %311 = vrot.lane.b32.xlu1 %v3778_v10, %s4185_s22  ;;  %309 = vrot.lane.b32.xlu0 %v3777_v11, %s4185_s22  ;;  %258 = vst.msk [vmem:[#allocation2 + $0x90] sm:$0xf] %vm248_vm0, %v3772_v44  ;;  %257 = vst.msk [vmem:[#allocation2 + $0x80] sm:$0xf] %vm248_vm0, %v3771_v45  ;;  %v3790_v54 = vpack.c.bf16 %v3191_v50, %v3191_v50  ;;  %v3789_v55 = vpack.c.bf16 %v3190_v53, %v3190_v53  ;;  %v3192_v57 = vld [vmem:[%s4237_s19 + $0x42] sm:$0xff]  ;;  %v3214_v60 = vld [vmem:[%s4237_s19 + $0x52] sm:$0xff] }
  0x18   : > { %v3792_v58 = vpack.c.bf16 %v3193_v56, %v3193_v56  ;;  %v3791_v59 = vpack.c.bf16 %v3192_v57, %v3192_v57  ;;  %v3802_v61 = vpack.c.bf16 %v3214_v60, %v3214_v60  ;;  %v3227_v62 = vld [vmem:[%s4237_s19 + $0x13] sm:$0xff]  ;;  %v3226_v63 = vld [vmem:[%s4237_s19 + $0xb] sm:$0xff]  ;;  %v3229_v2 = vld [vmem:[%s4237_s19 + $0x23] sm:$0xff]  ;;  %vm2848_vm10 = vcmask 130050  }
  0x19   : > { %v3804_v0 = vpack.c.bf16 %v3227_v62, %v3227_v62  ;;  %v3803_v1 = vpack.c.bf16 %v3226_v63, %v3226_v63  ;;  %v3228_v3 = vld [vmem:[%s4237_s19 + $0x1b] sm:$0xff]  ;;  %v3806_v4 = vpack.c.bf16 %v3229_v2, %v3229_v2  ;;  %v3231_v6 = vld [vmem:[%s4237_s19 + $0x33] sm:$0xff]  ;;  %v3230_v7 = vld [vmem:[%s4237_s19 + $0x2b] sm:$0xff]  ;;  %vm2850_vm11 = vcmask 123904  }
  0x1a   : > { %v3805_v5 = vpack.c.bf16 %v3228_v3, %v3228_v3  ;;  %v3808_v8 = vpack.c.bf16 %v3231_v6, %v3231_v6  ;;  %v3807_v9 = vpack.c.bf16 %v3230_v7, %v3230_v7  ;;  %v3233_v10 = vld [vmem:[%s4237_s19 + $0x43] sm:$0xff]  ;;  %v3232_v11 = vld [vmem:[%s4237_s19 + $0x3b] sm:$0xff]  ;;  %v3251_v27 = vld [vmem:[%s4237_s19 + $0x2c] sm:$0xff]  ;;  %vm2852_vm12 = vcmask 130052  }
  0x1b   : > { %315 = vrot.lane.b32.xlu1 %v3780_v14, %s4185_s22  ;;  %313 = vrot.lane.b32.xlu0 %v3779_v15, %s4185_s22  ;;  %v3810_v12 = vpack.c.bf16 %v3233_v10, %v3233_v10  ;;  %v3809_v13 = vpack.c.bf16 %v3232_v11, %v3232_v11  ;;  %v3235_v14 = vld [vmem:[%s4237_s19 + $0x53] sm:$0xff]  ;;  %v3234_v15 = vld [vmem:[%s4237_s19 + $0x4b] sm:$0xff]  ;;  %v3817_v29 = vpack.c.bf16 %v3251_v27, %v3251_v27  ;;  %vm2855_vm13 = vcmask 130054  }
  0x1c   : > { %v3812_v16 = vpack.c.bf16 %v3235_v14, %v3235_v14  ;;  %v3811_v17 = vpack.c.bf16 %v3234_v15, %v3234_v15  ;;  %v3248_v18 = vld [vmem:[%s4237_s19 + $0x14] sm:$0xff]  ;;  %v3250_v22 = vld [vmem:[%s4237_s19 + $0x24] sm:$0xff]  ;;  %v3249_v23 = vld [vmem:[%s4237_s19 + $0x1c] sm:$0xff]  ;;  %vm2857_vm14 = vcmask 128000  }
  0x1d   : > { %v3816_v24 = vpack.c.bf16 %v3250_v22, %v3250_v22  ;;  %v3815_v25 = vpack.c.bf16 %v3249_v23, %v3249_v23  ;;  %v3252_v26 = vld [vmem:[%s4237_s19 + $0x34] sm:$0xff]  ;;  %v3254_v30 = vld [vmem:[%s4237_s19 + $0x44] sm:$0xff]  ;;  %v3253_v31 = vld [vmem:[%s4237_s19 + $0x3c] sm:$0xff] }
  0x1e   : > { %v3818_v28 = vpack.c.bf16 %v3252_v26, %v3252_v26  ;;  %v3626_v32 = vld [vmem:[%s4237_s19 + $0xdc] sm:$0xff]  ;;  %v3820_v34 = vpack.c.bf16 %v3254_v30, %v3254_v30  ;;  %v3255_v37 = vld [vmem:[%s4237_s19 + $0x4c] sm:$0xff]  ;;  %v3333_v27 = vld [vmem:[%s4237_s19 + $0x74] sm:$0xff] }
  0x1f   : > { %319 = vrot.lane.b32.xlu1 %v3782_v19, %s4185_s22  ;;  %317 = vrot.lane.b32.xlu0 %v3781_v20, %s4185_s22  ;;  %v3247_v19 = vld [vmem:[%s4237_s19 + $0xc] sm:$0xff]  ;;  %v3814_v20 = vpack.c.bf16 %v3248_v18, %v3248_v18  ;;  %v4349_v33 = vpack.c.bf16 %v3626_v32, %v3626_v32  ;;  %v3821_v39 = vpack.c.bf16 %v3255_v37, %v3255_v37  ;;  %v3277_v40 = vld [vmem:[%s4237_s19 + $0x5c] sm:$0xff] }
  0x20   : > { %v3813_v21 = vpack.c.bf16 %v3247_v19, %v3247_v19  ;;  %v3832_v41 = vpack.c.bf16 %v3277_v40, %v3277_v40  ;;  %v3290_v42 = vld [vmem:[%s4237_s19 + $0x1d] sm:$0xff]  ;;  %v3289_v43 = vld [vmem:[%s4237_s19 + $0x15] sm:$0xff]  ;;  %v3292_v48 = vld [vmem:[%s4237_s19 + $0x2d] sm:$0xff]  ;;  %v3855_v32 = vpack.c.bf16 %v3333_v27, %v3333_v27 }
  0x21   : > { %2162 = vst.msk [vmem:[#allocation2 + $0xc] sm:$0xf] %vm248_vm0, %v4349_v33  ;;  %v3291_v49 = vld [vmem:[%s4237_s19 + $0x25] sm:$0xff]  ;;  %v3310_v60 = vld [vmem:[%s4237_s19 + $0x16] sm:$0xff]  ;;  %v3296_v62 = vld [vmem:[%s4237_s19 + $0x4d] sm:$0xff] }
  0x22   : > { %v3835_v53 = vpack.c.bf16 %v3291_v49, %v3291_v49  ;;  %v3312_v6 = vld [vmem:[%s4237_s19 + $0x26] sm:$0xff]  ;;  %v3298_v10 = vld [vmem:[%s4237_s19 + $0x5d] sm:$0xff]  ;;  %v3297_v11 = vld [vmem:[%s4237_s19 + $0x55] sm:$0xff] }
  0x23   : > { %386 = vrot.lane.b32.xlu1 %v3784_v35, %s4186_s29  ;;  %384 = vrot.lane.b32.xlu0 %v3783_v36, %s4186_s29  ;;  %v3256_v36 = vld [vmem:[%s4237_s19 + $0x54] sm:$0xff]  ;;  %v3842_v15 = vpack.c.bf16 %v3298_v10, %v3298_v10  ;;  %v3332_v18 = vld [vmem:[%s4237_s19 + $0x6c] sm:$0xff] }
  0x24   : > { %v3822_v38 = vpack.c.bf16 %v3256_v36, %v3256_v36  ;;  %v4111_v14 = vld [vmem:[%s5201_s1 + $0x78] sm:$0xff]   ;;  %v3331_v19 = vld [vmem:[%s4237_s19 + $0x64] sm:$0xff]  ;;  %v4113_v22 = vld [vmem:[%s5201_s1 + $0x70] sm:$0xff]   ;;  %v3854_v23 = vpack.c.bf16 %v3332_v18, %v3332_v18 }
  0x25   : > { %4033 = vmatprep.subr.bf16.mxu0 %v4111_v14  ;;  %v3334_v26 = vld [vmem:[%s4237_s19 + $0x7c] sm:$0xff]  ;;  %v4115_v30 = vld [vmem:[%s5201_s1 + $0x68] sm:$0xff]   ;;  %v3436_v10 = vld [vmem:[%s4237_s19 + $0x70] sm:$0xff] }
  0x26   : > { %v3352_v36 = vld [vmem:[%s4237_s19 + $0x65] sm:$0xff]  ;;  %v3521_v27 = vld [vmem:[%s4237_s19 + $0xd0] sm:$0xff] }
  0x27   : > { %390 = vrot.lane.b32.xlu1 %v3786_v46, %s4186_s29  ;;  %388 = vrot.lane.b32.xlu0 %v3785_v47, %s4186_s29 }
  0x2b   : > { %394 = vrot.lane.b32.xlu1 %v3788_v51, %s4186_s29  ;;  %392 = vrot.lane.b32.xlu0 %v3787_v52, %s4186_s29 }
  0x2f   : > { %398 = vrot.lane.b32.xlu1 %v3790_v54, %s4186_s29  ;;  %396 = vrot.lane.b32.xlu0 %v3789_v55, %s4186_s29 }
  0x33   : > { %402 = vrot.lane.b32.xlu1 %v3792_v58, %s4186_s29  ;;  %400 = vrot.lane.b32.xlu0 %v3791_v59, %s4186_s29 }
  0x37   : > { %469 = vrot.lane.b32.xlu1 %v3785_v47, %s4187_s30  ;;  %467 = vrot.lane.b32.xlu0 %v3784_v35, %s4187_s30  ;;  %v3819_v35 = vpack.c.bf16 %v3253_v31, %v3253_v31  ;;  %v3833_v47 = vpack.c.bf16 %v3289_v43, %v3289_v43  ;;  %v3856_v31 = vpack.c.bf16 %v3334_v26, %v3334_v26  ;;  %v3374_v43 = vld [vmem:[%s4237_s19 + $0x6e] sm:$0xff] }
  0x3b   : > { %473 = vrot.lane.b32.xlu1 %v3787_v52, %s4187_s30  ;;  %471 = vrot.lane.b32.xlu0 %v3786_v46, %s4187_s30  ;;  %v3834_v46 = vpack.c.bf16 %v3290_v42, %v3290_v42  ;;  %v3836_v52 = vpack.c.bf16 %v3292_v48, %v3292_v48  ;;  %v4118_v42 = vld [vmem:[%s5201_s1 + $0x20] sm:$0xff]   ;;  %v3874_v48 = vpack.c.bf16 %v3374_v43, %v3374_v43  ;;  %v3354_v43 = vld [vmem:[%s4237_s19 + $0x75] sm:$0xff] }
  0x3f   : > { %477 = vrot.lane.b32.xlu1 %v3789_v55, %s4187_s30  ;;  %475 = vrot.lane.b32.xlu0 %v3788_v51, %s4187_s30  ;;  %v3293_v55 = vld [vmem:[%s4237_s19 + $0x35] sm:$0xff] }
  0x43   : > { %481 = vrot.lane.b32.xlu1 %v3791_v59, %s4187_s30  ;;  %479 = vrot.lane.b32.xlu0 %v3790_v54, %s4187_s30  ;;  %v3294_v54 = vld [vmem:[%s4237_s19 + $0x3d] sm:$0xff] }
  0x44   : > { %v3311_v59 = vld [vmem:[%s4237_s19 + $0x1e] sm:$0xff] }
  0x45   : > { %v3844_v63 = vpack.c.bf16 %v3311_v59, %v3311_v59 }
  0x47   : > { %485 = vrot.lane.b32.xlu1 %v3802_v61, %s4187_s30  ;;  %483 = vrot.lane.b32.xlu0 %v3792_v58, %s4187_s30  ;;  %v3838_v58 = vpack.c.bf16 %v3294_v54, %v3294_v54  ;;  %v3837_v61 = vpack.c.bf16 %v3293_v55, %v3293_v55  ;;  %893 = vst.msk [vmem:[#allocation2 + $0x14] sm:$0xf] %vm248_vm0, %v3844_v63 }
  0x4b   : > { %552 = vrot.lane.b32.xlu1 %v3804_v0, %s4188_s4  ;;  %550 = vrot.lane.b32.xlu0 %v3803_v1, %s4188_s4  ;;  %v3843_v0 = vpack.c.bf16 %v3310_v60, %v3310_v60  ;;  %v3295_v1 = vld [vmem:[%s4237_s19 + $0x45] sm:$0xff]  ;;  %v3416_v60 = vld [vmem:[%s4237_s19 + $0x77] sm:$0xff] }
  0x4c   : > { %v3839_v7 = vpack.c.bf16 %v3295_v1, %v3295_v1  ;;  %v3894_v1 = vpack.c.bf16 %v3416_v60, %v3416_v60  ;;  %v4133_v60 = vld [vmem:[%s5201_s1 + $0xa0] sm:$0xff]  }
  0x4d   : > { %892 = vst.msk [vmem:[#allocation2 + $0x4] sm:$0xf] %vm248_vm0, %v3843_v0 }
  0x4f   : > { %556 = vrot.lane.b32.xlu1 %v3806_v4, %s4188_s4  ;;  %554 = vrot.lane.b32.xlu0 %v3805_v5, %s4188_s4  ;;  %v3840_v4 = vpack.c.bf16 %v3296_v62, %v3296_v62  ;;  %v3313_v5 = vld [vmem:[%s4237_s19 + $0x2e] sm:$0xff] }
  0x50   : > { %v3415_v62 = vld [vmem:[%s4237_s19 + $0x6f] sm:$0xff] }
  0x53   : > { %560 = vrot.lane.b32.xlu1 %v3808_v8, %s4188_s4  ;;  %558 = vrot.lane.b32.xlu0 %v3807_v9, %s4188_s4  ;;  %v3846_v8 = vpack.c.bf16 %v3313_v5, %v3313_v5  ;;  %v3845_v9 = vpack.c.bf16 %v3312_v6, %v3312_v6  ;;  %v3893_v5 = vpack.c.bf16 %v3415_v62, %v3415_v62 }
  0x55   : > { %895 = vst.msk [vmem:[#allocation2 + $0x34] sm:$0xf] %vm248_vm0, %v3846_v8  ;;  %894 = vst.msk [vmem:[#allocation2 + $0x24] sm:$0xf] %vm248_vm0, %v3845_v9  ;;  %v4124_v8 = vld [vmem:[%s5201_s1 + $0x8] sm:$0xff]   ;;  %v3437_v9 = vld [vmem:[%s4237_s19 + $0x78] sm:$0xff] }
  0x56   : > { %v3904_v14 = vpack.c.bf16 %v3437_v9, %v3437_v9  ;;  %v3605_v9 = vld [vmem:[%s4237_s19 + $0xdb] sm:$0xff] }
  0x57   : > { %564 = vrot.lane.b32.xlu1 %v3810_v12, %s4188_s4  ;;  %562 = vrot.lane.b32.xlu0 %v3809_v13, %s4188_s4 }
  0x5b   : > { %568 = vrot.lane.b32.xlu1 %v3812_v16, %s4188_s4  ;;  %566 = vrot.lane.b32.xlu0 %v3811_v17, %s4188_s4  ;;  %v3841_v16 = vpack.c.bf16 %v3297_v11, %v3297_v11  ;;  %v4112_v17 = vld [vmem:[%s5201_s1 + $0x38] sm:$0xff]  }
  0x5c   : > { %4034 = vmatpush3.bf16.msra.mxu0 %v4112_v17  ;;  %v3458_v17 = vld [vmem:[%s4237_s19 + $0x80] sm:$0xff] }
  0x5d   : > { %4035 = vmatprep.subr.bf16.mxu0 %v4113_v22  ;;  %v3499_v22 = vld [vmem:[%s4237_s19 + $0x7a] sm:$0xff] }
  0x5e   : > { %v3933_v26 = vpack.c.bf16 %v3499_v22, %v3499_v22 }
  0x5f   : > { %635 = vrot.lane.b32.xlu1 %v3814_v20, %s4189_s5  ;;  %633 = vrot.lane.b32.xlu0 %v3813_v21, %s4189_s5 }
  0x63   : > { %639 = vrot.lane.b32.xlu1 %v3816_v24, %s4189_s5  ;;  %637 = vrot.lane.b32.xlu0 %v3815_v25, %s4189_s5 }
  0x67   : > { %643 = vrot.lane.b32.xlu1 %v3818_v28, %s4189_s5  ;;  %641 = vrot.lane.b32.xlu0 %v3817_v29, %s4189_s5 }
  0x6b   : > { %647 = vrot.lane.b32.xlu1 %v3820_v34, %s4189_s5  ;;  %645 = vrot.lane.b32.xlu0 %v3819_v35, %s4189_s5 }
  0x6f   : > { %651 = vrot.lane.b32.xlu1 %v3822_v38, %s4189_s5  ;;  %649 = vrot.lane.b32.xlu0 %v3821_v39, %s4189_s5 }
  0x73   : > { %718 = vrot.lane.b32.xlu1 %v3815_v25, %s4190_s6  ;;  %716 = vrot.lane.b32.xlu0 %v3814_v20, %s4190_s6  ;;  %v4114_v25 = vld [vmem:[%s5201_s1 + $0x30] sm:$0xff]  }
  0x74   : > { %4036 = vmatpush3.bf16.msra.mxu0 %v4114_v25 }
  0x75   : > { %4037 = vmatprep.subr.bf16.mxu0 %v4115_v30 }
  0x77   : > { %722 = vrot.lane.b32.xlu1 %v3817_v29, %s4190_s6  ;;  %720 = vrot.lane.b32.xlu0 %v3816_v24, %s4190_s6  ;;  %v3853_v24 = vpack.c.bf16 %v3331_v19, %v3331_v19 }
  0x7b   : > { %726 = vrot.lane.b32.xlu1 %v3819_v35, %s4190_s6  ;;  %724 = vrot.lane.b32.xlu0 %v3818_v28, %s4190_s6  ;;  %v3353_v35 = vld [vmem:[%s4237_s19 + $0x6d] sm:$0xff] }
  0x7c   : > { %v3864_v40 = vpack.c.bf16 %v3353_v35, %v3353_v35  ;;  %v3541_v35 = vld [vmem:[%s4237_s19 + $0xc9] sm:$0xff] }
  0x7f   : > { %730 = vrot.lane.b32.xlu1 %v3821_v39, %s4190_s6  ;;  %728 = vrot.lane.b32.xlu0 %v3820_v34, %s4190_s6  ;;  %v4116_v34 = vld [vmem:[%s5201_s1 + $0x28] sm:$0xff]   ;;  %v4117_v39 = vld [vmem:[%s5201_s1 + $0x60] sm:$0xff]  }
  0x80   : > { %4038 = vmatpush3.bf16.msra.mxu0 %v4116_v34  ;;  %v3542_v34 = vld [vmem:[%s4237_s19 + $0xd1] sm:$0xff] }
  0x81   : > { %v306_v44 = vpop.permute.xlu1 %305  ;;  %v302_v45 = vpop.permute.xlu0 %301  ;;  %4039 = vmatprep.subr.bf16.mxu0 %v4117_v39 }
  0x82   : > { %334 = vst.msk [vmem:[#allocation2 + $0x20] sm:$0xf] %vm331_vm1, %v306_v44  ;;  %332 = vst.msk [vmem:[#allocation2] sm:$0xf] %vm331_vm1, %v302_v45  ;;  %v3373_v44 = vld [vmem:[%s4237_s19 + $0x66] sm:$0xff] }
  0x83   : > { %734 = vrot.lane.b32.xlu1 %v3832_v41, %s4190_s6  ;;  %732 = vrot.lane.b32.xlu0 %v3822_v38, %s4190_s6  ;;  %v3863_v41 = vpack.c.bf16 %v3352_v36, %v3352_v36  ;;  %v3873_v49 = vpack.c.bf16 %v3373_v44, %v3373_v44  ;;  %v4192_v36 = vmov 0   ;;  %v4131_v44 = vld [vmem:[%s5201_s1 + $0xb0] sm:$0xff]  }
  0x84   : > { %4040 = vmatpush3.bf16.msra.mxu0 %v4118_v42  ;;  %2763 = vmatprep.subr.bf16.mxu1 %v4192_v36  ;;  %v3355_v42 = vld [vmem:[%s4237_s19 + $0x7d] sm:$0xff] }
  0x85   : > { %v308_v50 = vpop.permute.xlu1 %307  ;;  %v304_v51 = vpop.permute.xlu0 %303 }
  0x86   : > { %335 = vst.msk [vmem:[#allocation2 + $0x30] sm:$0xf] %vm331_vm1, %v308_v50  ;;  %333 = vst.msk [vmem:[#allocation2 + $0x10] sm:$0xf] %vm331_vm1, %v304_v51  ;;  %v4120_v50 = vld [vmem:[%s5201_s1 + $0x18] sm:$0xff]  }
  0x87   : > { %801 = vrot.lane.b32.xlu1 %v3834_v46, %s4191_s7  ;;  %799 = vrot.lane.b32.xlu0 %v3833_v47, %s4191_s7  ;;  %v4119_v47 = vld [vmem:[%s5201_s1 + $0x58] sm:$0xff]  }
  0x88   : > { %v3395_v51 = vld [vmem:[%s4237_s19 + $0x76] sm:$0xff]  ;;  %4041 = vmatprep.subr.bf16.mxu0 %v4119_v47  ;;  %v3866_v47 = vpack.c.bf16 %v3355_v42, %v3355_v42 }
  0x89   : > { %v312_v56 = vpop.permute.xlu1 %311  ;;  %v310_v57 = vpop.permute.xlu0 %309  ;;  %4042 = vmatpush3.bf16.msra.mxu0 %v4120_v50  ;;  %v4476_v59 = vpack.c.bf16 %v3395_v51, %v3395_v51  ;;  %v3562_v50 = vld [vmem:[%s4237_s19 + $0xca] sm:$0xff] }
  0x8a   : > { %337 = vst.msk [vmem:[#allocation2 + $0x50] sm:$0xf] %vm331_vm1, %v312_v56  ;;  %336 = vst.msk [vmem:[#allocation2 + $0x40] sm:$0xf] %vm331_vm1, %v310_v57  ;;  %v4132_v51 = vld [vmem:[%s5201_s1 + $0xa8] sm:$0xff]  }
  0x8b   : > { %805 = vrot.lane.b32.xlu1 %v3836_v52, %s4191_s7  ;;  %803 = vrot.lane.b32.xlu0 %v3835_v53, %s4191_s7  ;;  %v3628_v52 = vld [vmem:[%s4237_s19 + $0xec] sm:$0xff]  ;;  %v3627_v53 = vld [vmem:[%s4237_s19 + $0xe4] sm:$0xff] }
  0x8c   : > { %v4465_v56 = vpack.c.bf16 %v3628_v52, %v3628_v52  ;;  %v4467_v57 = vpack.c.bf16 %v3627_v53, %v3627_v53 }
  0x8d   : > { %v316_v2 = vpop.permute.xlu1 %315  ;;  %v314_v3 = vpop.permute.xlu0 %313 }
  0x8e   : > { %339 = vst.msk [vmem:[#allocation2 + $0x70] sm:$0xf] %vm331_vm1, %v316_v2  ;;  %338 = vst.msk [vmem:[#allocation2 + $0x60] sm:$0xf] %vm331_vm1, %v314_v3  ;;  %v4123_v2 = vld [vmem:[%s5201_s1 + $0x48] sm:$0xff]  }
  0x8f   : > { %809 = vrot.lane.b32.xlu1 %v3838_v58, %s4191_s7  ;;  %807 = vrot.lane.b32.xlu0 %v3837_v61, %s4191_s7  ;;  %v4121_v58 = vld [vmem:[%s5201_s1 + $0x50] sm:$0xff]   ;;  %2163 = vst.msk [vmem:[#allocation2 + $0x1c] sm:$0xf] %vm248_vm0, %v4467_v57  ;;  %2164 = vst.msk [vmem:[#allocation2 + $0x2c] sm:$0xf] %vm248_vm0, %v4465_v56  ;;  %v3479_v3 = vld [vmem:[%s4237_s19 + $0x81] sm:$0xff] }
  0x90   : > { %v4122_v61 = vld [vmem:[%s5201_s1 + $0x10] sm:$0xff]   ;;  %4043 = vmatprep.subr.bf16.mxu0 %v4121_v58  ;;  %v3924_v6 = vpack.c.bf16 %v3479_v3, %v3479_v3  ;;  %v3376_v58 = vld [vmem:[%s4237_s19 + $0x7e] sm:$0xff] }
  0x91   : > { %v320_v12 = vpop.permute.xlu1 %319  ;;  %v318_v13 = vpop.permute.xlu0 %317  ;;  %4044 = vmatpush3.bf16.msra.mxu0 %v4122_v61 }
  0x92   : > { %341 = vst.msk [vmem:[#allocation2 + $0x90] sm:$0xf] %vm331_vm1, %v320_v12  ;;  %340 = vst.msk [vmem:[#allocation2 + $0x80] sm:$0xf] %vm331_vm1, %v318_v13  ;;  %4045 = vmatprep.subr.bf16.mxu0 %v4123_v2  ;;  %v4125_v13 = vld [vmem:[%s5201_s1 + $0x40] sm:$0xff]  }
  0x93   : > { %813 = vrot.lane.b32.xlu1 %v3840_v4, %s4191_s7  ;;  %811 = vrot.lane.b32.xlu0 %v3839_v7, %s4191_s7  ;;  %v3478_v4 = vld [vmem:[%s4237_s19 + $0x79] sm:$0xff]  ;;  %1527 = vst.msk [vmem:[#allocation2 + $0x18] sm:$0xf] %vm248_vm0, %v3924_v6  ;;  %v4135_v6 = vld [vmem:[%s5201_s1 + $0x90] sm:$0xff]  }
  0x94   : > { %v3923_v7 = vpack.c.bf16 %v3478_v4, %v3478_v4 }
  0x95   : > { %v387_v20 = vpop.permute.xlu1 %386  ;;  %v385_v21 = vpop.permute.xlu0 %384  ;;  %4046 = vmatpush3.bf16.msra.mxu0 %v4124_v8 }
  0x96   : > { %416 = vst.msk [vmem:[#allocation2 + $0x10] sm:$0xf] %vm414_vm2, %v387_v20  ;;  %415 = vst.msk [vmem:[#allocation2] sm:$0xf] %vm414_vm2, %v385_v21  ;;  %4047 = vmatprep.subr.bf16.mxu0 %v4125_v13  ;;  %v4519_v20 = vpack.c.bf16 %v3458_v17, %v3458_v17  ;;  %v3500_v21 = vld [vmem:[%s4237_s19 + $0x82] sm:$0xff] }
  0x97   : > { %817 = vrot.lane.b32.xlu1 %v3842_v15, %s4191_s7  ;;  %815 = vrot.lane.b32.xlu0 %v3841_v16, %s4191_s7  ;;  %1526 = vst.msk [vmem:[#allocation2 + $0x8] sm:$0xf] %vm248_vm0, %v3923_v7  ;;  %v3903_v15 = vpack.c.bf16 %v3436_v10, %v3436_v10  ;;  %v4126_v16 = vld [vmem:[%s5201_s1] sm:$0xff]   ;;  %v3934_v25 = vpack.c.bf16 %v3500_v21, %v3500_v21  ;;  %v3604_v10 = vld [vmem:[%s4237_s19 + $0xd3] sm:$0xff] }
  0x98   : > { %v3667_v17 = vld [vmem:[%s4237_s19 + $0xdd] sm:$0xff] }
  0x99   : > { %v391_v28 = vpop.permute.xlu1 %390  ;;  %v389_v29 = vpop.permute.xlu0 %388  ;;  %4048 = vmatpush3.bf16.msra.mxu0 %v4126_v16  ;;  %v3668_v16 = vld [vmem:[%s4237_s19 + $0xe5] sm:$0xff] }
  0x9a   : > { %418 = vst.msk [vmem:[#allocation2 + $0x30] sm:$0xf] %vm414_vm2, %v391_v28  ;;  %417 = vst.msk [vmem:[#allocation2 + $0x20] sm:$0xf] %vm414_vm2, %v389_v29  ;;  %v3520_v28 = vld [vmem:[%s4237_s19 + $0xc8] sm:$0xff]  ;;  %v4014_v22 = vpack.c.bf16 %v3668_v16, %v3668_v16 }
  0x9b   : > { %946 = vrot.lane.b32.xlu1 %v3854_v23, %s4185_s22  ;;  %944 = vrot.lane.b32.xlu0 %v3853_v24, %s4185_s22 }
  0x9d   : > { %v395_v37 = vpop.permute.xlu1 %394  ;;  %v393_v38 = vpop.permute.xlu0 %392 }
  0x9e   : > { %420 = vst.msk [vmem:[#allocation2 + $0x50] sm:$0xf] %vm414_vm2, %v395_v37  ;;  %419 = vst.msk [vmem:[#allocation2 + $0x40] sm:$0xf] %vm414_vm2, %v393_v38  ;;  %v4130_v37 = vld [vmem:[%s5201_s1 + $0xb8] sm:$0xff]  }
  0x9f   : > { %950 = vrot.lane.b32.xlu1 %v3856_v31, %s4185_s22  ;;  %948 = vrot.lane.b32.xlu0 %v3855_v32, %s4185_s22  ;;  %v3944_v31 = vpack.c.bf16 %v3521_v27, %v3521_v27  ;;  %v3943_v32 = vpack.c.bf16 %v3520_v28, %v3520_v28 }
  0xa0   : > { %2764 = vmatpush1.bf16.msra.mxu1 %v4130_v37 }
  0xa1   : > { %v399_v45 = vpop.permute.xlu1 %398  ;;  %v397_v46 = vpop.permute.xlu0 %396  ;;  %2765 = vmatprep.subr.bf16.mxu1 %v4192_v36 }
  0xa2   : > { %422 = vst.msk [vmem:[#allocation2 + $0x70] sm:$0xf] %vm414_vm2, %v399_v45  ;;  %421 = vst.msk [vmem:[#allocation2 + $0x60] sm:$0xf] %vm414_vm2, %v397_v46 }
  0xa3   : > { %1028 = vrot.lane.b32.xlu1 %v3864_v40, %s4186_s29  ;;  %1026 = vrot.lane.b32.xlu0 %v3863_v41, %s4186_s29  ;;  %v3954_v40 = vpack.c.bf16 %v3542_v34, %v3542_v34  ;;  %v3953_v41 = vpack.c.bf16 %v3541_v35, %v3541_v35 }
  0xa4   : > { %2766 = vmatpush1.bf16.msra.mxu1 %v4131_v44  ;;  %v3629_v44 = vld [vmem:[%s4237_s19 + $0xf4] sm:$0xff] }
  0xa5   : > { %v403_v54 = vpop.permute.xlu1 %402  ;;  %v401_v55 = vpop.permute.xlu0 %400  ;;  %2767 = vmatprep.subr.bf16.mxu1 %v4192_v36 }
  0xa6   : > { %424 = vst.msk [vmem:[#allocation2 + $0x90] sm:$0xf] %vm414_vm2, %v403_v54  ;;  %423 = vst.msk [vmem:[#allocation2 + $0x80] sm:$0xf] %vm414_vm2, %v401_v55  ;;  %v3963_v55 = vpack.c.bf16 %v3562_v50, %v3562_v50  ;;  %v3439_v50 = vld [vmem:[%s4237_s19 + $0x88] sm:$0xff] }
  0xa7   : > { %1110 = vrot.lane.b32.xlu1 %v3874_v48, %s4187_s30  ;;  %1108 = vrot.lane.b32.xlu0 %v3873_v49, %s4187_s30  ;;  %v3563_v49 = vld [vmem:[%s4237_s19 + $0xd2] sm:$0xff] }
  0xa8   : > { %2768 = vmatpush1.bf16.msra.mxu1 %v4132_v51  ;;  %v3964_v54 = vpack.c.bf16 %v3563_v49, %v3563_v49  ;;  %v3480_v49 = vld [vmem:[%s4237_s19 + $0x89] sm:$0xff] }
  0xa9   : > { %v470_v63 = vpop.permute.xlu1 %469  ;;  %v468_v0 = vpop.permute.xlu0 %467  ;;  %2769 = vmatprep.subr.bf16.mxu1 %v4192_v36 }
  0xaa   : > { %499 = vst.msk [vmem:[#allocation2 + $0x10] sm:$0xf] %vm497_vm3, %v470_v63  ;;  %498 = vst.msk [vmem:[#allocation2] sm:$0xf] %vm497_vm3, %v468_v0  ;;  %v3876_v63 = vpack.c.bf16 %v3376_v58, %v3376_v58  ;;  %v3584_v0 = vld [vmem:[%s4237_s19 + $0xda] sm:$0xff] }
  0xab   : > { %1191 = vrot.lane.b32.xlu1 %v4476_v59, %s4188_s4  ;;  %1189 = vrot.lane.b32.xlu0 %v3874_v48, %s4188_s4  ;;  %v3865_v48 = vpack.c.bf16 %v3354_v43, %v3354_v43  ;;  %v4583_v4 = vpack.c.bf16 %v3584_v0, %v3584_v0  ;;  %v3630_v43 = vld [vmem:[%s4237_s19 + $0xfc] sm:$0xff]  ;;  %v3502_v0 = vld [vmem:[%s4237_s19 + $0x92] sm:$0xff] }
  0xac   : > { %2770 = vmatpush1.bf16.msra.mxu1 %v4133_v60 }
  0xad   : > { %v474_v11 = vpop.permute.xlu1 %473  ;;  %v472_v12 = vpop.permute.xlu0 %471  ;;  %2771 = vmatprep.subr.bf16.mxu1 %v4192_v36 }
  0xae   : > { %501 = vst.msk [vmem:[#allocation2 + $0x30] sm:$0xf] %vm497_vm3, %v474_v11  ;;  %500 = vst.msk [vmem:[#allocation2 + $0x20] sm:$0xf] %vm497_vm3, %v472_v12  ;;  %v4136_v11 = vld [vmem:[%s5201_s1 + $0x88] sm:$0xff]  }
  0xaf   : > { %1272 = vrot.lane.b32.xlu1 %v3894_v1, %s4189_s5  ;;  %1270 = vrot.lane.b32.xlu0 %v3893_v5, %s4189_s5  ;;  %v4134_v1 = vld [vmem:[%s5201_s1 + $0x98] sm:$0xff]   ;;  %v3397_v5 = vld [vmem:[%s4237_s19 + $0x86] sm:$0xff] }
  0xb0   : > { %2772 = vmatpush1.bf16.msra.mxu1 %v4134_v1  ;;  %v3501_v1 = vld [vmem:[%s4237_s19 + $0x8a] sm:$0xff] }
  0xb1   : > { %v478_v18 = vpop.permute.xlu1 %477  ;;  %v476_v19 = vpop.permute.xlu0 %475  ;;  %2773 = vmatprep.subr.bf16.mxu1 %v4192_v36 }
  0xb2   : > { %503 = vst.msk [vmem:[#allocation2 + $0x50] sm:$0xf] %vm497_vm3, %v478_v18  ;;  %502 = vst.msk [vmem:[#allocation2 + $0x40] sm:$0xf] %vm497_vm3, %v476_v19  ;;  %v4137_v18 = vld [vmem:[%s5201_s1 + $0x80] sm:$0xff]  }
  0xb3   : > { %1354 = vrot.lane.b32.xlu1 %v3904_v14, %s4190_s6  ;;  %1352 = vrot.lane.b32.xlu0 %v3903_v15, %s4190_s6  ;;  %v3983_v15 = vpack.c.bf16 %v3604_v10, %v3604_v10 }
  0xb4   : > { %2774 = vmatpush1.bf16.msra.mxu1 %v4135_v6 }
  0xb5   : > { %v482_v23 = vpop.permute.xlu1 %481  ;;  %v480_v24 = vpop.permute.xlu0 %479  ;;  %2775 = vmatprep.subr.bf16.mxu1 %v4192_v36 }
  0xb6   : > { %505 = vst.msk [vmem:[#allocation2 + $0x70] sm:$0xf] %vm497_vm3, %v482_v23  ;;  %504 = vst.msk [vmem:[#allocation2 + $0x60] sm:$0xf] %vm497_vm3, %v480_v24  ;;  %v4013_v23 = vpack.c.bf16 %v3667_v17, %v3667_v17  ;;  %v3418_v24 = vld [vmem:[%s4237_s19 + $0x87] sm:$0xff] }
  0xb7   : > { %1436 = vrot.lane.b32.xlu1 %v4519_v20, %s4191_s7  ;;  %1434 = vrot.lane.b32.xlu0 %v3904_v14, %s4191_s7  ;;  %v3984_v14 = vpack.c.bf16 %v3605_v9, %v3605_v9  ;;  %v3522_v9 = vld [vmem:[%s4237_s19 + $0xd8] sm:$0xff] }
  0xb8   : > { %2776 = vmatpush1.bf16.msra.mxu1 %v4136_v11 }
  0xb9   : > { %v486_v29 = vpop.permute.xlu1 %485  ;;  %v484_v30 = vpop.permute.xlu0 %483  ;;  %2777 = vmatprep.subr.bf16.mxu1 %v4192_v36 }
  0xba   : > { %507 = vst.msk [vmem:[#allocation2 + $0x90] sm:$0xf] %vm497_vm3, %v486_v29  ;;  %506 = vst.msk [vmem:[#allocation2 + $0x80] sm:$0xf] %vm497_vm3, %v484_v30  ;;  %v3896_v29 = vpack.c.bf16 %v3418_v24, %v3418_v24 }
  0xbb   : > { %1580 = vrot.lane.b32.xlu1 %v3934_v25, %s4185_s22  ;;  %1578 = vrot.lane.b32.xlu0 %v3933_v26, %s4185_s22  ;;  %v3417_v25 = vld [vmem:[%s4237_s19 + $0x7f] sm:$0xff]  ;;  %v4138_v26 = vld [vmem:[%s5201_s1 + $0xd0] sm:$0xff]  }
  0xbc   : > { %2778 = vmatpush1.bf16.msra.mxu1 %v4137_v18  ;;  %v3895_v30 = vpack.c.bf16 %v3417_v25, %v3417_v25 }
  0xbd   : > { %v553_v38 = vpop.permute.xlu1 %552  ;;  %v551_v39 = vpop.permute.xlu0 %550  ;;  %2789 = vmatprep.subr.bf16.mxu1 %v4192_v36 }
  0xbe   : > { %582 = vst.msk [vmem:[#allocation2 + $0x10] sm:$0xf] %vm580_vm4, %v553_v38  ;;  %581 = vst.msk [vmem:[#allocation2] sm:$0xf] %vm580_vm4, %v551_v39  ;;  %v3689_v38 = vld [vmem:[%s4237_s19 + $0xe6] sm:$0xff]  ;;  %v3688_v39 = vld [vmem:[%s4237_s19 + $0xde] sm:$0xff] }
  0xbf   : > { %1662 = vrot.lane.b32.xlu1 %v3944_v31, %s4186_s29  ;;  %1660 = vrot.lane.b32.xlu0 %v3943_v32, %s4186_s29  ;;  %v3625_v31 = vld [vmem:[%s4237_s19 + $0xd4] sm:$0xff]  ;;  %v4139_v32 = vld [vmem:[%s5201_s1 + $0xc8] sm:$0xff]  }
  0xc0   : > { %2790 = vmatpush2.bf16.msra.mxu1 %v4138_v26  ;;  %v3993_v37 = vpack.c.bf16 %v3625_v31, %v3625_v31 }
  0xc1   : > { %v557_v45 = vpop.permute.xlu1 %556  ;;  %v555_v46 = vpop.permute.xlu0 %554  ;;  %2791 = vmatprep.subr.bf16.mxu1 %v4192_v36 }
  0xc2   : > { %584 = vst.msk [vmem:[#allocation2 + $0x30] sm:$0xf] %vm580_vm4, %v557_v45  ;;  %583 = vst.msk [vmem:[#allocation2 + $0x20] sm:$0xf] %vm580_vm4, %v555_v46  ;;  %v4647_v45 = vpack.c.bf16 %v3630_v43, %v3630_v43  ;;  %v4649_v46 = vpack.c.bf16 %v3629_v44, %v3629_v44  ;;  %v3586_v43 = vld [vmem:[%s4237_s19 + $0xea] sm:$0xff] }
  0xc3   : > { %1744 = vrot.lane.b32.xlu1 %v3954_v40, %s4187_s30  ;;  %1742 = vrot.lane.b32.xlu0 %v3953_v41, %s4187_s30  ;;  %v4140_v40 = vld [vmem:[%s5201_s1 + $0xc0] sm:$0xff]  }
  0xc4   : > { %2792 = vmatpush2.bf16.msra.mxu1 %v4139_v32  ;;  %2165 = vst.msk [vmem:[#allocation2 + $0x3c] sm:$0xf] %vm248_vm0, %v4649_v46  ;;  %2166 = vst.msk [vmem:[#allocation2 + $0x4c] sm:$0xf] %vm248_vm0, %v4647_v45 }
  0xc5   : > { %v561_v52 = vpop.permute.xlu1 %560  ;;  %v559_v53 = vpop.permute.xlu0 %558  ;;  %2793 = vmatprep.subr.bf16.mxu1 %v4192_v36  ;;  %v4024_v36 = vpack.c.bf16 %v3689_v38, %v3689_v38 }
  0xc6   : > { %586 = vst.msk [vmem:[#allocation2 + $0x50] sm:$0xf] %vm580_vm4, %v561_v52  ;;  %585 = vst.msk [vmem:[#allocation2 + $0x40] sm:$0xf] %vm580_vm4, %v559_v53  ;;  %v3925_v52 = vpack.c.bf16 %v3480_v49, %v3480_v49 }
  0xc7   : > { %1032 = vrot.lane.b32.xlu1 %v3866_v47, %s4186_s29  ;;  %1030 = vrot.lane.b32.xlu0 %v3865_v48, %s4186_s29  ;;  %v4023_v47 = vpack.c.bf16 %v3688_v39, %v3688_v39  ;;  %v3481_v48 = vld [vmem:[%s4237_s19 + $0x91] sm:$0xff] }
  0xc8   : > { %2794 = vmatpush2.bf16.msra.mxu1 %v4140_v40  ;;  %v3926_v51 = vpack.c.bf16 %v3481_v48, %v3481_v48  ;;  %1528 = vst.msk [vmem:[#allocation2 + $0x28] sm:$0xf] %vm248_vm0, %v3925_v52  ;;  %v3378_v39 = vld [vmem:[%s4237_s19 + $0x8e] sm:$0xff]  ;;  %v3399_v48 = vld [vmem:[%s4237_s19 + $0x96] sm:$0xff] }
  0xc9   : > { %v565_v61 = vpop.permute.xlu1 %564  ;;  %v563_v62 = vpop.permute.xlu0 %562 }
  0xca   : > { %588 = vst.msk [vmem:[#allocation2 + $0x70] sm:$0xf] %vm580_vm4, %v565_v61  ;;  %587 = vst.msk [vmem:[#allocation2 + $0x60] sm:$0xf] %vm580_vm4, %v563_v62  ;;  %v3315_v62 = vld [vmem:[%s4237_s19 + $0x3e] sm:$0xff] }
  0xcb   : > { %1826 = vrot.lane.b32.xlu1 %v3964_v54, %s4188_s4  ;;  %1824 = vrot.lane.b32.xlu0 %v3963_v55, %s4188_s4  ;;  %1529 = vst.msk [vmem:[#allocation2 + $0x38] sm:$0xf] %vm248_vm0, %v3926_v51  ;;  %v3460_v55 = vld [vmem:[%s4237_s19 + $0x90] sm:$0xff] }
  0xcc   : > { %v4673_v61 = vpack.c.bf16 %v3460_v55, %v3460_v55  ;;  %v3607_v51 = vld [vmem:[%s4237_s19 + $0xeb] sm:$0xff]  ;;  %v3670_v55 = vld [vmem:[%s4237_s19 + $0xf5] sm:$0xff] }
  0xcd   : > { %v569_v2 = vpop.permute.xlu1 %568  ;;  %v567_v3 = vpop.permute.xlu0 %566 }
  0xce   : > { %590 = vst.msk [vmem:[#allocation2 + $0x90] sm:$0xf] %vm580_vm4, %v569_v2  ;;  %589 = vst.msk [vmem:[#allocation2 + $0x80] sm:$0xf] %vm580_vm4, %v567_v3  ;;  %v3848_v2 = vpack.c.bf16 %v3315_v62, %v3315_v62 }
  0xcf   : > { %1114 = vrot.lane.b32.xlu1 %v3876_v63, %s4187_s30  ;;  %1112 = vrot.lane.b32.xlu0 %v4476_v59, %s4187_s30  ;;  %v4595_v59 = vpack.c.bf16 %v3397_v5, %v3397_v5 }
  0xd0   : > { %897 = vst.msk [vmem:[#allocation2 + $0x54] sm:$0xf] %vm248_vm0, %v3848_v2  ;;  %v3419_v2 = vld [vmem:[%s4237_s19 + $0x8f] sm:$0xff] }
  0xd1   : > { %v636_v7 = vpop.permute.xlu1 %635  ;;  %v634_v8 = vpop.permute.xlu0 %633 }
  0xd2   : > { %665 = vst.msk [vmem:[#allocation2 + $0x10] sm:$0xf] %vm663_vm5, %v636_v7  ;;  %664 = vst.msk [vmem:[#allocation2] sm:$0xf] %vm663_vm5, %v634_v8  ;;  %v3935_v7 = vpack.c.bf16 %v3501_v1, %v3501_v1  ;;  %v3523_v8 = vld [vmem:[%s4237_s19 + $0xe0] sm:$0xff]  ;;  %v3420_v1 = vld [vmem:[%s4237_s19 + $0x97] sm:$0xff] }
  0xd3   : > { %1908 = vrot.lane.b32.xlu1 %v4583_v4, %s4189_s5  ;;  %1906 = vrot.lane.b32.xlu0 %v3964_v54, %s4189_s5 }
  0xd5   : > { %v640_v12 = vpop.permute.xlu1 %639  ;;  %v638_v13 = vpop.permute.xlu0 %637 }
  0xd6   : > { %667 = vst.msk [vmem:[#allocation2 + $0x30] sm:$0xf] %vm663_vm5, %v640_v12  ;;  %666 = vst.msk [vmem:[#allocation2 + $0x20] sm:$0xf] %vm663_vm5, %v638_v13  ;;  %v3946_v12 = vpack.c.bf16 %v3523_v8, %v3523_v8  ;;  %v3945_v13 = vpack.c.bf16 %v3522_v9, %v3522_v9  ;;  %v3691_v9 = vld [vmem:[%s4237_s19 + $0xf6] sm:$0xff] }
  0xd7   : > { %1195 = vrot.lane.b32.xlu1 %v4595_v59, %s4188_s4  ;;  %1193 = vrot.lane.b32.xlu0 %v3876_v63, %s4188_s4  ;;  %v3314_v63 = vld [vmem:[%s4237_s19 + $0x36] sm:$0xff] }
  0xd8   : > { %v3847_v3 = vpack.c.bf16 %v3314_v63, %v3314_v63  ;;  %v4016_v63 = vpack.c.bf16 %v3670_v55, %v3670_v55  ;;  %v3546_v55 = vld [vmem:[%s4237_s19 + $0xf1] sm:$0xff] }
  0xd9   : > { %v644_v19 = vpop.permute.xlu1 %643  ;;  %v642_v21 = vpop.permute.xlu0 %641 }
  0xda   : > { %669 = vst.msk [vmem:[#allocation2 + $0x50] sm:$0xf] %vm663_vm5, %v644_v19  ;;  %668 = vst.msk [vmem:[#allocation2 + $0x40] sm:$0xf] %vm663_vm5, %v642_v21  ;;  %v3544_v21 = vld [vmem:[%s4237_s19 + $0xe1] sm:$0xff] }
  0xdb   : > { %1990 = vrot.lane.b32.xlu1 %v3984_v14, %s4190_s6  ;;  %1988 = vrot.lane.b32.xlu0 %v3983_v15, %s4190_s6  ;;  %896 = vst.msk [vmem:[#allocation2 + $0x44] sm:$0xf] %vm248_vm0, %v3847_v3  ;;  %v3336_v14 = vld [vmem:[%s4237_s19 + $0x8c] sm:$0xff]  ;;  %v3335_v15 = vld [vmem:[%s4237_s19 + $0x84] sm:$0xff]  ;;  %v3956_v25 = vpack.c.bf16 %v3544_v21, %v3544_v21 }
  0xdc   : > { %v3858_v18 = vpack.c.bf16 %v3336_v14, %v3336_v14  ;;  %v3857_v19 = vpack.c.bf16 %v3335_v15, %v3335_v15  ;;  %v3631_v14 = vld [vmem:[%s4237_s19 + $0x104] sm:$0xff]  ;;  %v3482_v21 = vld [vmem:[%s4237_s19 + $0x99] sm:$0xff] }
  0xdd   : > { %v648_v27 = vpop.permute.xlu1 %647  ;;  %v646_v28 = vpop.permute.xlu0 %645 }
  0xde   : > { %671 = vst.msk [vmem:[#allocation2 + $0x70] sm:$0xf] %vm663_vm5, %v648_v27  ;;  %670 = vst.msk [vmem:[#allocation2 + $0x60] sm:$0xf] %vm663_vm5, %v646_v28  ;;  %v3357_v27 = vld [vmem:[%s4237_s19 + $0x8d] sm:$0xff]  ;;  %v3356_v28 = vld [vmem:[%s4237_s19 + $0x85] sm:$0xff] }
  0xdf   : > { %2216 = vrot.lane.b32.xlu1 %v4014_v22, %s4185_s22  ;;  %2214 = vrot.lane.b32.xlu0 %v4013_v23, %s4185_s22  ;;  %v3543_v22 = vld [vmem:[%s4237_s19 + $0xd9] sm:$0xff]  ;;  %v3868_v31 = vpack.c.bf16 %v3357_v27, %v3357_v27  ;;  %v3867_v32 = vpack.c.bf16 %v3356_v28, %v3356_v28 }
  0xe0   : > { %v3955_v26 = vpack.c.bf16 %v3543_v22, %v3543_v22  ;;  %v3441_v22 = vld [vmem:[%s4237_s19 + $0x98] sm:$0xff] }
  0xe1   : > { %v652_v34 = vpop.permute.xlu1 %651  ;;  %v650_v35 = vpop.permute.xlu0 %649 }
  0xe2   : > { %673 = vst.msk [vmem:[#allocation2 + $0x90] sm:$0xf] %vm663_vm5, %v652_v34  ;;  %672 = vst.msk [vmem:[#allocation2 + $0x80] sm:$0xf] %vm663_vm5, %v650_v35  ;;  %v3565_v34 = vld [vmem:[%s4237_s19 + $0xe2] sm:$0xff] }
  0xe3   : > { %1276 = vrot.lane.b32.xlu1 %v3896_v29, %s4189_s5  ;;  %1274 = vrot.lane.b32.xlu0 %v3895_v30, %s4189_s5  ;;  %v3966_v38 = vpack.c.bf16 %v3565_v34, %v3565_v34  ;;  %v3503_v34 = vld [vmem:[%s4237_s19 + $0x9a] sm:$0xff] }
  0xe5   : > { %v719_v41 = vpop.permute.xlu1 %718  ;;  %v717_v42 = vpop.permute.xlu0 %716 }
  0xe6   : > { %748 = vst.msk [vmem:[#allocation2 + $0x10] sm:$0xf] %vm746_vm6, %v719_v41  ;;  %747 = vst.msk [vmem:[#allocation2] sm:$0xf] %vm746_vm6, %v717_v42  ;;  %v3878_v42 = vpack.c.bf16 %v3378_v39, %v3378_v39 }
  0xe7   : > { %2072 = vrot.lane.b32.xlu1 %v4349_v33, %s4191_s7  ;;  %2070 = vrot.lane.b32.xlu0 %v3993_v37, %s4191_s7  ;;  %v3906_v33 = vpack.c.bf16 %v3439_v50, %v3439_v50  ;;  %v4735_v50 = vpack.c.bf16 %v3399_v48, %v3399_v48 }
  0xe9   : > { %v723_v53 = vpop.permute.xlu1 %722  ;;  %v721_v54 = vpop.permute.xlu0 %720 }
  0xea   : > { %750 = vst.msk [vmem:[#allocation2 + $0x30] sm:$0xf] %vm746_vm6, %v723_v53  ;;  %749 = vst.msk [vmem:[#allocation2 + $0x20] sm:$0xf] %vm746_vm6, %v721_v54  ;;  %v3986_v54 = vpack.c.bf16 %v3607_v51, %v3607_v51  ;;  %v3338_v51 = vld [vmem:[%s4237_s19 + $0x9c] sm:$0xff] }
  0xeb   : > { %2298 = vrot.lane.b32.xlu1 %v4024_v36, %s4186_s29  ;;  %2296 = vrot.lane.b32.xlu0 %v4023_v47, %s4186_s29  ;;  %v4727_v47 = vpack.c.bf16 %v3586_v43, %v3586_v43  ;;  %v3525_v43 = vld [vmem:[%s4237_s19 + $0xf0] sm:$0xff] }
  0xed   : > { %v727_v58 = vpop.permute.xlu1 %726  ;;  %v725_v60 = vpop.permute.xlu0 %724 }
  0xee   : > { %752 = vst.msk [vmem:[#allocation2 + $0x50] sm:$0xf] %vm746_vm6, %v727_v58  ;;  %751 = vst.msk [vmem:[#allocation2 + $0x40] sm:$0xf] %vm746_vm6, %v725_v60  ;;  %v3669_v58 = vld [vmem:[%s4237_s19 + $0xed] sm:$0xff] }
  0xef   : > { %1358 = vrot.lane.b32.xlu1 %v3906_v33, %s4190_s6  ;;  %1356 = vrot.lane.b32.xlu0 %v4519_v20, %s4190_s6  ;;  %v3936_v20 = vpack.c.bf16 %v3502_v0, %v3502_v0  ;;  %v4015_v0 = vpack.c.bf16 %v3669_v58, %v3669_v58  ;;  %v3545_v58 = vld [vmem:[%s4237_s19 + $0xe9] sm:$0xff] }
  0xf1   : > { %v731_v5 = vpop.permute.xlu1 %730  ;;  %v729_v6 = vpop.permute.xlu0 %728 }
  0xf2   : > { %754 = vst.msk [vmem:[#allocation2 + $0x70] sm:$0xf] %vm746_vm6, %v731_v5  ;;  %753 = vst.msk [vmem:[#allocation2 + $0x60] sm:$0xf] %vm746_vm6, %v729_v6  ;;  %v3898_v6 = vpack.c.bf16 %v3420_v1, %v3420_v1  ;;  %v3359_v1 = vld [vmem:[%s4237_s19 + $0x9d] sm:$0xff] }
  0xf3   : > { %1440 = vrot.lane.b32.xlu1 %v4673_v61, %s4191_s7  ;;  %1438 = vrot.lane.b32.xlu0 %v3906_v33, %s4191_s7 }
  0xf5   : > { %v735_v10 = vpop.permute.xlu1 %734  ;;  %v733_v11 = vpop.permute.xlu0 %732 }
  0xf6   : > { %756 = vst.msk [vmem:[#allocation2 + $0x90] sm:$0xf] %vm746_vm6, %v735_v10  ;;  %755 = vst.msk [vmem:[#allocation2 + $0x80] sm:$0xf] %vm746_vm6, %v733_v11  ;;  %v3690_v10 = vld [vmem:[%s4237_s19 + $0xee] sm:$0xff] }
  0xf7   : > { %1584 = vrot.lane.b32.xlu1 %v3936_v20, %s4185_s22  ;;  %1582 = vrot.lane.b32.xlu0 %v3935_v7, %s4185_s22  ;;  %v3897_v20 = vpack.c.bf16 %v3419_v2, %v3419_v2  ;;  %v3358_v2 = vld [vmem:[%s4237_s19 + $0x95] sm:$0xff] }
  0xf9   : > { %v802_v16 = vpop.permute.xlu1 %801  ;;  %v800_v17 = vpop.permute.xlu0 %799 }
  0xfa   : > { %831 = vst.msk [vmem:[#allocation2 + $0x10] sm:$0xf] %vm829_vm7, %v802_v16  ;;  %830 = vst.msk [vmem:[#allocation2] sm:$0xf] %vm829_vm7, %v800_v17  ;;  %v4768_v16 = vpack.c.bf16 %v3631_v14, %v3631_v14  ;;  %v4026_v17 = vpack.c.bf16 %v3691_v9, %v3691_v9 }
  0xfb   : > { %1666 = vrot.lane.b32.xlu1 %v3946_v12, %s4186_s29  ;;  %1664 = vrot.lane.b32.xlu0 %v3945_v13, %s4186_s29  ;;  %v3632_v13 = vld [vmem:[%s4237_s19 + $0x10c] sm:$0xff] }
  0xfc   : > { %v4766_v15 = vpack.c.bf16 %v3632_v13, %v3632_v13  ;;  %2167 = vst.msk [vmem:[#allocation2 + $0x5c] sm:$0xf] %vm248_vm0, %v4768_v16 }
  0xfd   : > { %v806_v23 = vpop.permute.xlu1 %805  ;;  %v804_v24 = vpop.permute.xlu0 %803 }
  0xfe   : > { %833 = vst.msk [vmem:[#allocation2 + $0x30] sm:$0xf] %vm829_vm7, %v806_v23  ;;  %832 = vst.msk [vmem:[#allocation2 + $0x20] sm:$0xf] %vm829_vm7, %v804_v24  ;;  %v3927_v24 = vpack.c.bf16 %v3482_v21, %v3482_v21 }
  0xff   : > { %954 = vrot.lane.b32.xlu1 %v3858_v18, %s4185_s22  ;;  %952 = vrot.lane.b32.xlu0 %v3857_v19, %s4185_s22  ;;  %v4025_v18 = vpack.c.bf16 %v3690_v10, %v3690_v10  ;;  %v3483_v19 = vld [vmem:[%s4237_s19 + $0xa1] sm:$0xff]  ;;  %2168 = vst.msk [vmem:[#allocation2 + $0x6c] sm:$0xf] %vm248_vm0, %v4766_v15 }
 0x100   : > { %v3928_v23 = vpack.c.bf16 %v3483_v19, %v3483_v19  ;;  %1530 = vst.msk [vmem:[#allocation2 + $0x48] sm:$0xf] %vm248_vm0, %v3927_v24  ;;  %v3634_v24 = vld [vmem:[%s4237_s19 + $0x11c] sm:$0xff] }
 0x101   : > { %v810_v29 = vpop.permute.xlu1 %809  ;;  %v808_v30 = vpop.permute.xlu0 %807 }
 0x102   : > { %835 = vst.msk [vmem:[#allocation2 + $0x50] sm:$0xf] %vm829_vm7, %v810_v29  ;;  %834 = vst.msk [vmem:[#allocation2 + $0x40] sm:$0xf] %vm829_vm7, %v808_v30  ;;  %v3317_v30 = vld [vmem:[%s4237_s19 + $0x4e] sm:$0xff] }
 0x103   : > { %1748 = vrot.lane.b32.xlu1 %v3956_v25, %s4187_s30  ;;  %1746 = vrot.lane.b32.xlu0 %v3955_v26, %s4187_s30  ;;  %1531 = vst.msk [vmem:[#allocation2 + $0x58] sm:$0xf] %vm248_vm0, %v3928_v23 }
 0x105   : > { %v814_v35 = vpop.permute.xlu1 %813  ;;  %v812_v37 = vpop.permute.xlu0 %811 }
 0x106   : > { %837 = vst.msk [vmem:[#allocation2 + $0x70] sm:$0xf] %vm829_vm7, %v814_v35  ;;  %836 = vst.msk [vmem:[#allocation2 + $0x60] sm:$0xf] %vm829_vm7, %v812_v37  ;;  %v3850_v35 = vpack.c.bf16 %v3317_v30, %v3317_v30 }
 0x107   : > { %1036 = vrot.lane.b32.xlu1 %v3868_v31, %s4186_s29  ;;  %1034 = vrot.lane.b32.xlu0 %v3867_v32, %s4186_s29  ;;  %v3316_v31 = vld [vmem:[%s4237_s19 + $0x46] sm:$0xff] }
 0x108   : > { %v3504_v32 = vld [vmem:[%s4237_s19 + $0xa2] sm:$0xff]  ;;  %v3849_v37 = vpack.c.bf16 %v3316_v31, %v3316_v31  ;;  %899 = vst.msk [vmem:[#allocation2 + $0x74] sm:$0xf] %vm248_vm0, %v3850_v35 }
 0x109   : > { %v818_v40 = vpop.permute.xlu1 %817  ;;  %v816_v41 = vpop.permute.xlu0 %815  ;;  %v3671_v35 = vld [vmem:[%s4237_s19 + $0xfd] sm:$0xff] }
 0x10a   : > { %839 = vst.msk [vmem:[#allocation2 + $0x90] sm:$0xf] %vm829_vm7, %v818_v40  ;;  %838 = vst.msk [vmem:[#allocation2 + $0x80] sm:$0xf] %vm829_vm7, %v816_v41  ;;  %v4127_v40 = vld [vmem:[#allocation2] ss:$16 sps:$4 sm:$0xff]  }
 0x10b   : > { %1830 = vrot.lane.b32.xlu1 %v3966_v38, %s4188_s4  ;;  %1828 = vrot.lane.b32.xlu0 %v4583_v4, %s4188_s4  ;;  %898 = vst.msk [vmem:[#allocation2 + $0x64] sm:$0xf] %vm248_vm0, %v3849_v37 }
 0x10d   : > { %v947_v44 = vpop.permute.xlu1 %946  ;;  %v945_v36 = vpop.permute.xlu0 %944 }
 0x10e   : > { %975 = vst.msk [vmem:[#allocation2 + $0x14] sm:$0xf] %vm331_vm1, %v947_v44  ;;  %974 = vst.msk [vmem:[#allocation2 + $0x4] sm:$0xf] %vm331_vm1, %v945_v36  ;;  %v3524_v44 = vld [vmem:[%s4237_s19 + $0xe8] sm:$0xff] }
 0x10f   : > { %1118 = vrot.lane.b32.xlu1 %v3878_v42, %s4187_s30  ;;  %1116 = vrot.lane.b32.xlu0 %v4595_v59, %s4187_s30  ;;  %v3606_v59 = vld [vmem:[%s4237_s19 + $0xe3] sm:$0xff] }
 0x110   : > { %v3985_v33 = vpack.c.bf16 %v3606_v59, %v3606_v59  ;;  %v3337_v59 = vld [vmem:[%s4237_s19 + $0x94] sm:$0xff] }
 0x111   : > { %v951_v49 = vpop.permute.xlu1 %950  ;;  %v949_v4 = vpop.permute.xlu0 %948 }
 0x112   : > { %977 = vst.msk [vmem:[#allocation2 + $0x34] sm:$0xf] %vm331_vm1, %v951_v49  ;;  %976 = vst.msk [vmem:[#allocation2 + $0x24] sm:$0xf] %vm331_vm1, %v949_v4  ;;  %v3948_v49 = vpack.c.bf16 %v3525_v43, %v3525_v43  ;;  %v3947_v4 = vpack.c.bf16 %v3524_v44, %v3524_v44 }
 0x113   : > { %1912 = vrot.lane.b32.xlu1 %v4727_v47, %s4189_s5  ;;  %1910 = vrot.lane.b32.xlu0 %v3966_v38, %s4189_s5 }
 0x115   : > { %v1029_v52 = vpop.permute.xlu1 %1028  ;;  %v1027_v53 = vpop.permute.xlu0 %1026 }
 0x116   : > { %1057 = vst.msk [vmem:[#allocation2 + $0x14] sm:$0xf] %vm414_vm2, %v1029_v52  ;;  %1056 = vst.msk [vmem:[#allocation2 + $0x4] sm:$0xf] %vm414_vm2, %v1027_v53 }
 0x117   : > { %1199 = vrot.lane.b32.xlu1 %v4735_v50, %s4188_s4  ;;  %1197 = vrot.lane.b32.xlu0 %v3878_v42, %s4188_s4  ;;  %v3937_v42 = vpack.c.bf16 %v3503_v34, %v3503_v34  ;;  %v3672_v34 = vld [vmem:[%s4237_s19 + $0x105] sm:$0xff] }
 0x119   : > { %v1111_v60 = vpop.permute.xlu1 %1110  ;;  %v1109_v62 = vpop.permute.xlu0 %1108 }
 0x11a   : > { %1139 = vst.msk [vmem:[#allocation2 + $0x14] sm:$0xf] %vm497_vm3, %v1111_v60  ;;  %1138 = vst.msk [vmem:[#allocation2 + $0x4] sm:$0xf] %vm497_vm3, %v1109_v62 }
 0x11b   : > { %1994 = vrot.lane.b32.xlu1 %v3986_v54, %s4190_s6  ;;  %1992 = vrot.lane.b32.xlu0 %v3985_v33, %s4190_s6  ;;  %v3860_v54 = vpack.c.bf16 %v3338_v51, %v3338_v51  ;;  %v3859_v33 = vpack.c.bf16 %v3337_v59, %v3337_v59  ;;  %v3692_v51 = vld [vmem:[%s4237_s19 + $0xfe] sm:$0xff] }
 0x11d   : > { %v1192_v3 = vpop.permute.xlu1 %1191  ;;  %v1190_v5 = vpop.permute.xlu0 %1189 }
 0x11e   : > { %1220 = vst.msk [vmem:[#allocation2 + $0x14] sm:$0xf] %vm580_vm4, %v1192_v3  ;;  %1219 = vst.msk [vmem:[#allocation2 + $0x4] sm:$0xf] %vm580_vm4, %v1190_v5 }
 0x11f   : > { %2220 = vrot.lane.b32.xlu1 %v4016_v63, %s4185_s22  ;;  %2218 = vrot.lane.b32.xlu0 %v4015_v0, %s4185_s22  ;;  %v3958_v63 = vpack.c.bf16 %v3546_v55, %v3546_v55  ;;  %v3957_v0 = vpack.c.bf16 %v3545_v58, %v3545_v58  ;;  %v4027_v55 = vpack.c.bf16 %v3692_v51, %v3692_v51  ;;  %v3485_v58 = vld [vmem:[%s4237_s19 + $0xb1] sm:$0xff] }
 0x121   : > { %v1273_v7 = vpop.permute.xlu1 %1272  ;;  %v1271_v8 = vpop.permute.xlu0 %1270 }
 0x122   : > { %1301 = vst.msk [vmem:[#allocation2 + $0x14] sm:$0xf] %vm663_vm5, %v1273_v7  ;;  %1300 = vst.msk [vmem:[#allocation2 + $0x4] sm:$0xf] %vm663_vm5, %v1271_v8  ;;  %v3567_v7 = vld [vmem:[%s4237_s19 + $0xf2] sm:$0xff] }
 0x123   : > { %1280 = vrot.lane.b32.xlu1 %v3898_v6, %s4189_s5  ;;  %1278 = vrot.lane.b32.xlu0 %v3897_v20, %s4189_s5  ;;  %v3870_v6 = vpack.c.bf16 %v3359_v1, %v3359_v1  ;;  %v3869_v20 = vpack.c.bf16 %v3358_v2, %v3358_v2  ;;  %v3968_v10 = vpack.c.bf16 %v3567_v7, %v3567_v7 }
 0x125   : > { %v1355_v11 = vpop.permute.xlu1 %1354  ;;  %v1353_v12 = vpop.permute.xlu0 %1352 }
 0x126   : > { %1383 = vst.msk [vmem:[#allocation2 + $0x14] sm:$0xf] %vm746_vm6, %v1355_v11  ;;  %1382 = vst.msk [vmem:[#allocation2 + $0x4] sm:$0xf] %vm746_vm6, %v1353_v12  ;;  %v3380_v11 = vld [vmem:[%s4237_s19 + $0x9e] sm:$0xff] }
 0x127   : > { %2076 = vrot.lane.b32.xlu1 %v4465_v56, %s4191_s7  ;;  %2074 = vrot.lane.b32.xlu0 %v4467_v57, %s4191_s7  ;;  %v3908_v56 = vpack.c.bf16 %v3441_v22, %v3441_v22  ;;  %v3462_v57 = vld [vmem:[%s4237_s19 + $0xa0] sm:$0xff]  ;;  %v3880_v14 = vpack.c.bf16 %v3380_v11, %v3380_v11  ;;  %v3318_v11 = vld [vmem:[%s4237_s19 + $0x56] sm:$0xff] }
 0x128   : > { %v4793_v29 = vpack.c.bf16 %v3462_v57, %v3462_v57  ;;  %v3401_v22 = vld [vmem:[%s4237_s19 + $0xa6] sm:$0xff]  ;;  %v3609_v57 = vld [vmem:[%s4237_s19 + $0xfb] sm:$0xff] }
 0x129   : > { %v1437_v25 = vpop.permute.xlu1 %1436  ;;  %v1435_v26 = vpop.permute.xlu0 %1434  ;;  %v3988_v31 = vpack.c.bf16 %v3609_v57, %v3609_v57 }
 0x12a   : > { %1465 = vst.msk [vmem:[#allocation2 + $0x14] sm:$0xf] %vm829_vm7, %v1437_v25  ;;  %1464 = vst.msk [vmem:[#allocation2 + $0x4] sm:$0xf] %vm829_vm7, %v1435_v26  ;;  %v3633_v25 = vld [vmem:[%s4237_s19 + $0x114] sm:$0xff]  ;;  %v4854_v26 = vpack.c.bf16 %v3634_v24, %v3634_v24 }
 0x12b   : > { %2302 = vrot.lane.b32.xlu1 %v4026_v17, %s4186_s29  ;;  %2300 = vrot.lane.b32.xlu0 %v4025_v18, %s4186_s29  ;;  %v3588_v17 = vld [vmem:[%s4237_s19 + $0xfa] sm:$0xff] }
 0x12c   : > { %v4847_v21 = vpack.c.bf16 %v3588_v17, %v3588_v17  ;;  %2170 = vst.msk [vmem:[#allocation2 + $0x8c] sm:$0xf] %vm248_vm0, %v4854_v26  ;;  %v3851_v17 = vpack.c.bf16 %v3318_v11, %v3318_v11 }
 0x12d   : > { %v1581_v27 = vpop.permute.xlu1 %1580  ;;  %v1579_v28 = vpop.permute.xlu0 %1578 }
 0x12e   : > { %1609 = vst.msk [vmem:[#allocation2 + $0x18] sm:$0xf] %vm331_vm1, %v1581_v27  ;;  %1608 = vst.msk [vmem:[#allocation2 + $0x8] sm:$0xf] %vm331_vm1, %v1579_v28  ;;  %v3608_v27 = vld [vmem:[%s4237_s19 + $0xf3] sm:$0xff] }
 0x12f   : > { %1362 = vrot.lane.b32.xlu1 %v3908_v56, %s4190_s6  ;;  %1360 = vrot.lane.b32.xlu0 %v4673_v61, %s4190_s6  ;;  %v3938_v61 = vpack.c.bf16 %v3504_v32, %v3504_v32  ;;  %v3987_v32 = vpack.c.bf16 %v3608_v27, %v3608_v27  ;;  %900 = vst.msk [vmem:[#allocation2 + $0x84] sm:$0xf] %vm248_vm0, %v3851_v17 }
 0x131   : > { %v1663_v38 = vpop.permute.xlu1 %1662  ;;  %v1661_v39 = vpop.permute.xlu0 %1660  ;;  %v4129_v41 = vld [vmem:[#allocation2 + $0x4] ss:$16 sps:$4 sm:$0xff]  }
 0x132   : > { %1691 = vst.msk [vmem:[#allocation2 + $0x18] sm:$0xf] %vm414_vm2, %v1663_v38  ;;  %1690 = vst.msk [vmem:[#allocation2 + $0x8] sm:$0xf] %vm414_vm2, %v1661_v39  ;;  %2722 = vmatprep.mubr.bf16.mxu0 %v4129_v41  ;;  %v4018_v39 = vpack.c.bf16 %v3672_v34, %v3672_v34  ;;  %v3422_v41 = vld [vmem:[%s4237_s19 + $0xa7] sm:$0xff] }
 0x133   : > { %1444 = vrot.lane.b32.xlu1 %v4793_v29, %s4191_s7  ;;  %1442 = vrot.lane.b32.xlu0 %v3908_v56, %s4191_s7  ;;  %v4856_v56 = vpack.c.bf16 %v3633_v25, %v3633_v25  ;;  %v3900_v44 = vpack.c.bf16 %v3422_v41, %v3422_v41 }
 0x134   : > { %2723 = vmatmul.mubr.bf16.vlgmr.msra.gmra.mxu0 %v4127_v40  ;;  %v4017_v40 = vpack.c.bf16 %v3671_v35, %v3671_v35 }
 0x135   : > { %v1745_v36 = vpop.permute.xlu1 %1744  ;;  %v1743_v48 = vpop.permute.xlu0 %1742  ;;  %2169 = vst.msk [vmem:[#allocation2 + $0x7c] sm:$0xf] %vm248_vm0, %v4856_v56 }
 0x136   : > { %1773 = vst.msk [vmem:[#allocation2 + $0x18] sm:$0xf] %vm497_vm3, %v1745_v36  ;;  %1772 = vst.msk [vmem:[#allocation2 + $0x8] sm:$0xf] %vm497_vm3, %v1743_v48 }
 0x137   : > { %1588 = vrot.lane.b32.xlu1 %v3938_v61, %s4185_s22  ;;  %1586 = vrot.lane.b32.xlu0 %v3937_v42, %s4185_s22  ;;  %v3421_v61 = vld [vmem:[%s4237_s19 + $0x9f] sm:$0xff] }
 0x138   : > { %v3899_v36 = vpack.c.bf16 %v3421_v61, %v3421_v61 }
 0x139   : > { %v1033_v52 = vpop.permute.xlu1 %1032  ;;  %v1031_v53 = vpop.permute.xlu0 %1030 }
 0x13a   : > { %1059 = vst.msk [vmem:[#allocation2 + $0x34] sm:$0xf] %vm414_vm2, %v1033_v52  ;;  %1058 = vst.msk [vmem:[#allocation2 + $0x24] sm:$0xf] %vm414_vm2, %v1031_v53 }
 0x13b   : > { %1670 = vrot.lane.b32.xlu1 %v3948_v49, %s4186_s29  ;;  %1668 = vrot.lane.b32.xlu0 %v3947_v4, %s4186_s29  ;;  %v3693_v4 = vld [vmem:[%s4237_s19 + $0x106] sm:$0xff] }
 0x13d   : > { %v1827_v60 = vpop.permute.xlu1 %1826  ;;  %v1825_v62 = vpop.permute.xlu0 %1824 }
 0x13e   : > { %1855 = vst.msk [vmem:[#allocation2 + $0x18] sm:$0xf] %vm580_vm4, %v1827_v60  ;;  %1854 = vst.msk [vmem:[#allocation2 + $0x8] sm:$0xf] %vm580_vm4, %v1825_v62  ;;  %v3484_v60 = vld [vmem:[%s4237_s19 + $0xa9] sm:$0xff] }
 0x13f   : > { %958 = vrot.lane.b32.xlu1 %v3860_v54, %s4185_s22  ;;  %956 = vrot.lane.b32.xlu0 %v3859_v33, %s4185_s22  ;;  %v4028_v33 = vpack.c.bf16 %v3693_v4, %v3693_v4  ;;  %v3443_v62 = vld [vmem:[%s4237_s19 + $0xa8] sm:$0xff] }
 0x140   : > { %v3569_v4 = vld [vmem:[%s4237_s19 + $0x102] sm:$0xff] }
 0x141   : > { %v1115_v3 = vpop.permute.xlu1 %1114  ;;  %v1113_v5 = vpop.permute.xlu0 %1112 }
 0x142   : > { %1141 = vst.msk [vmem:[#allocation2 + $0x34] sm:$0xf] %vm497_vm3, %v1115_v3  ;;  %1140 = vst.msk [vmem:[#allocation2 + $0x24] sm:$0xf] %vm497_vm3, %v1113_v5 }
 0x143   : > { %1752 = vrot.lane.b32.xlu1 %v3958_v63, %s4187_s30  ;;  %1750 = vrot.lane.b32.xlu0 %v3957_v0, %s4187_s30  ;;  %v3930_v63 = vpack.c.bf16 %v3485_v58, %v3485_v58  ;;  %v3929_v0 = vpack.c.bf16 %v3484_v60, %v3484_v60  ;;  %v3590_v58 = vld [vmem:[%s4237_s19 + $0x10a] sm:$0xff] }
 0x145   : > { %v1909_v8 = vpop.permute.xlu1 %1908  ;;  %v1907_v9 = vpop.permute.xlu0 %1906  ;;  %1533 = vst.msk [vmem:[#allocation2 + $0x78] sm:$0xf] %vm248_vm0, %v3930_v63  ;;  %1532 = vst.msk [vmem:[#allocation2 + $0x68] sm:$0xf] %vm248_vm0, %v3929_v0  ;;  %v4968_v63 = vpack.c.bf16 %v3590_v58, %v3590_v58  ;;  %v3403_v0 = vld [vmem:[%s4237_s19 + $0xb6] sm:$0xff] }
 0x146   : > { %1937 = vst.msk [vmem:[#allocation2 + $0x18] sm:$0xf] %vm663_vm5, %v1909_v8  ;;  %1936 = vst.msk [vmem:[#allocation2 + $0x8] sm:$0xf] %vm663_vm5, %v1907_v9 }
 0x147   : > { %1040 = vrot.lane.b32.xlu1 %v3870_v6, %s4186_s29  ;;  %1038 = vrot.lane.b32.xlu0 %v3869_v20, %s4186_s29 }
 0x149   : > { %v1196_v12 = vpop.permute.xlu1 %1195  ;;  %v1194_v13 = vpop.permute.xlu0 %1193 }
 0x14a   : > { %1222 = vst.msk [vmem:[#allocation2 + $0x34] sm:$0xf] %vm580_vm4, %v1196_v12  ;;  %1221 = vst.msk [vmem:[#allocation2 + $0x24] sm:$0xf] %vm580_vm4, %v1194_v13  ;;  %v3506_v12 = vld [vmem:[%s4237_s19 + $0xb2] sm:$0xff]  ;;  %v3505_v13 = vld [vmem:[%s4237_s19 + $0xaa] sm:$0xff] }
 0x14b   : > { %1834 = vrot.lane.b32.xlu1 %v3968_v10, %s4188_s4  ;;  %1832 = vrot.lane.b32.xlu0 %v4727_v47, %s4188_s4 }
 0x14d   : > { %v1991_v18 = vpop.permute.xlu1 %1990  ;;  %v1989_v19 = vpop.permute.xlu0 %1988 }
 0x14e   : > { %2019 = vst.msk [vmem:[#allocation2 + $0x18] sm:$0xf] %vm746_vm6, %v1991_v18  ;;  %2018 = vst.msk [vmem:[#allocation2 + $0x8] sm:$0xf] %vm746_vm6, %v1989_v19 }
 0x14f   : > { %1122 = vrot.lane.b32.xlu1 %v3880_v14, %s4187_s30  ;;  %1120 = vrot.lane.b32.xlu0 %v4735_v50, %s4187_s30  ;;  %v4861_v50 = vpack.c.bf16 %v3401_v22, %v3401_v22  ;;  %v3939_v22 = vpack.c.bf16 %v3505_v13, %v3505_v13  ;;  %v3424_v13 = vld [vmem:[%s4237_s19 + $0xb7] sm:$0xff] }
 0x151   : > { %v2217_v23 = vpop.permute.xlu1 %2216  ;;  %v2215_v47 = vpop.permute.xlu0 %2214 }
 0x152   : > { %2245 = vst.msk [vmem:[#allocation2 + $0x1c] sm:$0xf] %vm331_vm1, %v2217_v23  ;;  %2244 = vst.msk [vmem:[#allocation2 + $0xc] sm:$0xf] %vm331_vm1, %v2215_v47  ;;  %v3527_v23 = vld [vmem:[%s4237_s19 + $0x100] sm:$0xff]  ;;  %v3526_v47 = vld [vmem:[%s4237_s19 + $0xf8] sm:$0xff] }
 0x153   : > { %1916 = vrot.lane.b32.xlu1 %v4847_v21, %s4189_s5  ;;  %1914 = vrot.lane.b32.xlu0 %v3968_v10, %s4189_s5  ;;  %v3319_v10 = vld [vmem:[%s4237_s19 + $0x5e] sm:$0xff]  ;;  %v3950_v57 = vpack.c.bf16 %v3527_v23, %v3527_v23  ;;  %v3949_v27 = vpack.c.bf16 %v3526_v47, %v3526_v47  ;;  %v3695_v47 = vld [vmem:[%s4237_s19 + $0x116] sm:$0xff] }
 0x155   : > { %v1277_v28 = vpop.permute.xlu1 %1276  ;;  %v1275_v30 = vpop.permute.xlu0 %1274 }
 0x156   : > { %1303 = vst.msk [vmem:[#allocation2 + $0x34] sm:$0xf] %vm663_vm5, %v1277_v28  ;;  %1302 = vst.msk [vmem:[#allocation2 + $0x24] sm:$0xf] %vm663_vm5, %v1275_v30  ;;  %v3340_v28 = vld [vmem:[%s4237_s19 + $0xac] sm:$0xff]  ;;  %v3339_v30 = vld [vmem:[%s4237_s19 + $0xa4] sm:$0xff] }
 0x157   : > { %1203 = vrot.lane.b32.xlu1 %v4861_v50, %s4188_s4  ;;  %1201 = vrot.lane.b32.xlu0 %v3880_v14, %s4188_s4  ;;  %v3852_v14 = vpack.c.bf16 %v3319_v10, %v3319_v10  ;;  %v3862_v34 = vpack.c.bf16 %v3340_v28, %v3340_v28  ;;  %v3861_v35 = vpack.c.bf16 %v3339_v30, %v3339_v30 }
 0x159   : > { %v2073_v37 = vpop.permute.xlu1 %2072  ;;  %v2071_v38 = vpop.permute.xlu0 %2070  ;;  %901 = vst.msk [vmem:[#allocation2 + $0x94] sm:$0xf] %vm248_vm0, %v3852_v14  ;;  %v3423_v14 = vld [vmem:[%s4237_s19 + $0xaf] sm:$0xff] }
 0x15a   : > { %2101 = vst.msk [vmem:[#allocation2 + $0x18] sm:$0xf] %vm829_vm7, %v2073_v37  ;;  %2100 = vst.msk [vmem:[#allocation2 + $0x8] sm:$0xf] %vm829_vm7, %v2071_v38  ;;  %v3548_v37 = vld [vmem:[%s4237_s19 + $0x101] sm:$0xff]  ;;  %v3547_v38 = vld [vmem:[%s4237_s19 + $0xf9] sm:$0xff] }
 0x15b   : > { %1998 = vrot.lane.b32.xlu1 %v3988_v31, %s4190_s6  ;;  %1996 = vrot.lane.b32.xlu0 %v3987_v32, %s4190_s6  ;;  %v3960_v41 = vpack.c.bf16 %v3548_v37, %v3548_v37  ;;  %v3959_v61 = vpack.c.bf16 %v3547_v38, %v3547_v38  ;;  %v3445_v37 = vld [vmem:[%s4237_s19 + $0xb8] sm:$0xff] }
 0x15d   : > { %v2299_v42 = vpop.permute.xlu1 %2298  ;;  %v2297_v43 = vpop.permute.xlu0 %2296 }
 0x15e   : > { %2327 = vst.msk [vmem:[#allocation2 + $0x1c] sm:$0xf] %vm414_vm2, %v2299_v42  ;;  %2326 = vst.msk [vmem:[#allocation2 + $0xc] sm:$0xf] %vm414_vm2, %v2297_v43  ;;  %v3361_v42 = vld [vmem:[%s4237_s19 + $0xad] sm:$0xff]  ;;  %v3360_v43 = vld [vmem:[%s4237_s19 + $0xa5] sm:$0xff] }
 0x15f   : > { %2224 = vrot.lane.b32.xlu1 %v4018_v39, %s4185_s22  ;;  %2222 = vrot.lane.b32.xlu0 %v4017_v40, %s4185_s22 }
 0x161   : > { %v1359_v48 = vpop.permute.xlu1 %1358  ;;  %v1357_v49 = vpop.permute.xlu0 %1356  ;;  %v4141_v53 = vld [vmem:[#allocation2 + $0x8] ss:$16 sps:$4 sm:$0xff]  }
 0x162   : > { %1385 = vst.msk [vmem:[#allocation2 + $0x34] sm:$0xf] %vm746_vm6, %v1359_v48  ;;  %1384 = vst.msk [vmem:[#allocation2 + $0x24] sm:$0xf] %vm746_vm6, %v1357_v49  ;;  %v3872_v48 = vpack.c.bf16 %v3361_v42, %v3361_v42  ;;  %v3871_v49 = vpack.c.bf16 %v3360_v43, %v3360_v43 }
 0x163   : > { %1284 = vrot.lane.b32.xlu1 %v3900_v44, %s4189_s5  ;;  %1282 = vrot.lane.b32.xlu0 %v3899_v36, %s4189_s5 }
 0x165   : > { %v1441_v59 = vpop.permute.xlu1 %1440  ;;  %v1439_v52 = vpop.permute.xlu0 %1438  ;;  %v4143_v54 = vld [vmem:[#allocation2 + $0xc] ss:$16 sps:$4 sm:$0xff]  }
 0x166   : > { %1467 = vst.msk [vmem:[#allocation2 + $0x34] sm:$0xf] %vm829_vm7, %v1441_v59  ;;  %1466 = vst.msk [vmem:[#allocation2 + $0x24] sm:$0xf] %vm829_vm7, %v1439_v52  ;;  %3756 = vmatprep.mubr.msk.bf16.mxu1 %vm2674_vm8, %v4143_v54  ;;  %v3970_v52 = vpack.c.bf16 %v3569_v4, %v3569_v4 }
 0x167   : > { %2080 = vrot.lane.b32.xlu1 %v4647_v45, %s4191_s7  ;;  %2078 = vrot.lane.b32.xlu0 %v4649_v46, %s4191_s7  ;;  %v3910_v45 = vpack.c.bf16 %v3443_v62, %v3443_v62  ;;  %v3464_v46 = vld [vmem:[%s4237_s19 + $0xb0] sm:$0xff] }
 0x168   : > { %2796 = vmatmul.mubr.bf16.vlgmr.msra.gmra.mxu1 %v4141_v53  ;;  %v4914_v9 = vpack.c.bf16 %v3464_v46, %v3464_v46  ;;  %v3382_v53 = vld [vmem:[%s4237_s19 + $0xae] sm:$0xff]  ;;  %v3610_v46 = vld [vmem:[%s4237_s19 + $0x103] sm:$0xff] }
 0x169   : > { %v1585_v1 = vpop.permute.xlu1 %1584  ;;  %v1583_v2 = vpop.permute.xlu0 %1582 }
 0x16a   : > { %1611 = vst.msk [vmem:[#allocation2 + $0x38] sm:$0xf] %vm331_vm1, %v1585_v1  ;;  %1610 = vst.msk [vmem:[#allocation2 + $0x28] sm:$0xf] %vm331_vm1, %v1583_v2  ;;  %v3892_v2 = vpack.c.bf16 %v3403_v0, %v3403_v0 }
 0x16b   : > { %2306 = vrot.lane.b32.xlu1 %v4028_v33, %s4186_s29  ;;  %2304 = vrot.lane.b32.xlu0 %v4027_v55, %s4186_s29  ;;  %v3882_v55 = vpack.c.bf16 %v3382_v53, %v3382_v53 }
 0x16d   : > { %v1667_v3 = vpop.permute.xlu1 %1666  ;;  %v1665_v5 = vpop.permute.xlu0 %1664  ;;  %v2340_v6 = vld [vmem:[#allocation2 + $0x20] sm:$0xff]  ;;  %v2342_v20 = vld [vmem:[#allocation2 + $0x30] sm:$0xff] }
 0x16e   : > { %v4144_v7 = vld [vmem:[#allocation2 + $0x24] ss:$16 sps:$4 sm:$0xff]   ;;  %1693 = vst.msk [vmem:[#allocation2 + $0x38] sm:$0xf] %vm414_vm2, %v1667_v3  ;;  %1692 = vst.msk [vmem:[#allocation2 + $0x28] sm:$0xf] %vm414_vm2, %v1665_v5  ;;  %v3713_v8 = vcombine.low %v2340_v6, %v2342_v20  ;;  %v3989_v6 = vpack.c.bf16 %v3610_v46, %v3610_v46 }
 0x16f   : > { %1366 = vrot.lane.b32.xlu1 %v3910_v45, %s4190_s6  ;;  %1364 = vrot.lane.b32.xlu0 %v4793_v29, %s4190_s6  ;;  %v3940_v29 = vpack.c.bf16 %v3506_v12, %v3506_v12  ;;  %v3674_v20 = vld [vmem:[%s4237_s19 + $0x115] sm:$0xff] }
 0x170   : > { %2730 = vmatprep.mubr.bf16.mxu0 %v4144_v7  ;;  %v3673_v7 = vld [vmem:[%s4237_s19 + $0x10d] sm:$0xff]  ;;  %v4020_v11 = vpack.c.bf16 %v3674_v20, %v3674_v20  ;;  %v3655_v20 = vld [vmem:[%s4237_s19 + $0x124] sm:$0xff] }
 0x171   : > { %v955_v18 = vpop.permute.xlu1 %954  ;;  %v953_v19 = vpop.permute.xlu0 %952  ;;  %2731 = vmatmul.mubr.bf16.gmra.mxu0 %v3713_v8  ;;  %v4019_v12 = vpack.c.bf16 %v3673_v7, %v3673_v7 }
 0x172   : > { %979 = vst.msk [vmem:[#allocation2 + $0x54] sm:$0xf] %vm331_vm1, %v955_v18  ;;  %978 = vst.msk [vmem:[#allocation2 + $0x44] sm:$0xf] %vm331_vm1, %v953_v19  ;;  %v3902_v19 = vpack.c.bf16 %v3424_v13, %v3424_v13 }
 0x173   : > { %1448 = vrot.lane.b32.xlu1 %v4914_v9, %s4191_s7  ;;  %1446 = vrot.lane.b32.xlu0 %v3910_v45, %s4191_s7  ;;  %v3611_v45 = vld [vmem:[%s4237_s19 + $0x10b] sm:$0xff] }
 0x174   : > { %v3990_v5 = vpack.c.bf16 %v3611_v45, %v3611_v45 }
 0x175   : > { %v1749_v24 = vpop.permute.xlu1 %1748  ;;  %v1747_v25 = vpop.permute.xlu0 %1746 }
 0x176   : > { %1775 = vst.msk [vmem:[#allocation2 + $0x38] sm:$0xf] %vm497_vm3, %v1749_v24  ;;  %1774 = vst.msk [vmem:[#allocation2 + $0x28] sm:$0xf] %vm497_vm3, %v1747_v25  ;;  %v3694_v24 = vld [vmem:[%s4237_s19 + $0x10e] sm:$0xff] }
 0x177   : > { %1592 = vrot.lane.b32.xlu1 %v3940_v29, %s4185_s22  ;;  %1590 = vrot.lane.b32.xlu0 %v3939_v22, %s4185_s22  ;;  %v3901_v29 = vpack.c.bf16 %v3423_v14, %v3423_v14  ;;  %v3613_v14 = vld [vmem:[%s4237_s19 + $0x11b] sm:$0xff] }
 0x179   : > { %v1037_v31 = vpop.permute.xlu1 %1036  ;;  %v1035_v32 = vpop.permute.xlu0 %1034 }
 0x17a   : > { %1061 = vst.msk [vmem:[#allocation2 + $0x54] sm:$0xf] %vm414_vm2, %v1037_v31  ;;  %1060 = vst.msk [vmem:[#allocation2 + $0x44] sm:$0xf] %vm414_vm2, %v1035_v32  ;;  %v4030_v32 = vpack.c.bf16 %v3695_v47, %v3695_v47  ;;  %v3675_v47 = vld [vmem:[%s4237_s19 + $0x11d] sm:$0xff] }
 0x17b   : > { %1674 = vrot.lane.b32.xlu1 %v3950_v57, %s4186_s29  ;;  %1672 = vrot.lane.b32.xlu0 %v3949_v27, %s4186_s29 }
 0x17d   : > { %v1831_v39 = vpop.permute.xlu1 %1830  ;;  %v1829_v40 = vpop.permute.xlu0 %1828 }
 0x17e   : > { %1857 = vst.msk [vmem:[#allocation2 + $0x38] sm:$0xf] %vm580_vm4, %v1831_v39  ;;  %1856 = vst.msk [vmem:[#allocation2 + $0x28] sm:$0xf] %vm580_vm4, %v1829_v40  ;;  %v3486_v39 = vld [vmem:[%s4237_s19 + $0xb9] sm:$0xff] }
 0x17f   : > { %962 = vrot.lane.b32.xlu1 %v3862_v34, %s4185_s22  ;;  %960 = vrot.lane.b32.xlu0 %v3861_v35, %s4185_s22  ;;  %v4029_v34 = vpack.c.bf16 %v3694_v24, %v3694_v24  ;;  %v3487_v35 = vld [vmem:[%s4237_s19 + $0xc1] sm:$0xff] }
 0x180   : > { %v3932_v38 = vpack.c.bf16 %v3487_v35, %v3487_v35 }
 0x181   : > { %v1119_v44 = vpop.permute.xlu1 %1118  ;;  %v1117_v36 = vpop.permute.xlu0 %1116 }
 0x182   : > { %1143 = vst.msk [vmem:[#allocation2 + $0x54] sm:$0xf] %vm497_vm3, %v1119_v44  ;;  %1142 = vst.msk [vmem:[#allocation2 + $0x44] sm:$0xf] %vm497_vm3, %v1117_v36 }
 0x183   : > { %1756 = vrot.lane.b32.xlu1 %v3960_v41, %s4187_s30  ;;  %1754 = vrot.lane.b32.xlu0 %v3959_v61, %s4187_s30  ;;  %v3931_v61 = vpack.c.bf16 %v3486_v39, %v3486_v39  ;;  %1535 = vst.msk [vmem:[#allocation2 + $0x98] sm:$0xf] %vm248_vm0, %v3932_v38 }
 0x185   : > { %v1913_v51 = vpop.permute.xlu1 %1912  ;;  %v1911_v59 = vpop.permute.xlu0 %1910  ;;  %1534 = vst.msk [vmem:[#allocation2 + $0x88] sm:$0xf] %vm248_vm0, %v3931_v61 }
 0x186   : > { %1939 = vst.msk [vmem:[#allocation2 + $0x38] sm:$0xf] %vm663_vm5, %v1913_v51  ;;  %1938 = vst.msk [vmem:[#allocation2 + $0x28] sm:$0xf] %vm663_vm5, %v1911_v59  ;;  %v3508_v51 = vld [vmem:[%s4237_s19 + $0xc2] sm:$0xff]  ;;  %v3507_v59 = vld [vmem:[%s4237_s19 + $0xba] sm:$0xff] }
 0x187   : > { %1044 = vrot.lane.b32.xlu1 %v3872_v48, %s4186_s29  ;;  %1042 = vrot.lane.b32.xlu0 %v3871_v49, %s4186_s29 }
 0x189   : > { %v1200_v54 = vpop.permute.xlu1 %1199  ;;  %v1198_v33 = vpop.permute.xlu0 %1197 }
 0x18a   : > { %1224 = vst.msk [vmem:[#allocation2 + $0x54] sm:$0xf] %vm580_vm4, %v1200_v54  ;;  %1223 = vst.msk [vmem:[#allocation2 + $0x44] sm:$0xf] %vm580_vm4, %v1198_v33  ;;  %v3942_v54 = vpack.c.bf16 %v3508_v51, %v3508_v51  ;;  %v3941_v33 = vpack.c.bf16 %v3507_v59, %v3507_v59 }
 0x18b   : > { %1838 = vrot.lane.b32.xlu1 %v3970_v52, %s4188_s4  ;;  %1836 = vrot.lane.b32.xlu0 %v4847_v21, %s4188_s4 }
 0x18d   : > { %v1995_v60 = vpop.permute.xlu1 %1994  ;;  %v1993_v62 = vpop.permute.xlu0 %1992 }
 0x18e   : > { %2021 = vst.msk [vmem:[#allocation2 + $0x38] sm:$0xf] %vm746_vm6, %v1995_v60  ;;  %2020 = vst.msk [vmem:[#allocation2 + $0x28] sm:$0xf] %vm746_vm6, %v1993_v62 }
 0x18f   : > { %1126 = vrot.lane.b32.xlu1 %v3882_v55, %s4187_s30  ;;  %1124 = vrot.lane.b32.xlu0 %v4861_v50, %s4187_s30 }
 0x191   : > { %v2221_v1 = vpop.permute.xlu1 %2220  ;;  %v2219_v21 = vpop.permute.xlu0 %2218 }
 0x192   : > { %2247 = vst.msk [vmem:[#allocation2 + $0x3c] sm:$0xf] %vm331_vm1, %v2221_v1  ;;  %2246 = vst.msk [vmem:[#allocation2 + $0x2c] sm:$0xf] %vm331_vm1, %v2219_v21  ;;  %v3550_v1 = vld [vmem:[%s4237_s19 + $0x111] sm:$0xff]  ;;  %v3549_v21 = vld [vmem:[%s4237_s19 + $0x109] sm:$0xff] }
 0x193   : > { %1920 = vrot.lane.b32.xlu1 %v4968_v63, %s4189_s5  ;;  %1918 = vrot.lane.b32.xlu0 %v3970_v52, %s4189_s5  ;;  %v3962_v46 = vpack.c.bf16 %v3550_v1, %v3550_v1 }
 0x195   : > { %v1281_v50 = vpop.permute.xlu1 %1280  ;;  %v1279_v3 = vpop.permute.xlu0 %1278 }
 0x196   : > { %1305 = vst.msk [vmem:[#allocation2 + $0x54] sm:$0xf] %vm663_vm5, %v1281_v50  ;;  %1304 = vst.msk [vmem:[#allocation2 + $0x44] sm:$0xf] %vm663_vm5, %v1279_v3  ;;  %v3961_v50 = vpack.c.bf16 %v3549_v21, %v3549_v21  ;;  %v3571_v3 = vld [vmem:[%s4237_s19 + $0x112] sm:$0xff] }
 0x197   : > { %1207 = vrot.lane.b32.xlu1 %v3892_v2, %s4188_s4  ;;  %1205 = vrot.lane.b32.xlu0 %v3882_v55, %s4188_s4  ;;  %v3528_v55 = vld [vmem:[%s4237_s19 + $0x108] sm:$0xff]  ;;  %v3972_v7 = vpack.c.bf16 %v3571_v3, %v3571_v3 }
 0x198   : > { %v3951_v0 = vpack.c.bf16 %v3528_v55, %v3528_v55 }
 0x199   : > { %v2077_v8 = vpop.permute.xlu1 %2076  ;;  %v2075_v10 = vpop.permute.xlu0 %2074 }
 0x19a   : > { %2103 = vst.msk [vmem:[#allocation2 + $0x38] sm:$0xf] %vm829_vm7, %v2077_v8  ;;  %2102 = vst.msk [vmem:[#allocation2 + $0x28] sm:$0xf] %vm829_vm7, %v2075_v10  ;;  %v4012_v8 = vpack.c.bf16 %v3655_v20, %v3655_v20  ;;  %v3592_v10 = vld [vmem:[%s4237_s19 + $0x11a] sm:$0xff] }
 0x19b   : > { %2002 = vrot.lane.b32.xlu1 %v3990_v5, %s4190_s6  ;;  %2000 = vrot.lane.b32.xlu0 %v3989_v6, %s4190_s6  ;;  %v3982_v13 = vpack.c.bf16 %v3592_v10, %v3592_v10 }
 0x19c   : > { %2171 = vst.msk [vmem:[#allocation2 + $0x9c] sm:$0xf] %vm248_vm0, %v4012_v8 }
 0x19d   : > { %v2303_v17 = vpop.permute.xlu1 %2302  ;;  %v2301_v18 = vpop.permute.xlu0 %2300 }
 0x19e   : > { %2329 = vst.msk [vmem:[#allocation2 + $0x3c] sm:$0xf] %vm414_vm2, %v2303_v17  ;;  %2328 = vst.msk [vmem:[#allocation2 + $0x2c] sm:$0xf] %vm414_vm2, %v2301_v18  ;;  %v3612_v17 = vld [vmem:[%s4237_s19 + $0x113] sm:$0xff] }
 0x19f   : > { %2228 = vrot.lane.b32.xlu1 %v4020_v11, %s4185_s22  ;;  %2226 = vrot.lane.b32.xlu0 %v4019_v12, %s4185_s22 }
 0x1a1   : > { %v1363_v22 = vpop.permute.xlu1 %1362  ;;  %v1361_v23 = vpop.permute.xlu0 %1360 }
 0x1a2   : > { %1387 = vst.msk [vmem:[#allocation2 + $0x54] sm:$0xf] %vm746_vm6, %v1363_v22  ;;  %1386 = vst.msk [vmem:[#allocation2 + $0x44] sm:$0xf] %vm746_vm6, %v1361_v23  ;;  %v3991_v22 = vpack.c.bf16 %v3612_v17, %v3612_v17  ;;  %v3676_v23 = vld [vmem:[%s4237_s19 + $0x125] sm:$0xff] }
 0x1a3   : > { %1288 = vrot.lane.b32.xlu1 %v3902_v19, %s4189_s5  ;;  %1286 = vrot.lane.b32.xlu0 %v3901_v29, %s4189_s5  ;;  %v3992_v29 = vpack.c.bf16 %v3613_v14, %v3613_v14 }
 0x1a5   : > { %v1445_v25 = vpop.permute.xlu1 %1444  ;;  %v1443_v57 = vpop.permute.xlu0 %1442  ;;  %v2341_v27 = vld [vmem:[#allocation2 + $0x28] sm:$0xff]  ;;  %v2343_v28 = vld [vmem:[#allocation2 + $0x38] sm:$0xff] }
 0x1a6   : > { %v4146_v30 = vld [vmem:[#allocation2 + $0x2c] ss:$16 sps:$4 sm:$0xff]   ;;  %1469 = vst.msk [vmem:[#allocation2 + $0x54] sm:$0xf] %vm829_vm7, %v1445_v25  ;;  %1468 = vst.msk [vmem:[#allocation2 + $0x44] sm:$0xf] %vm829_vm7, %v1443_v57  ;;  %v3715_v31 = vcombine.low %v2341_v27, %v2343_v28  ;;  %v4022_v25 = vpack.c.bf16 %v3676_v23, %v3676_v23  ;;  %v4021_v57 = vpack.c.bf16 %v3675_v47, %v3675_v47 }
 0x1a7   : > { %2084 = vrot.lane.b32.xlu1 %v4766_v15, %s4191_s7  ;;  %2082 = vrot.lane.b32.xlu0 %v4768_v16, %s4191_s7  ;;  %v3912_v15 = vpack.c.bf16 %v3445_v37, %v3445_v37  ;;  %v3466_v16 = vld [vmem:[%s4237_s19 + $0xc0] sm:$0xff] }
 0x1a8   : > { %3757 = vmatprep.mubr.msk.bf16.mxu1 %vm2674_vm8, %v4146_v30  ;;  %v3922_v4 = vpack.c.bf16 %v3466_v16, %v3466_v16  ;;  %v3697_v30 = vld [vmem:[%s4237_s19 + $0x126] sm:$0xff] }
 0x1a9   : > { %v1589_v40 = vpop.permute.xlu1 %1588  ;;  %v1587_v41 = vpop.permute.xlu0 %1586  ;;  %2804 = vmatmul.mubr.bf16.gmra.mxu1 %v3715_v31  ;;  %v3696_v31 = vld [vmem:[%s4237_s19 + $0x11e] sm:$0xff]  ;;  %v4032_v35 = vpack.c.bf16 %v3697_v30, %v3697_v30 }
 0x1aa   : > { %1613 = vst.msk [vmem:[#allocation2 + $0x58] sm:$0xf] %vm331_vm1, %v1589_v40  ;;  %1612 = vst.msk [vmem:[#allocation2 + $0x48] sm:$0xf] %vm331_vm1, %v1587_v41  ;;  %v4031_v37 = vpack.c.bf16 %v3696_v31, %v3696_v31  ;;  %v5126_v30 = vld [vmem:[%s5202_s2] ss:$0 sm:$0xff] }
 0x1ab   : > { %2310 = vrot.lane.b32.xlu1 %v4030_v32, %s4186_s29  ;;  %2308 = vrot.lane.b32.xlu0 %v4029_v34, %s4186_s29 }
 0x1ad   : > { %v1671_v42 = vpop.permute.xlu1 %1670  ;;  %v1669_v43 = vpop.permute.xlu0 %1668  ;;  %v2344_v44 = vld [vmem:[#allocation2 + $0x40] sm:$0xff]  ;;  %v2346_v36 = vld [vmem:[#allocation2 + $0x50] sm:$0xff] }
 0x1ae   : > { %v4148_v48 = vld [vmem:[#allocation2 + $0x44] ss:$16 sps:$4 sm:$0xff]   ;;  %1695 = vst.msk [vmem:[#allocation2 + $0x58] sm:$0xf] %vm414_vm2, %v1671_v42  ;;  %1694 = vst.msk [vmem:[#allocation2 + $0x48] sm:$0xf] %vm414_vm2, %v1669_v43  ;;  %v3717_v49 = vcombine.low %v2344_v44, %v2346_v36 }
 0x1af   : > { %1370 = vrot.lane.b32.xlu1 %v3912_v15, %s4190_s6  ;;  %1368 = vrot.lane.b32.xlu0 %v4914_v9, %s4190_s6  ;;  %v3529_v9 = vld [vmem:[%s4237_s19 + $0x110] sm:$0xff]  ;;  %s3150_s19 = sshll.u32 %s4175_s12, 3 }
 0x1b0   : > { %2738 = vmatprep.mubr.bf16.mxu0 %v4148_v48  ;;  %v3952_v62 = vpack.c.bf16 %v3529_v9, %v3529_v9  ;;  %p178_p4 = scmp.lt.s32.totalorder %s3150_s19, 31 }
 0x1b1   : > { %v959_v52 = vpop.permute.xlu1 %958  ;;  %v957_v53 = vpop.permute.xlu0 %956  ;;  %2739 = vmatmul.mubr.bf16.gmra.mxu0 %v3717_v49 }
 0x1b2   : > { %981 = vst.msk [vmem:[#allocation2 + $0x74] sm:$0xf] %vm331_vm1, %v959_v52  ;;  %980 = vst.msk [vmem:[#allocation2 + $0x64] sm:$0xf] %vm331_vm1, %v957_v53  ;;  %s5209_s19 = smov (!%p178_p4, %s3150_s19), 31 }
 0x1b3   : > { %1452 = vrot.lane.b32.xlu1 %v3922_v4, %s4191_s7  ;;  %1450 = vrot.lane.b32.xlu0 %v3912_v15, %s4191_s7 }
 0x1b5   : > { %v1753_v58 = vpop.permute.xlu1 %1752  ;;  %v1751_v60 = vpop.permute.xlu0 %1750 }
 0x1b6   : > { %1777 = vst.msk [vmem:[#allocation2 + $0x58] sm:$0xf] %vm497_vm3, %v1753_v58  ;;  %1776 = vst.msk [vmem:[#allocation2 + $0x48] sm:$0xf] %vm497_vm3, %v1751_v60 }
 0x1b7   : > { %1596 = vrot.lane.b32.xlu1 %v3942_v54, %s4185_s22  ;;  %1594 = vrot.lane.b32.xlu0 %v3941_v33, %s4185_s22 }
 0x1b9   : > { %v1041_v2 = vpop.permute.xlu1 %1040  ;;  %v1039_v45 = vpop.permute.xlu0 %1038 }
 0x1ba   : > { %1063 = vst.msk [vmem:[#allocation2 + $0x74] sm:$0xf] %vm414_vm2, %v1041_v2  ;;  %1062 = vst.msk [vmem:[#allocation2 + $0x64] sm:$0xf] %vm414_vm2, %v1039_v45 }
 0x1bb   : > { %1678 = vrot.lane.b32.xlu1 %v3952_v62, %s4186_s29  ;;  %1676 = vrot.lane.b32.xlu0 %v3951_v0, %s4186_s29 }
 0x1bd   : > { %v1835_v5 = vpop.permute.xlu1 %1834  ;;  %v1833_v6 = vpop.permute.xlu0 %1832 }
 0x1be   : > { %1859 = vst.msk [vmem:[#allocation2 + $0x58] sm:$0xf] %vm580_vm4, %v1835_v5  ;;  %1858 = vst.msk [vmem:[#allocation2 + $0x48] sm:$0xf] %vm580_vm4, %v1833_v6 }
 0x1bf   : > { %1760 = vrot.lane.b32.xlu1 %v3962_v46, %s4187_s30  ;;  %1758 = vrot.lane.b32.xlu0 %v3961_v50, %s4187_s30 }
 0x1c1   : > { %v1123_v11 = vpop.permute.xlu1 %1122  ;;  %v1121_v12 = vpop.permute.xlu0 %1120 }
 0x1c2   : > { %1145 = vst.msk [vmem:[#allocation2 + $0x74] sm:$0xf] %vm497_vm3, %v1123_v11  ;;  %1144 = vst.msk [vmem:[#allocation2 + $0x64] sm:$0xf] %vm497_vm3, %v1121_v12 }
 0x1c3   : > { %1842 = vrot.lane.b32.xlu1 %v3972_v7, %s4188_s4  ;;  %1840 = vrot.lane.b32.xlu0 %v4968_v63, %s4188_s4 }
 0x1c5   : > { %v1917_v18 = vpop.permute.xlu1 %1916  ;;  %v1915_v19 = vpop.permute.xlu0 %1914 }
 0x1c6   : > { %1941 = vst.msk [vmem:[#allocation2 + $0x58] sm:$0xf] %vm663_vm5, %v1917_v18  ;;  %1940 = vst.msk [vmem:[#allocation2 + $0x48] sm:$0xf] %vm663_vm5, %v1915_v19 }
 0x1c7   : > { %1924 = vrot.lane.b32.xlu1 %v3982_v13, %s4189_s5  ;;  %1922 = vrot.lane.b32.xlu0 %v3972_v7, %s4189_s5 }
 0x1c9   : > { %v1204_v63 = vpop.permute.xlu1 %1203  ;;  %v1202_v24 = vpop.permute.xlu0 %1201 }
 0x1ca   : > { %1226 = vst.msk [vmem:[#allocation2 + $0x74] sm:$0xf] %vm580_vm4, %v1204_v63  ;;  %1225 = vst.msk [vmem:[#allocation2 + $0x64] sm:$0xf] %vm580_vm4, %v1202_v24 }
 0x1cb   : > { %2006 = vrot.lane.b32.xlu1 %v3992_v29, %s4190_s6  ;;  %2004 = vrot.lane.b32.xlu0 %v3991_v22, %s4190_s6 }
 0x1cd   : > { %v1999_v27 = vpop.permute.xlu1 %1998  ;;  %v1997_v28 = vpop.permute.xlu0 %1996 }
 0x1ce   : > { %2023 = vst.msk [vmem:[#allocation2 + $0x58] sm:$0xf] %vm746_vm6, %v1999_v27  ;;  %2022 = vst.msk [vmem:[#allocation2 + $0x48] sm:$0xf] %vm746_vm6, %v1997_v28 }
 0x1cf   : > { %2232 = vrot.lane.b32.xlu1 %v4022_v25, %s4185_s22  ;;  %2230 = vrot.lane.b32.xlu0 %v4021_v57, %s4185_s22 }
 0x1d1   : > { %v2225_v32 = vpop.permute.xlu1 %2224  ;;  %v2223_v34 = vpop.permute.xlu0 %2222 }
 0x1d2   : > { %2249 = vst.msk [vmem:[#allocation2 + $0x5c] sm:$0xf] %vm331_vm1, %v2225_v32  ;;  %2248 = vst.msk [vmem:[#allocation2 + $0x4c] sm:$0xf] %vm331_vm1, %v2223_v34 }
 0x1d3   : > { %2088 = vrot.lane.b32.xlu1 %v4854_v26, %s4191_s7  ;;  %2086 = vrot.lane.b32.xlu0 %v4856_v56, %s4191_s7 }
 0x1d5   : > { %v1285_v38 = vpop.permute.xlu1 %1284  ;;  %v1283_v39 = vpop.permute.xlu0 %1282 }
 0x1d6   : > { %1307 = vst.msk [vmem:[#allocation2 + $0x74] sm:$0xf] %vm663_vm5, %v1285_v38  ;;  %1306 = vst.msk [vmem:[#allocation2 + $0x64] sm:$0xf] %vm663_vm5, %v1283_v39 }
 0x1d7   : > { %2314 = vrot.lane.b32.xlu1 %v4032_v35, %s4186_s29  ;;  %2312 = vrot.lane.b32.xlu0 %v4031_v37, %s4186_s29  ;;  %s3151_s29 = sshll.u32 %s5209_s19, 3 }
 0x1d8   : > { %s5135_s5 = scalar_lea.vmem %s5203_s3, %s3151_s29 }
 0x1d9   : > { %v2081_v40 = vpop.permute.xlu1 %2080  ;;  %v2079_v41 = vpop.permute.xlu0 %2078 }
 0x1da   : > { %2105 = vst.msk [vmem:[#allocation2 + $0x58] sm:$0xf] %vm829_vm7, %v2081_v40  ;;  %2104 = vst.msk [vmem:[#allocation2 + $0x48] sm:$0xf] %vm829_vm7, %v2079_v41 }
 0x1dd   : > { %v2307_v26 = vpop.permute.xlu1 %2306  ;;  %v2305_v56 = vpop.permute.xlu0 %2304 }
 0x1de   : > { %2331 = vst.msk [vmem:[#allocation2 + $0x5c] sm:$0xf] %vm414_vm2, %v2307_v26  ;;  %2330 = vst.msk [vmem:[#allocation2 + $0x4c] sm:$0xf] %vm414_vm2, %v2305_v56 }
 0x1e1   : > { %v1367_v61 = vpop.permute.xlu1 %1366  ;;  %v1365_v15 = vpop.permute.xlu0 %1364 }
 0x1e2   : > { %1389 = vst.msk [vmem:[#allocation2 + $0x74] sm:$0xf] %vm746_vm6, %v1367_v61  ;;  %1388 = vst.msk [vmem:[#allocation2 + $0x64] sm:$0xf] %vm746_vm6, %v1365_v15 }
 0x1e5   : > { %v1449_v16 = vpop.permute.xlu1 %1448  ;;  %v1447_v42 = vpop.permute.xlu0 %1446  ;;  %v2345_v43 = vld [vmem:[#allocation2 + $0x48] sm:$0xff]  ;;  %v2347_v44 = vld [vmem:[#allocation2 + $0x58] sm:$0xff] }
 0x1e6   : > { %v4150_v36 = vld [vmem:[#allocation2 + $0x4c] ss:$16 sps:$4 sm:$0xff]   ;;  %1471 = vst.msk [vmem:[#allocation2 + $0x74] sm:$0xf] %vm829_vm7, %v1449_v16  ;;  %1470 = vst.msk [vmem:[#allocation2 + $0x64] sm:$0xf] %vm829_vm7, %v1447_v42  ;;  %v3719_v48 = vcombine.low %v2345_v43, %v2347_v44 }
 0x1e7   : > { %3758 = vmatprep.mubr.msk.bf16.mxu1 %vm2674_vm8, %v4150_v36 }
 0x1e8   : > { %2812 = vmatmul.mubr.bf16.gmra.mxu1 %v3719_v48 }
 0x1e9   : > { %v1593_v49 = vpop.permute.xlu1 %1592  ;;  %v1591_v4 = vpop.permute.xlu0 %1590 }
 0x1ea   : > { %1615 = vst.msk [vmem:[#allocation2 + $0x78] sm:$0xf] %vm331_vm1, %v1593_v49  ;;  %1614 = vst.msk [vmem:[#allocation2 + $0x68] sm:$0xf] %vm331_vm1, %v1591_v4 }
 0x1ed   : > { %v1675_v51 = vpop.permute.xlu1 %1674  ;;  %v1673_v59 = vpop.permute.xlu0 %1672  ;;  %v2348_v52 = vld [vmem:[#allocation2 + $0x60] sm:$0xff]  ;;  %v2350_v53 = vld [vmem:[#allocation2 + $0x70] sm:$0xff] }
 0x1ee   : > { %v4152_v54 = vld [vmem:[#allocation2 + $0x64] ss:$16 sps:$4 sm:$0xff]   ;;  %1697 = vst.msk [vmem:[#allocation2 + $0x78] sm:$0xf] %vm414_vm2, %v1675_v51  ;;  %1696 = vst.msk [vmem:[#allocation2 + $0x68] sm:$0xf] %vm414_vm2, %v1673_v59  ;;  %v3721_v33 = vcombine.low %v2348_v52, %v2350_v53 }
 0x1ef   : > { %2746 = vmatprep.mubr.bf16.mxu0 %v4152_v54 }
 0x1f0   : > { %2747 = vmatmul.mubr.bf16.gmra.mxu0 %v3721_v33 }
 0x1f1   : > { %v963_v9 = vpop.permute.xlu1 %962  ;;  %v961_v55 = vpop.permute.xlu0 %960 }
 0x1f2   : > { %983 = vst.msk [vmem:[#allocation2 + $0x94] sm:$0xf] %vm331_vm1, %v963_v9  ;;  %982 = vst.msk [vmem:[#allocation2 + $0x84] sm:$0xf] %vm331_vm1, %v961_v55 }
 0x1f4   : > { %v4049_v14 = vpop.f32.mrf.mxu0 }
 0x1f5   : > { %v1757_v58 = vpop.permute.xlu1 %1756  ;;  %v1755_v60 = vpop.permute.xlu0 %1754 }
 0x1f6   : > { %1779 = vst.msk [vmem:[#allocation2 + $0x78] sm:$0xf] %vm497_vm3, %v1757_v58  ;;  %1778 = vst.msk [vmem:[#allocation2 + $0x68] sm:$0xf] %vm497_vm3, %v1755_v60  ;;  %v4050_v19 = vpop.f32.mrf.mxu0 }
 0x1f7   : > { %v4051_v47 = vadd.f32 %v4050_v19, %v4049_v14 }
 0x1f8   : > { %v4052_v23 = vpop.f32.mrf.mxu0 }
 0x1f9   : > { %v1045_v62 = vpop.permute.xlu1 %1044  ;;  %v1043_v0 = vpop.permute.xlu0 %1042  ;;  %v2725_v37 = vadd.f32 %v4051_v47, %v5126_v30 }
 0x1fa   : > { %1065 = vst.msk [vmem:[#allocation2 + $0x94] sm:$0xf] %vm414_vm2, %v1045_v62  ;;  %1064 = vst.msk [vmem:[#allocation2 + $0x84] sm:$0xf] %vm414_vm2, %v1043_v0  ;;  %v4053_v28 = vpop.f32.mrf.mxu0 }
 0x1fb   : > { %v4054_v32 = vadd.f32 %v4053_v28, %v4052_v23 }
 0x1fd   : > { %v1839_v1 = vpop.permute.xlu1 %1838  ;;  %v1837_v21 = vpop.permute.xlu0 %1836  ;;  %v2728_v61 = vadd.f32 %v4054_v32, %v5126_v30 }
 0x1fe   : > { %1861 = vst.msk [vmem:[#allocation2 + $0x78] sm:$0xf] %vm580_vm4, %v1839_v1  ;;  %1860 = vst.msk [vmem:[#allocation2 + $0x68] sm:$0xf] %vm580_vm4, %v1837_v21 }
 0x201   : > { %v1127_v2 = vpop.permute.xlu1 %1126  ;;  %v1125_v45 = vpop.permute.xlu0 %1124 }
 0x202   : > { %1147 = vst.msk [vmem:[#allocation2 + $0x94] sm:$0xf] %vm497_vm3, %v1127_v2  ;;  %1146 = vst.msk [vmem:[#allocation2 + $0x84] sm:$0xf] %vm497_vm3, %v1125_v45 }
 0x205   : > { %v1921_v46 = vpop.permute.xlu1 %1920  ;;  %v1919_v50 = vpop.permute.xlu0 %1918 }
 0x206   : > { %1943 = vst.msk [vmem:[#allocation2 + $0x78] sm:$0xf] %vm663_vm5, %v1921_v46  ;;  %1942 = vst.msk [vmem:[#allocation2 + $0x68] sm:$0xf] %vm663_vm5, %v1919_v50 }
 0x209   : > { %v1208_v3 = vpop.permute.xlu1 %1207  ;;  %v1206_v5 = vpop.permute.xlu0 %1205 }
 0x20a   : > { %1228 = vst.msk [vmem:[#allocation2 + $0x94] sm:$0xf] %vm580_vm4, %v1208_v3  ;;  %1227 = vst.msk [vmem:[#allocation2 + $0x84] sm:$0xf] %vm580_vm4, %v1206_v5 }
 0x20d   : > { %v2003_v6 = vpop.permute.xlu1 %2002  ;;  %v2001_v20 = vpop.permute.xlu0 %2000 }
 0x20e   : > { %2025 = vst.msk [vmem:[#allocation2 + $0x78] sm:$0xf] %vm746_vm6, %v2003_v6  ;;  %2024 = vst.msk [vmem:[#allocation2 + $0x68] sm:$0xf] %vm746_vm6, %v2001_v20 }
 0x211   : > { %v2229_v7 = vpop.permute.xlu1 %2228  ;;  %v2227_v8 = vpop.permute.xlu0 %2226 }
 0x212   : > { %2251 = vst.msk [vmem:[#allocation2 + $0x7c] sm:$0xf] %vm331_vm1, %v2229_v7  ;;  %2250 = vst.msk [vmem:[#allocation2 + $0x6c] sm:$0xf] %vm331_vm1, %v2227_v8 }
 0x215   : > { %v1289_v10 = vpop.permute.xlu1 %1288  ;;  %v1287_v11 = vpop.permute.xlu0 %1286 }
 0x216   : > { %1309 = vst.msk [vmem:[#allocation2 + $0x94] sm:$0xf] %vm663_vm5, %v1289_v10  ;;  %1308 = vst.msk [vmem:[#allocation2 + $0x84] sm:$0xf] %vm663_vm5, %v1287_v11 }
 0x219   : > { %v2085_v12 = vpop.permute.xlu1 %2084  ;;  %v2083_v13 = vpop.permute.xlu0 %2082 }
 0x21a   : > { %2107 = vst.msk [vmem:[#allocation2 + $0x78] sm:$0xf] %vm829_vm7, %v2085_v12  ;;  %2106 = vst.msk [vmem:[#allocation2 + $0x68] sm:$0xf] %vm829_vm7, %v2083_v13 }
 0x21d   : > { %v2311_v17 = vpop.permute.xlu1 %2310  ;;  %v2309_v18 = vpop.permute.xlu0 %2308 }
 0x21e   : > { %2333 = vst.msk [vmem:[#allocation2 + $0x7c] sm:$0xf] %vm414_vm2, %v2311_v17  ;;  %2332 = vst.msk [vmem:[#allocation2 + $0x6c] sm:$0xf] %vm414_vm2, %v2309_v18 }
 0x221   : > { %v1371_v29 = vpop.permute.xlu1 %1370  ;;  %v1369_v22 = vpop.permute.xlu0 %1368 }
 0x222   : > { %1391 = vst.msk [vmem:[#allocation2 + $0x94] sm:$0xf] %vm746_vm6, %v1371_v29  ;;  %1390 = vst.msk [vmem:[#allocation2 + $0x84] sm:$0xf] %vm746_vm6, %v1369_v22 }
 0x225   : > { %v1453_v63 = vpop.permute.xlu1 %1452  ;;  %v1451_v24 = vpop.permute.xlu0 %1450  ;;  %v2349_v25 = vld [vmem:[#allocation2 + $0x68] sm:$0xff]  ;;  %v2351_v57 = vld [vmem:[#allocation2 + $0x78] sm:$0xff] }
 0x226   : > { %v4154_v27 = vld [vmem:[#allocation2 + $0x6c] ss:$16 sps:$4 sm:$0xff]   ;;  %1473 = vst.msk [vmem:[#allocation2 + $0x94] sm:$0xf] %vm829_vm7, %v1453_v63  ;;  %1472 = vst.msk [vmem:[#allocation2 + $0x84] sm:$0xf] %vm829_vm7, %v1451_v24  ;;  %v3723_v31 = vcombine.low %v2349_v25, %v2351_v57 }
 0x227   : > { %3759 = vmatprep.mubr.msk.bf16.mxu1 %vm2674_vm8, %v4154_v27 }
 0x228   : > { %2820 = vmatmul.mubr.bf16.gmra.mxu1 %v3723_v31  ;;  %v2797_v38 = vpop.f32.mrf.mxu1 }
 0x229   : > { %v1597_v34 = vpop.permute.xlu1 %1596  ;;  %v1595_v35 = vpop.permute.xlu0 %1594  ;;  %v2798_v39 = vadd.f32 %v2797_v38, %v2725_v37 }
 0x22a   : > { %1617 = vst.msk [vmem:[#allocation2 + $0x98] sm:$0xf] %vm331_vm1, %v1597_v34  ;;  %1616 = vst.msk [vmem:[#allocation2 + $0x88] sm:$0xf] %vm331_vm1, %v1595_v35  ;;  %v2799_v40 = vpop.f32.mrf.mxu1 }
 0x22b   : > { %v2836_v41 = vmax.f32 %v2798_v39, 0.0 }
 0x22c   : > { %v2800_v43 = vpop.f32.mrf.mxu1 }
 0x22d   : > { %v1679_v26 = vpop.permute.xlu1 %1678  ;;  %v1677_v56 = vpop.permute.xlu0 %1676  ;;  %v2352_v15 = vld [vmem:[#allocation2 + $0x80] sm:$0xff]  ;;  %v2354_v16 = vld [vmem:[#allocation2 + $0x90] sm:$0xff]  ;;  %2847 = vst.msk [vmem:[%s5135_s5] sm:$0xff] %vm2846_vm9, %v2836_v41  ;;  %v2801_v36 = vadd.f32 %v2800_v43, %v2728_v61 }
 0x22e   : > { %v4156_v42 = vld [vmem:[#allocation2 + $0x84] ss:$16 sps:$4 sm:$0xff]   ;;  %1699 = vst.msk [vmem:[#allocation2 + $0x98] sm:$0xf] %vm414_vm2, %v1679_v26  ;;  %1698 = vst.msk [vmem:[#allocation2 + $0x88] sm:$0xf] %vm414_vm2, %v1677_v56  ;;  %v3725_v44 = vcombine.low %v2352_v15, %v2354_v16  ;;  %v2802_v48 = vpop.f32.mrf.mxu1 }
 0x22f   : > { %2754 = vmatprep.mubr.bf16.mxu0 %v4156_v42  ;;  %v2837_v49 = vmax.f32 %v2801_v36, 0.0 }
 0x230   : > { %2755 = vmatmul.mubr.bf16.gmra.mxu0 %v3725_v44 }
 0x231   : > { %v1761_v4 = vpop.permute.xlu1 %1760  ;;  %v1759_v51 = vpop.permute.xlu0 %1758  ;;  %2849 = vst.msk [vmem:[%s5135_s5 + $0x6] sm:$0xfc] %vm2848_vm10, %v2837_v49 }
 0x232   : > { %1781 = vst.msk [vmem:[#allocation2 + $0x98] sm:$0xf] %vm497_vm3, %v1761_v4  ;;  %1780 = vst.msk [vmem:[#allocation2 + $0x88] sm:$0xf] %vm497_vm3, %v1759_v51  ;;  %v4055_v45 = vpop.f32.mrf.mxu0 }
 0x234   : > { %v4056_v46 = vpop.f32.mrf.mxu0 }
 0x235   : > { %v1843_v59 = vpop.permute.xlu1 %1842  ;;  %v1841_v52 = vpop.permute.xlu0 %1840  ;;  %v4057_v3 = vadd.f32 %v4056_v46, %v4055_v45 }
 0x236   : > { %1863 = vst.msk [vmem:[#allocation2 + $0x98] sm:$0xf] %vm580_vm4, %v1843_v59  ;;  %1862 = vst.msk [vmem:[#allocation2 + $0x88] sm:$0xf] %vm580_vm4, %v1841_v52  ;;  %v4058_v50 = vpop.f32.mrf.mxu0 }
 0x237   : > { %v2733_v20 = vadd.f32 %v4057_v3, %v5126_v30 }
 0x238   : > { %v4059_v5 = vpop.f32.mrf.mxu0 }
 0x239   : > { %v1925_v53 = vpop.permute.xlu1 %1924  ;;  %v1923_v54 = vpop.permute.xlu0 %1922  ;;  %v4060_v6 = vadd.f32 %v4059_v5, %v4058_v50 }
 0x23a   : > { %1945 = vst.msk [vmem:[#allocation2 + $0x98] sm:$0xf] %vm663_vm5, %v1925_v53  ;;  %1944 = vst.msk [vmem:[#allocation2 + $0x88] sm:$0xf] %vm663_vm5, %v1923_v54 }
 0x23b   : > { %v2736_v12 = vadd.f32 %v4060_v6, %v5126_v30 }
 0x23d   : > { %v2007_v33 = vpop.permute.xlu1 %2006  ;;  %v2005_v9 = vpop.permute.xlu0 %2004 }
 0x23e   : > { %2027 = vst.msk [vmem:[#allocation2 + $0x98] sm:$0xf] %vm746_vm6, %v2007_v33  ;;  %2026 = vst.msk [vmem:[#allocation2 + $0x88] sm:$0xf] %vm746_vm6, %v2005_v9 }
 0x241   : > { %v2233_v55 = vpop.permute.xlu1 %2232  ;;  %v2231_v58 = vpop.permute.xlu0 %2230 }
 0x242   : > { %2253 = vst.msk [vmem:[#allocation2 + $0x9c] sm:$0xf] %vm331_vm1, %v2233_v55  ;;  %2252 = vst.msk [vmem:[#allocation2 + $0x8c] sm:$0xf] %vm331_vm1, %v2231_v58 }
 0x245   : > { %v2089_v60 = vpop.permute.xlu1 %2088  ;;  %v2087_v62 = vpop.permute.xlu0 %2086 }
 0x246   : > { %2109 = vst.msk [vmem:[#allocation2 + $0x98] sm:$0xf] %vm829_vm7, %v2089_v60  ;;  %2108 = vst.msk [vmem:[#allocation2 + $0x88] sm:$0xf] %vm829_vm7, %v2087_v62 }
 0x249   : > { %v2315_v0 = vpop.permute.xlu1 %2314  ;;  %v2313_v1 = vpop.permute.xlu0 %2312 }
 0x24a   : > { %2335 = vst.msk [vmem:[#allocation2 + $0x9c] sm:$0xf] %vm414_vm2, %v2315_v0  ;;  %2334 = vst.msk [vmem:[#allocation2 + $0x8c] sm:$0xf] %vm414_vm2, %v2313_v1 }
 0x24d   : > { %v4160_v2 = vld [vmem:[#allocation2 + $0x88] ss:$16 sps:$4 sm:$0xff]  }
 0x251   : > { %v4158_v21 = vld [vmem:[#allocation2 + $0x8c] ss:$16 sps:$4 sm:$0xff]  }
 0x252   : > { %3760 = vmatprep.mubr.msk.bf16.mxu1 %vm2674_vm8, %v4158_v21 }
 0x253   : > { %2828 = vmatmul.mubr.bf16.gmra.mxu1 %v4160_v2 }
 0x269   : > { %v2805_v7 = vpop.f32.mrf.mxu1 }
 0x26a   : > { %v2806_v8 = vadd.f32 %v2805_v7, %v2733_v20 }
 0x26b   : > { %v2807_v10 = vpop.f32.mrf.mxu1 }
 0x26c   : > { %v2838_v11 = vmax.f32 %v2806_v8, 0.0 }
 0x26d   : > { %v2808_v13 = vpop.f32.mrf.mxu1 }
 0x26e   : > { %2851 = vst.msk [vmem:[%s5135_s5 + $0xe] sm:$0x3] %vm2850_vm11, %v2838_v11  ;;  %v2809_v14 = vadd.f32 %v2808_v13, %v2736_v12 }
 0x26f   : > { %2853 = vst.msk [vmem:[%s5135_s5 + $0xc] sm:$0xf0] %vm2852_vm12, %v2838_v11  ;;  %v2810_v17 = vpop.f32.mrf.mxu1 }
 0x270   : > { %v2839_v18 = vmax.f32 %v2809_v14, 0.0 }
 0x271   : > { %v4061_v19 = vpop.f32.mrf.mxu0 }
 0x272   : > { %2854 = vst.msk [vmem:[%s5135_s5 + $0x14] sm:$0xf] %vm248_vm0, %v2839_v18 }
 0x273   : > { %2856 = vst.msk [vmem:[%s5135_s5 + $0x12] sm:$0xc0] %vm2855_vm13, %v2839_v18  ;;  %v4062_v29 = vpop.f32.mrf.mxu0 }
 0x274   : > { %v4063_v23 = vadd.f32 %v4062_v29, %v4061_v19 }
 0x275   : > { %v4064_v22 = vpop.f32.mrf.mxu0 }
 0x276   : > { %v2741_v24 = vadd.f32 %v4063_v23, %v5126_v30 }
 0x277   : > { %v4065_v47 = vpop.f32.mrf.mxu0 }
 0x278   : > { %v4066_v63 = vadd.f32 %v4065_v47, %v4064_v22 }
 0x27a   : > { %v2744_v31 = vadd.f32 %v4066_v63, %v5126_v30 }
 0x2a8   : > { %v2813_v25 = vpop.f32.mrf.mxu1 }
 0x2a9   : > { %v2814_v57 = vadd.f32 %v2813_v25, %v2741_v24 }
 0x2aa   : > { %v2815_v27 = vpop.f32.mrf.mxu1 }
 0x2ab   : > { %v2840_v28 = vmax.f32 %v2814_v57, 0.0 }
 0x2ac   : > { %v2816_v32 = vpop.f32.mrf.mxu1 }
 0x2ad   : > { %2858 = vst.msk [vmem:[%s5135_s5 + $0x1a] sm:$0x3f] %vm2857_vm14, %v2840_v28  ;;  %v2817_v34 = vadd.f32 %v2816_v32, %v2744_v31 }
 0x2ae   : > { %v2818_v35 = vpop.f32.mrf.mxu1 }
 0x2af   : > { %v2841_v37 = vmax.f32 %v2817_v34, 0.0 }
 0x2b0   : > { %v4067_v38 = vpop.f32.mrf.mxu0 }
 0x2b1   : > { %2859 = vst.msk [vmem:[%s5135_s5 + $0x20] sm:$0xff] %vm2846_vm9, %v2841_v37 }
 0x2b2   : > { %v4068_v39 = vpop.f32.mrf.mxu0 }
 0x2b3   : > { %v4069_v41 = vadd.f32 %v4068_v39, %v4067_v38 }
 0x2b4   : > { %v4070_v40 = vpop.f32.mrf.mxu0 }
 0x2b5   : > { %v2749_v61 = vadd.f32 %v4069_v41, %v5126_v30 }
 0x2b6   : > { %v4071_v26 = vpop.f32.mrf.mxu0 }
 0x2b7   : > { %v4072_v56 = vadd.f32 %v4071_v26, %v4070_v40 }
 0x2b9   : > { %v2752_v44 = vadd.f32 %v4072_v56, %v5126_v30 }
 0x2e8   : > { %v2821_v15 = vpop.f32.mrf.mxu1 }
 0x2e9   : > { %v2822_v16 = vadd.f32 %v2821_v15, %v2749_v61 }
 0x2ea   : > { %v2823_v42 = vpop.f32.mrf.mxu1 }
 0x2eb   : > { %v2842_v43 = vmax.f32 %v2822_v16, 0.0 }
 0x2ec   : > { %v2824_v36 = vpop.f32.mrf.mxu1 }
 0x2ed   : > { %2860 = vst.msk [vmem:[%s5135_s5 + $0x26] sm:$0xfc] %vm2848_vm10, %v2842_v43  ;;  %v2825_v48 = vadd.f32 %v2824_v36, %v2752_v44 }
 0x2ee   : > { %v2826_v49 = vpop.f32.mrf.mxu1 }
 0x2ef   : > { %v2843_v4 = vmax.f32 %v2825_v48, 0.0 }
 0x2f0   : > { %v4073_v51 = vpop.f32.mrf.mxu0 }
 0x2f1   : > { %2861 = vst.msk [vmem:[%s5135_s5 + $0x2e] sm:$0x3] %vm2850_vm11, %v2843_v4 }
 0x2f2   : > { %2862 = vst.msk [vmem:[%s5135_s5 + $0x2c] sm:$0xf0] %vm2852_vm12, %v2843_v4  ;;  %v4074_v59 = vpop.f32.mrf.mxu0 }
 0x2f3   : > { %v4075_v53 = vadd.f32 %v4074_v59, %v4073_v51 }
 0x2f4   : > { %v4076_v52 = vpop.f32.mrf.mxu0 }
 0x2f5   : > { %v2757_v9 = vadd.f32 %v4075_v53, %v5126_v30 }
 0x2f6   : > { %v4077_v54 = vpop.f32.mrf.mxu0 }
 0x2f7   : > { %v4078_v33 = vadd.f32 %v4077_v54, %v4076_v52 }
 0x2f9   : > { %v2760_v0 = vadd.f32 %v4078_v33, %v5126_v30 }
 0x313   : > { %v2829_v55 = vpop.f32.mrf.mxu1 }
 0x314   : > { %v2830_v58 = vadd.f32 %v2829_v55, %v2757_v9 }
 0x315   : > { %v2831_v60 = vpop.f32.mrf.mxu1 }
 0x316   : > { %v2844_v62 = vmax.f32 %v2830_v58, 0.0 }
 0x317   : > { %v2832_v1 = vpop.f32.mrf.mxu1 }
 0x318   : > { %2863 = vst.msk [vmem:[%s5135_s5 + $0x34] sm:$0xf] %vm248_vm0, %v2844_v62  ;;  %v2833_v21 = vadd.f32 %v2832_v1, %v2760_v0 }
 0x319   : > { %2864 = vst.msk [vmem:[%s5135_s5 + $0x32] sm:$0xc0] %vm2855_vm13, %v2844_v62  ;;  %v2834_v2 = vpop.f32.mrf.mxu1 }
 0x31a   : > { %v2845_v45 = vmax.f32 %v2833_v21, 0.0 }
 0x31c   : > { %2865 = vst.msk [vmem:[%s5135_s5 + $0x3a] sm:$0x3f] %vm2857_vm14, %v2845_v45 }
 0x31d PF: > { %s13_s14 = sadd.s32 1, %s4183_s14   ;;  %s5204_s12 = smov %s4179_s13 }
 0x31e   : > { %p10_p5 = scmp.ge.s32.totalorder %s13_s14, 6   ;;  %s5205_s13 = smov %s5207_s15 }
 0x320   :  { %12 = sbr.rel (!%p10_p5) target bundleno = 2 (0x2), region = 86 }

</bundles_post_ra>
